<compile_context>
chip_gen: v7x
topology: tpu7x:2x2x1
jax: 0.10.0
libtpu: 0.0.40
codegen_flags: <defaults>
</compile_context>

<pallas_src>
import math
import jax
import jax.numpy as jnp
from jax.experimental import pallas as pl
from jax.experimental.pallas import tpu as pltpu

# ---- small, BERT-shaped, lane-dense config --------------------------------------
B, S, H = 2, 8, 128          # batch, seq_len, hidden (H multiple of 128 -> lane-dense)
BS = B * S
NUM_HEADS = 4
HEAD_DIM = H // NUM_HEADS    # 32
INTERMEDIATE = 512           # 4*H, lane-dense
NUM_LAYERS = 2
VOCAB = 30
TYPE_VOCAB = 2
MAX_POS = 16
LN_EPS = 1e-12               # BertLayerNorm eps


def _layernorm(x, gamma, beta):
    mu = jnp.mean(x, axis=-1, keepdims=True)
    var = jnp.mean((x - mu) ** 2, axis=-1, keepdims=True)
    return (x - mu) * jax.lax.rsqrt(var + LN_EPS) * gamma + beta


def _split_heads(x2d):
    # (B*S, H) -> (NUM_HEADS*B, S, HEAD_DIM)  [head-major merged batch axis]
    parts = [x2d[:, n * HEAD_DIM:(n + 1) * HEAD_DIM].reshape(B, S, HEAD_DIM)
             for n in range(NUM_HEADS)]
    return jnp.concatenate(parts, axis=0)


def _merge_heads(ctx):
    # (NUM_HEADS*B, S, HEAD_DIM) -> (B*S, H)
    parts = [ctx[n * B:(n + 1) * B].reshape(BS, HEAD_DIM) for n in range(NUM_HEADS)]
    return jnp.concatenate(parts, axis=-1)


# ---- single Pallas kernel: embedding LN + full transformer stack -----------------
def bert_stack_kernel(x_ref, bias_ref, emb_g_ref, emb_b_ref,
                      wqkv_ref, bqkv_ref, wo_ref, bo_ref, g1_ref, be1_ref,
                      w1_ref, b1_ref, w2_ref, b2_ref, g2_ref, be2_ref,
                      out_ref):
    # Embedding LayerNorm fused here (was a separate pallas_call).
    h = _layernorm(x_ref[...], emb_g_ref[...], emb_b_ref[...])     # (B*S, H) f32
    bias = bias_ref[...]                                           # (NH*B, 1, S) f32, loop-invariant
    scale = 1.0 / math.sqrt(HEAD_DIM)
    bf16 = jnp.bfloat16

    for l in range(NUM_LAYERS):                  # static unroll; all weights resident in VMEM
        # --- fused QKV: one lane-dense (B*S,H)x(H,3H) matmul, bf16 operands, f32 acc
        qkv = (jnp.dot(h.astype(bf16), wqkv_ref[l],
                       preferred_element_type=jnp.float32) + bqkv_ref[l])
        q, k, v = qkv[:, :H], qkv[:, H:2 * H], qkv[:, 2 * H:]

        qh = _split_heads(q).astype(bf16)        # (NH*B, S, HD)
        kh = _split_heads(k).astype(bf16)
        vh = _split_heads(v).astype(bf16)

        # --- one batched attention over the merged (NUM_HEADS*B) axis
        s = (jnp.einsum('bqd,bkd->bqk', qh, kh,
                        preferred_element_type=jnp.float32) * scale + bias)
        s = s - jnp.max(s, axis=-1, keepdims=True)
        p = jnp.exp(s)
        p = p * pl.reciprocal(jnp.sum(p, axis=-1, keepdims=True), approx=True)
        ctx = jnp.einsum('bqk,bkd->bqd', p.astype(bf16), vh,
                         preferred_element_type=jnp.float32)

        attn = (jnp.dot(_merge_heads(ctx).astype(bf16), wo_ref[l],
                        preferred_element_type=jnp.float32) + bo_ref[l])
        h1 = _layernorm(h + attn, g1_ref[l], be1_ref[l])

        # --- FFN
        ff = (jnp.dot(h1.astype(bf16), w1_ref[l],
                      preferred_element_type=jnp.float32) + b1_ref[l])
        # TODO(synk): HF BERT uses exact erf-GELU; tanh-approx GELU used here (Mosaic-friendly).
        ff = jax.nn.gelu(ff, approximate=True)
        ff = (jnp.dot(ff.astype(bf16), w2_ref[l],
                      preferred_element_type=jnp.float32) + b2_ref[l])
        h = _layernorm(h1 + ff, g2_ref[l], be2_ref[l])

    out_ref[...] = h                             # lane-dense (B*S, H) store


LAYER_PARAM_NAMES = ('wqkv', 'bqkv', 'wo', 'bo', 'g1', 'be1',
                     'w1', 'b1', 'w2', 'b2', 'g2', 'be2')


# ---- wrapper: BERTSentenceEncoder.forward(tokens, mask) --------------------------
def bert_encoder_forward(tokens, mask, params):
    # Embedding gathers (word + position + token_type) are gather glue in XLA.
    # TODO(synk): token_type_ids assumed all-zero (single-segment inputs).
    emb = (params['word_emb'][tokens]
           + params['pos_emb'][None, :S, :]
           + params['type_emb'][0][None, None, :]).astype(jnp.float32)
    x = emb.reshape(BS, H)                                      # lane-dense [B*S, H]

    # HF-style additive mask, pre-broadcast per (head, batch) in the wrapper.
    mask_bias = (1.0 - mask.astype(jnp.float32)) * -1e9         # (B, S)
    bias = jnp.broadcast_to(mask_bias[None, :, :],
                            (NUM_HEADS, B, S)).reshape(NUM_HEADS * B, 1, S)

    layer_args = [params[name] for name in LAYER_PARAM_NAMES]
    vmem = pl.BlockSpec(memory_space=pltpu.MemorySpace.VMEM)

    out = pl.pallas_call(
        bert_stack_kernel,
        out_shape=jax.ShapeDtypeStruct((BS, H), jnp.float32),
        in_specs=[vmem] * (4 + len(layer_args)),
        out_specs=vmem,
        input_output_aliases={0: 0},     # reuse the embedding slab as the output buffer
    )(x, bias, params['emb_ln_g'], params['emb_ln_b'], *layer_args)

    # lexical_dropout == 0 -> identity (matches the module's `lambda x: x` path).
    return out.reshape(B, S, H)


# ---- deterministic synthetic parameters ------------------------------------------
def init_params(key):
    keys = jax.random.split(key, 8)
    ki = iter(keys)

    def nrm(shape, dtype=jnp.float32):
        return (0.02 * jax.random.normal(next(ki), shape, dtype=jnp.float32)).astype(dtype)

    L = NUM_LAYERS
    bf = jnp.bfloat16
    return {
        'word_emb': nrm((VOCAB, H)),
        'pos_emb':  nrm((MAX_POS, H)),
        'type_emb': nrm((TYPE_VOCAB, H)),
        'emb_ln_g': jnp.ones((1, H), jnp.float32),
        'emb_ln_b': jnp.zeros((1, H), jnp.float32),
        # per-layer stacked weights; matmul weights stored bf16 (MXU operands),
        # biases / LayerNorm params stay f32.
        'wqkv': nrm((L, H, 3 * H), bf),
        'bqkv': jnp.zeros((L, 1, 3 * H), jnp.float32),
        'wo':   nrm((L, H, H), bf),
        'bo':   jnp.zeros((L, 1, H), jnp.float32),
        'g1':   jnp.ones((L, 1, H), jnp.float32),
        'be1':  jnp.zeros((L, 1, H), jnp.float32),
        'w1':   nrm((L, H, INTERMEDIATE), bf),
        'b1':   jnp.zeros((L, 1, INTERMEDIATE), jnp.float32),
        'w2':   nrm((L, INTERMEDIATE, H), bf),
        'b2':   jnp.zeros((L, 1, H), jnp.float32),
        'g2':   jnp.ones((L, 1, H), jnp.float32),
        'be2':  jnp.zeros((L, 1, H), jnp.float32),
    }


if __name__ == "__main__":
    key = jax.random.PRNGKey(0)
    pkey, tkey = jax.random.split(key)
    params = init_params(pkey)

    tokens = jax.random.randint(tkey, (B, S), 0, VOCAB, dtype=jnp.int32)
    # second sentence has 3 padding positions
    mask = jnp.array([[1] * S, [1] * 5 + [0] * 3], dtype=jnp.int32)

    out = bert_encoder_forward(tokens, mask, params)
    out = jax.block_until_ready(out)
    assert out.shape == (B, S, H) and out.dtype == jnp.float32
    assert bool(jnp.all(jnp.isfinite(out)))
    print("KERNEL_OK")
</pallas_src>

<mosaic_0001>
module attributes {stable_mosaic.version = 11 : i64} {
  func.func @bert_stack_kernel(%arg0: memref<16x128xf32, #tpu.memory_space<vmem>>, %arg1: memref<8x1x8xf32, #tpu.memory_space<vmem>>, %arg2: memref<1x128xf32, #tpu.memory_space<vmem>>, %arg3: memref<1x128xf32, #tpu.memory_space<vmem>>, %arg4: memref<2x128x384xbf16, #tpu.memory_space<vmem>>, %arg5: memref<2x1x384xf32, #tpu.memory_space<vmem>>, %arg6: memref<2x128x128xbf16, #tpu.memory_space<vmem>>, %arg7: memref<2x1x128xf32, #tpu.memory_space<vmem>>, %arg8: memref<2x1x128xf32, #tpu.memory_space<vmem>>, %arg9: memref<2x1x128xf32, #tpu.memory_space<vmem>>, %arg10: memref<2x128x512xbf16, #tpu.memory_space<vmem>>, %arg11: memref<2x1x512xf32, #tpu.memory_space<vmem>>, %arg12: memref<2x512x128xbf16, #tpu.memory_space<vmem>>, %arg13: memref<2x1x128xf32, #tpu.memory_space<vmem>>, %arg14: memref<2x1x128xf32, #tpu.memory_space<vmem>>, %arg15: memref<2x1x128xf32, #tpu.memory_space<vmem>>, %arg16: memref<16x128xf32, #tpu.memory_space<vmem>>) attributes {dimension_semantics = [], scalar_prefetch = 0 : i64, scratch_operands = 0 : i64, tpu.core_type = #tpu.core_type<tc>} {
    %c0 = arith.constant 0 : index
    %c0_0 = arith.constant 0 : index
    %0 = vector.load %arg0[%c0, %c0_0] : memref<16x128xf32, #tpu.memory_space<vmem>>, vector<16x128xf32>
    %c0_1 = arith.constant 0 : index
    %c0_2 = arith.constant 0 : index
    %1 = vector.load %arg2[%c0_1, %c0_2] : memref<1x128xf32, #tpu.memory_space<vmem>>, vector<1x128xf32>
    %c0_3 = arith.constant 0 : index
    %c0_4 = arith.constant 0 : index
    %2 = vector.load %arg3[%c0_3, %c0_4] : memref<1x128xf32, #tpu.memory_space<vmem>>, vector<1x128xf32>
    %cst = arith.constant dense<0.000000e+00> : vector<16xf32>
    %3 = vector.multi_reduction <add>, %0, %cst [1] : vector<16x128xf32> to vector<16xf32>
    %4 = vector.shape_cast %3 : vector<16xf32> to vector<16x1xf32>
    %cst_5 = arith.constant 1.280000e+02 : f32
    %5 = vector.broadcast %cst_5 : f32 to vector<16x1xf32>
    %6 = arith.divf %4, %5 : vector<16x1xf32>
    %7 = vector.broadcast %6 : vector<16x1xf32> to vector<16x128xf32>
    %8 = arith.subf %0, %7 : vector<16x128xf32>
    %9 = arith.mulf %8, %8 : vector<16x128xf32>
    %cst_6 = arith.constant dense<0.000000e+00> : vector<16xf32>
    %10 = vector.multi_reduction <add>, %9, %cst_6 [1] : vector<16x128xf32> to vector<16xf32>
    %11 = vector.shape_cast %10 : vector<16xf32> to vector<16x1xf32>
    %cst_7 = arith.constant 1.280000e+02 : f32
    %12 = vector.broadcast %cst_7 : f32 to vector<16x1xf32>
    %13 = arith.divf %11, %12 : vector<16x1xf32>
    %14 = vector.broadcast %6 : vector<16x1xf32> to vector<16x128xf32>
    %15 = arith.subf %0, %14 : vector<16x128xf32>
    %cst_8 = arith.constant 9.99999996E-13 : f32
    %16 = vector.broadcast %cst_8 : f32 to vector<16x1xf32>
    %17 = arith.addf %13, %16 : vector<16x1xf32>
    %18 = math.rsqrt %17 : vector<16x1xf32>
    %19 = vector.broadcast %18 : vector<16x1xf32> to vector<16x128xf32>
    %20 = arith.mulf %15, %19 : vector<16x128xf32>
    %21 = vector.broadcast %1 : vector<1x128xf32> to vector<16x128xf32>
    %22 = arith.mulf %20, %21 : vector<16x128xf32>
    %23 = vector.broadcast %2 : vector<1x128xf32> to vector<16x128xf32>
    %24 = arith.addf %22, %23 : vector<16x128xf32>
    %c0_9 = arith.constant 0 : index
    %c0_10 = arith.constant 0 : index
    %c0_11 = arith.constant 0 : index
    %25 = vector.load %arg1[%c0_9, %c0_10, %c0_11] : memref<8x1x8xf32, #tpu.memory_space<vmem>>, vector<8x1x8xf32>
    %26 = arith.truncf %24 : vector<16x128xf32> to vector<16x128xbf16>
    %c0_12 = arith.constant 0 : index
    %c0_13 = arith.constant 0 : index
    %c0_14 = arith.constant 0 : index
    %27 = vector.load %arg4[%c0_12, %c0_13, %c0_14] : memref<2x128x384xbf16, #tpu.memory_space<vmem>>, vector<1x128x384xbf16>
    %28 = vector.shape_cast %27 : vector<1x128x384xbf16> to vector<128x384xbf16>
    %cst_15 = arith.constant dense<0.000000e+00> : vector<16x384xf32>
    %29 = tpu.matmul %26, %28, %cst_15 {dimension_numbers = #tpu.dot_dimension_numbers<[1], [0], [0], [1], [0, 0, 1, 1], [], []>} : vector<16x128xbf16>, vector<128x384xbf16>, vector<16x384xf32> -> vector<16x384xf32>
    %c0_16 = arith.constant 0 : index
    %c0_17 = arith.constant 0 : index
    %c0_18 = arith.constant 0 : index
    %30 = vector.load %arg5[%c0_16, %c0_17, %c0_18] : memref<2x1x384xf32, #tpu.memory_space<vmem>>, vector<1x1x384xf32>
    %31 = vector.shape_cast %30 : vector<1x1x384xf32> to vector<1x384xf32>
    %32 = vector.broadcast %31 : vector<1x384xf32> to vector<16x384xf32>
    %33 = arith.addf %29, %32 : vector<16x384xf32>
    %34 = vector.extract_strided_slice %33 {offsets = [0, 0], sizes = [16, 128], strides = [1, 1]} : vector<16x384xf32> to vector<16x128xf32>
    %35 = vector.extract_strided_slice %33 {offsets = [0, 128], sizes = [16, 128], strides = [1, 1]} : vector<16x384xf32> to vector<16x128xf32>
    %36 = vector.extract_strided_slice %33 {offsets = [0, 256], sizes = [16, 128], strides = [1, 1]} : vector<16x384xf32> to vector<16x128xf32>
    %37 = vector.extract_strided_slice %34 {offsets = [0, 0], sizes = [16, 32], strides = [1, 1]} : vector<16x128xf32> to vector<16x32xf32>
    %38 = vector.shape_cast %37 : vector<16x32xf32> to vector<2x8x32xf32>
    %39 = vector.extract_strided_slice %34 {offsets = [0, 32], sizes = [16, 32], strides = [1, 1]} : vector<16x128xf32> to vector<16x32xf32>
    %40 = vector.shape_cast %39 : vector<16x32xf32> to vector<2x8x32xf32>
    %41 = vector.extract_strided_slice %34 {offsets = [0, 64], sizes = [16, 32], strides = [1, 1]} : vector<16x128xf32> to vector<16x32xf32>
    %42 = vector.shape_cast %41 : vector<16x32xf32> to vector<2x8x32xf32>
    %43 = vector.extract_strided_slice %34 {offsets = [0, 96], sizes = [16, 32], strides = [1, 1]} : vector<16x128xf32> to vector<16x32xf32>
    %44 = vector.shape_cast %43 : vector<16x32xf32> to vector<2x8x32xf32>
    %45 = tpu.concatenate %38, %40, %42, %44 in 0 : vector<2x8x32xf32>, vector<2x8x32xf32>, vector<2x8x32xf32>, vector<2x8x32xf32> -> vector<8x8x32xf32>
    %46 = arith.truncf %45 : vector<8x8x32xf32> to vector<8x8x32xbf16>
    %47 = vector.extract_strided_slice %35 {offsets = [0, 0], sizes = [16, 32], strides = [1, 1]} : vector<16x128xf32> to vector<16x32xf32>
    %48 = vector.shape_cast %47 : vector<16x32xf32> to vector<2x8x32xf32>
    %49 = vector.extract_strided_slice %35 {offsets = [0, 32], sizes = [16, 32], strides = [1, 1]} : vector<16x128xf32> to vector<16x32xf32>
    %50 = vector.shape_cast %49 : vector<16x32xf32> to vector<2x8x32xf32>
    %51 = vector.extract_strided_slice %35 {offsets = [0, 64], sizes = [16, 32], strides = [1, 1]} : vector<16x128xf32> to vector<16x32xf32>
    %52 = vector.shape_cast %51 : vector<16x32xf32> to vector<2x8x32xf32>
    %53 = vector.extract_strided_slice %35 {offsets = [0, 96], sizes = [16, 32], strides = [1, 1]} : vector<16x128xf32> to vector<16x32xf32>
    %54 = vector.shape_cast %53 : vector<16x32xf32> to vector<2x8x32xf32>
    %55 = tpu.concatenate %48, %50, %52, %54 in 0 : vector<2x8x32xf32>, vector<2x8x32xf32>, vector<2x8x32xf32>, vector<2x8x32xf32> -> vector<8x8x32xf32>
    %56 = arith.truncf %55 : vector<8x8x32xf32> to vector<8x8x32xbf16>
    %57 = vector.extract_strided_slice %36 {offsets = [0, 0], sizes = [16, 32], strides = [1, 1]} : vector<16x128xf32> to vector<16x32xf32>
    %58 = vector.shape_cast %57 : vector<16x32xf32> to vector<2x8x32xf32>
    %59 = vector.extract_strided_slice %36 {offsets = [0, 32], sizes = [16, 32], strides = [1, 1]} : vector<16x128xf32> to vector<16x32xf32>
    %60 = vector.shape_cast %59 : vector<16x32xf32> to vector<2x8x32xf32>
    %61 = vector.extract_strided_slice %36 {offsets = [0, 64], sizes = [16, 32], strides = [1, 1]} : vector<16x128xf32> to vector<16x32xf32>
    %62 = vector.shape_cast %61 : vector<16x32xf32> to vector<2x8x32xf32>
    %63 = vector.extract_strided_slice %36 {offsets = [0, 96], sizes = [16, 32], strides = [1, 1]} : vector<16x128xf32> to vector<16x32xf32>
    %64 = vector.shape_cast %63 : vector<16x32xf32> to vector<2x8x32xf32>
    %65 = tpu.concatenate %58, %60, %62, %64 in 0 : vector<2x8x32xf32>, vector<2x8x32xf32>, vector<2x8x32xf32>, vector<2x8x32xf32> -> vector<8x8x32xf32>
    %66 = arith.truncf %65 : vector<8x8x32xf32> to vector<8x8x32xbf16>
    "tpu.trace_start"() <{level = 10 : i32, message = "bqd,bkd->bqk"}> : () -> ()
    %cst_19 = arith.constant dense<0.000000e+00> : vector<8x8x8xf32>
    %67 = tpu.matmul %46, %56, %cst_19 {dimension_numbers = #tpu.dot_dimension_numbers<[2], [2], [1], [1], [0, 0, 0, 1, 1, 1], [0], [0]>} : vector<8x8x32xbf16>, vector<8x8x32xbf16>, vector<8x8x8xf32> -> vector<8x8x8xf32>
    "tpu.trace_stop"() : () -> ()
    %cst_20 = arith.constant 0.176776692 : f32
    %68 = vector.broadcast %cst_20 : f32 to vector<8x8x8xf32>
    %69 = arith.mulf %67, %68 : vector<8x8x8xf32>
    %70 = vector.broadcast %25 : vector<8x1x8xf32> to vector<8x8x8xf32>
    %71 = arith.addf %69, %70 : vector<8x8x8xf32>
    %cst_21 = arith.constant dense<0xFF800000> : vector<8x8xf32>
    %72 = vector.multi_reduction <maximumf>, %71, %cst_21 [2] : vector<8x8x8xf32> to vector<8x8xf32>
    %73 = vector.shape_cast %72 : vector<8x8xf32> to vector<8x8x1xf32>
    %74 = vector.broadcast %73 : vector<8x8x1xf32> to vector<8x8x8xf32>
    %75 = arith.subf %71, %74 : vector<8x8x8xf32>
    %76 = math.exp %75 : vector<8x8x8xf32>
    %cst_22 = arith.constant dense<0.000000e+00> : vector<8x8xf32>
    %77 = vector.multi_reduction <add>, %76, %cst_22 [2] : vector<8x8x8xf32> to vector<8x8xf32>
    %78 = vector.shape_cast %77 : vector<8x8xf32> to vector<8x8x1xf32>
    %79 = tpu.reciprocal %78 {approx = true} : vector<8x8x1xf32> -> vector<8x8x1xf32>
    %80 = vector.broadcast %79 : vector<8x8x1xf32> to vector<8x8x8xf32>
    %81 = arith.mulf %76, %80 : vector<8x8x8xf32>
    %82 = arith.truncf %81 : vector<8x8x8xf32> to vector<8x8x8xbf16>
    "tpu.trace_start"() <{level = 10 : i32, message = "bqk,bkd->bqd"}> : () -> ()
    %cst_23 = arith.constant dense<0.000000e+00> : vector<8x8x32xf32>
    %83 = tpu.matmul %82, %66, %cst_23 {dimension_numbers = #tpu.dot_dimension_numbers<[2], [1], [1], [2], [0, 0, 0, 1, 1, 2], [0], [0]>} : vector<8x8x8xbf16>, vector<8x8x32xbf16>, vector<8x8x32xf32> -> vector<8x8x32xf32>
    "tpu.trace_stop"() : () -> ()
    %84 = vector.extract_strided_slice %83 {offsets = [0, 0, 0], sizes = [2, 8, 32], strides = [1, 1, 1]} : vector<8x8x32xf32> to vector<2x8x32xf32>
    %85 = vector.shape_cast %84 : vector<2x8x32xf32> to vector<16x32xf32>
    %86 = vector.extract_strided_slice %83 {offsets = [2, 0, 0], sizes = [2, 8, 32], strides = [1, 1, 1]} : vector<8x8x32xf32> to vector<2x8x32xf32>
    %87 = vector.shape_cast %86 : vector<2x8x32xf32> to vector<16x32xf32>
    %88 = vector.extract_strided_slice %83 {offsets = [4, 0, 0], sizes = [2, 8, 32], strides = [1, 1, 1]} : vector<8x8x32xf32> to vector<2x8x32xf32>
    %89 = vector.shape_cast %88 : vector<2x8x32xf32> to vector<16x32xf32>
    %90 = vector.extract_strided_slice %83 {offsets = [6, 0, 0], sizes = [2, 8, 32], strides = [1, 1, 1]} : vector<8x8x32xf32> to vector<2x8x32xf32>
    %91 = vector.shape_cast %90 : vector<2x8x32xf32> to vector<16x32xf32>
    %92 = tpu.concatenate %85, %87, %89, %91 in 1 : vector<16x32xf32>, vector<16x32xf32>, vector<16x32xf32>, vector<16x32xf32> -> vector<16x128xf32>
    %93 = arith.truncf %92 : vector<16x128xf32> to vector<16x128xbf16>
    %c0_24 = arith.constant 0 : index
    %c0_25 = arith.constant 0 : index
    %c0_26 = arith.constant 0 : index
    %94 = vector.load %arg6[%c0_24, %c0_25, %c0_26] : memref<2x128x128xbf16, #tpu.memory_space<vmem>>, vector<1x128x128xbf16>
    %95 = vector.shape_cast %94 : vector<1x128x128xbf16> to vector<128x128xbf16>
    %cst_27 = arith.constant dense<0.000000e+00> : vector<16x128xf32>
    %96 = tpu.matmul %93, %95, %cst_27 {dimension_numbers = #tpu.dot_dimension_numbers<[1], [0], [0], [1], [0, 0, 1, 1], [], []>} : vector<16x128xbf16>, vector<128x128xbf16>, vector<16x128xf32> -> vector<16x128xf32>
    %c0_28 = arith.constant 0 : index
    %c0_29 = arith.constant 0 : index
    %c0_30 = arith.constant 0 : index
    %97 = vector.load %arg7[%c0_28, %c0_29, %c0_30] : memref<2x1x128xf32, #tpu.memory_space<vmem>>, vector<1x1x128xf32>
    %98 = vector.shape_cast %97 : vector<1x1x128xf32> to vector<1x128xf32>
    %99 = vector.broadcast %98 : vector<1x128xf32> to vector<16x128xf32>
    %100 = arith.addf %96, %99 : vector<16x128xf32>
    %101 = arith.addf %24, %100 : vector<16x128xf32>
    %c0_31 = arith.constant 0 : index
    %c0_32 = arith.constant 0 : index
    %c0_33 = arith.constant 0 : index
    %102 = vector.load %arg8[%c0_31, %c0_32, %c0_33] : memref<2x1x128xf32, #tpu.memory_space<vmem>>, vector<1x1x128xf32>
    %103 = vector.shape_cast %102 : vector<1x1x128xf32> to vector<1x128xf32>
    %c0_34 = arith.constant 0 : index
    %c0_35 = arith.constant 0 : index
    %c0_36 = arith.constant 0 : index
    %104 = vector.load %arg9[%c0_34, %c0_35, %c0_36] : memref<2x1x128xf32, #tpu.memory_space<vmem>>, vector<1x1x128xf32>
    %105 = vector.shape_cast %104 : vector<1x1x128xf32> to vector<1x128xf32>
    %cst_37 = arith.constant dense<0.000000e+00> : vector<16xf32>
    %106 = vector.multi_reduction <add>, %101, %cst_37 [1] : vector<16x128xf32> to vector<16xf32>
    %107 = vector.shape_cast %106 : vector<16xf32> to vector<16x1xf32>
    %cst_38 = arith.constant 1.280000e+02 : f32
    %108 = vector.broadcast %cst_38 : f32 to vector<16x1xf32>
    %109 = arith.divf %107, %108 : vector<16x1xf32>
    %110 = vector.broadcast %109 : vector<16x1xf32> to vector<16x128xf32>
    %111 = arith.subf %101, %110 : vector<16x128xf32>
    %112 = arith.mulf %111, %111 : vector<16x128xf32>
    %cst_39 = arith.constant dense<0.000000e+00> : vector<16xf32>
    %113 = vector.multi_reduction <add>, %112, %cst_39 [1] : vector<16x128xf32> to vector<16xf32>
    %114 = vector.shape_cast %113 : vector<16xf32> to vector<16x1xf32>
    %cst_40 = arith.constant 1.280000e+02 : f32
    %115 = vector.broadcast %cst_40 : f32 to vector<16x1xf32>
    %116 = arith.divf %114, %115 : vector<16x1xf32>
    %117 = vector.broadcast %109 : vector<16x1xf32> to vector<16x128xf32>
    %118 = arith.subf %101, %117 : vector<16x128xf32>
    %cst_41 = arith.constant 9.99999996E-13 : f32
    %119 = vector.broadcast %cst_41 : f32 to vector<16x1xf32>
    %120 = arith.addf %116, %119 : vector<16x1xf32>
    %121 = math.rsqrt %120 : vector<16x1xf32>
    %122 = vector.broadcast %121 : vector<16x1xf32> to vector<16x128xf32>
    %123 = arith.mulf %118, %122 : vector<16x128xf32>
    %124 = vector.broadcast %103 : vector<1x128xf32> to vector<16x128xf32>
    %125 = arith.mulf %123, %124 : vector<16x128xf32>
    %126 = vector.broadcast %105 : vector<1x128xf32> to vector<16x128xf32>
    %127 = arith.addf %125, %126 : vector<16x128xf32>
    %128 = arith.truncf %127 : vector<16x128xf32> to vector<16x128xbf16>
    %c0_42 = arith.constant 0 : index
    %c0_43 = arith.constant 0 : index
    %c0_44 = arith.constant 0 : index
    %129 = vector.load %arg10[%c0_42, %c0_43, %c0_44] : memref<2x128x512xbf16, #tpu.memory_space<vmem>>, vector<1x128x512xbf16>
    %130 = vector.shape_cast %129 : vector<1x128x512xbf16> to vector<128x512xbf16>
    %cst_45 = arith.constant dense<0.000000e+00> : vector<16x512xf32>
    %131 = tpu.matmul %128, %130, %cst_45 {dimension_numbers = #tpu.dot_dimension_numbers<[1], [0], [0], [1], [0, 0, 1, 1], [], []>} : vector<16x128xbf16>, vector<128x512xbf16>, vector<16x512xf32> -> vector<16x512xf32>
    %c0_46 = arith.constant 0 : index
    %c0_47 = arith.constant 0 : index
    %c0_48 = arith.constant 0 : index
    %132 = vector.load %arg11[%c0_46, %c0_47, %c0_48] : memref<2x1x512xf32, #tpu.memory_space<vmem>>, vector<1x1x512xf32>
    %133 = vector.shape_cast %132 : vector<1x1x512xf32> to vector<1x512xf32>
    %134 = vector.broadcast %133 : vector<1x512xf32> to vector<16x512xf32>
    %135 = arith.addf %131, %134 : vector<16x512xf32>
    %136 = arith.mulf %135, %135 : vector<16x512xf32>
    %137 = arith.mulf %135, %136 : vector<16x512xf32>
    %cst_49 = arith.constant 4.471500e-02 : f32
    %138 = vector.broadcast %cst_49 : f32 to vector<16x512xf32>
    %139 = arith.mulf %138, %137 : vector<16x512xf32>
    %140 = arith.addf %135, %139 : vector<16x512xf32>
    %cst_50 = arith.constant 0.797884583 : f32
    %141 = vector.broadcast %cst_50 : f32 to vector<16x512xf32>
    %142 = arith.mulf %141, %140 : vector<16x512xf32>
    %143 = math.tanh %142 : vector<16x512xf32>
    %cst_51 = arith.constant 1.000000e+00 : f32
    %144 = vector.broadcast %cst_51 : f32 to vector<16x512xf32>
    %145 = arith.addf %144, %143 : vector<16x512xf32>
    %cst_52 = arith.constant 5.000000e-01 : f32
    %146 = vector.broadcast %cst_52 : f32 to vector<16x512xf32>
    %147 = arith.mulf %146, %145 : vector<16x512xf32>
    %148 = arith.mulf %135, %147 : vector<16x512xf32>
    %149 = arith.truncf %148 : vector<16x512xf32> to vector<16x512xbf16>
    %c0_53 = arith.constant 0 : index
    %c0_54 = arith.constant 0 : index
    %c0_55 = arith.constant 0 : index
    %150 = vector.load %arg12[%c0_53, %c0_54, %c0_55] : memref<2x512x128xbf16, #tpu.memory_space<vmem>>, vector<1x512x128xbf16>
    %151 = vector.shape_cast %150 : vector<1x512x128xbf16> to vector<512x128xbf16>
    %cst_56 = arith.constant dense<0.000000e+00> : vector<16x128xf32>
    %152 = tpu.matmul %149, %151, %cst_56 {dimension_numbers = #tpu.dot_dimension_numbers<[1], [0], [0], [1], [0, 0, 1, 1], [], []>} : vector<16x512xbf16>, vector<512x128xbf16>, vector<16x128xf32> -> vector<16x128xf32>
    %c0_57 = arith.constant 0 : index
    %c0_58 = arith.constant 0 : index
    %c0_59 = arith.constant 0 : index
    %153 = vector.load %arg13[%c0_57, %c0_58, %c0_59] : memref<2x1x128xf32, #tpu.memory_space<vmem>>, vector<1x1x128xf32>
    %154 = vector.shape_cast %153 : vector<1x1x128xf32> to vector<1x128xf32>
    %155 = vector.broadcast %154 : vector<1x128xf32> to vector<16x128xf32>
    %156 = arith.addf %152, %155 : vector<16x128xf32>
    %157 = arith.addf %127, %156 : vector<16x128xf32>
    %c0_60 = arith.constant 0 : index
    %c0_61 = arith.constant 0 : index
    %c0_62 = arith.constant 0 : index
    %158 = vector.load %arg14[%c0_60, %c0_61, %c0_62] : memref<2x1x128xf32, #tpu.memory_space<vmem>>, vector<1x1x128xf32>
    %159 = vector.shape_cast %158 : vector<1x1x128xf32> to vector<1x128xf32>
    %c0_63 = arith.constant 0 : index
    %c0_64 = arith.constant 0 : index
    %c0_65 = arith.constant 0 : index
    %160 = vector.load %arg15[%c0_63, %c0_64, %c0_65] : memref<2x1x128xf32, #tpu.memory_space<vmem>>, vector<1x1x128xf32>
    %161 = vector.shape_cast %160 : vector<1x1x128xf32> to vector<1x128xf32>
    %cst_66 = arith.constant dense<0.000000e+00> : vector<16xf32>
    %162 = vector.multi_reduction <add>, %157, %cst_66 [1] : vector<16x128xf32> to vector<16xf32>
    %163 = vector.shape_cast %162 : vector<16xf32> to vector<16x1xf32>
    %cst_67 = arith.constant 1.280000e+02 : f32
    %164 = vector.broadcast %cst_67 : f32 to vector<16x1xf32>
    %165 = arith.divf %163, %164 : vector<16x1xf32>
    %166 = vector.broadcast %165 : vector<16x1xf32> to vector<16x128xf32>
    %167 = arith.subf %157, %166 : vector<16x128xf32>
    %168 = arith.mulf %167, %167 : vector<16x128xf32>
    %cst_68 = arith.constant dense<0.000000e+00> : vector<16xf32>
    %169 = vector.multi_reduction <add>, %168, %cst_68 [1] : vector<16x128xf32> to vector<16xf32>
    %170 = vector.shape_cast %169 : vector<16xf32> to vector<16x1xf32>
    %cst_69 = arith.constant 1.280000e+02 : f32
    %171 = vector.broadcast %cst_69 : f32 to vector<16x1xf32>
    %172 = arith.divf %170, %171 : vector<16x1xf32>
    %173 = vector.broadcast %165 : vector<16x1xf32> to vector<16x128xf32>
    %174 = arith.subf %157, %173 : vector<16x128xf32>
    %cst_70 = arith.constant 9.99999996E-13 : f32
    %175 = vector.broadcast %cst_70 : f32 to vector<16x1xf32>
    %176 = arith.addf %172, %175 : vector<16x1xf32>
    %177 = math.rsqrt %176 : vector<16x1xf32>
    %178 = vector.broadcast %177 : vector<16x1xf32> to vector<16x128xf32>
    %179 = arith.mulf %174, %178 : vector<16x128xf32>
    %180 = vector.broadcast %159 : vector<1x128xf32> to vector<16x128xf32>
    %181 = arith.mulf %179, %180 : vector<16x128xf32>
    %182 = vector.broadcast %161 : vector<1x128xf32> to vector<16x128xf32>
    %183 = arith.addf %181, %182 : vector<16x128xf32>
    %184 = arith.truncf %183 : vector<16x128xf32> to vector<16x128xbf16>
    %c1 = arith.constant 1 : index
    %c0_71 = arith.constant 0 : index
    %c0_72 = arith.constant 0 : index
    %185 = vector.load %arg4[%c1, %c0_71, %c0_72] : memref<2x128x384xbf16, #tpu.memory_space<vmem>>, vector<1x128x384xbf16>
    %186 = vector.shape_cast %185 : vector<1x128x384xbf16> to vector<128x384xbf16>
    %cst_73 = arith.constant dense<0.000000e+00> : vector<16x384xf32>
    %187 = tpu.matmul %184, %186, %cst_73 {dimension_numbers = #tpu.dot_dimension_numbers<[1], [0], [0], [1], [0, 0, 1, 1], [], []>} : vector<16x128xbf16>, vector<128x384xbf16>, vector<16x384xf32> -> vector<16x384xf32>
    %c1_74 = arith.constant 1 : index
    %c0_75 = arith.constant 0 : index
    %c0_76 = arith.constant 0 : index
    %188 = vector.load %arg5[%c1_74, %c0_75, %c0_76] : memref<2x1x384xf32, #tpu.memory_space<vmem>>, vector<1x1x384xf32>
    %189 = vector.shape_cast %188 : vector<1x1x384xf32> to vector<1x384xf32>
    %190 = vector.broadcast %189 : vector<1x384xf32> to vector<16x384xf32>
    %191 = arith.addf %187, %190 : vector<16x384xf32>
    %192 = vector.extract_strided_slice %191 {offsets = [0, 0], sizes = [16, 128], strides = [1, 1]} : vector<16x384xf32> to vector<16x128xf32>
    %193 = vector.extract_strided_slice %191 {offsets = [0, 128], sizes = [16, 128], strides = [1, 1]} : vector<16x384xf32> to vector<16x128xf32>
    %194 = vector.extract_strided_slice %191 {offsets = [0, 256], sizes = [16, 128], strides = [1, 1]} : vector<16x384xf32> to vector<16x128xf32>
    %195 = vector.extract_strided_slice %192 {offsets = [0, 0], sizes = [16, 32], strides = [1, 1]} : vector<16x128xf32> to vector<16x32xf32>
    %196 = vector.shape_cast %195 : vector<16x32xf32> to vector<2x8x32xf32>
    %197 = vector.extract_strided_slice %192 {offsets = [0, 32], sizes = [16, 32], strides = [1, 1]} : vector<16x128xf32> to vector<16x32xf32>
    %198 = vector.shape_cast %197 : vector<16x32xf32> to vector<2x8x32xf32>
    %199 = vector.extract_strided_slice %192 {offsets = [0, 64], sizes = [16, 32], strides = [1, 1]} : vector<16x128xf32> to vector<16x32xf32>
    %200 = vector.shape_cast %199 : vector<16x32xf32> to vector<2x8x32xf32>
    %201 = vector.extract_strided_slice %192 {offsets = [0, 96], sizes = [16, 32], strides = [1, 1]} : vector<16x128xf32> to vector<16x32xf32>
    %202 = vector.shape_cast %201 : vector<16x32xf32> to vector<2x8x32xf32>
    %203 = tpu.concatenate %196, %198, %200, %202 in 0 : vector<2x8x32xf32>, vector<2x8x32xf32>, vector<2x8x32xf32>, vector<2x8x32xf32> -> vector<8x8x32xf32>
    %204 = arith.truncf %203 : vector<8x8x32xf32> to vector<8x8x32xbf16>
    %205 = vector.extract_strided_slice %193 {offsets = [0, 0], sizes = [16, 32], strides = [1, 1]} : vector<16x128xf32> to vector<16x32xf32>
    %206 = vector.shape_cast %205 : vector<16x32xf32> to vector<2x8x32xf32>
    %207 = vector.extract_strided_slice %193 {offsets = [0, 32], sizes = [16, 32], strides = [1, 1]} : vector<16x128xf32> to vector<16x32xf32>
    %208 = vector.shape_cast %207 : vector<16x32xf32> to vector<2x8x32xf32>
    %209 = vector.extract_strided_slice %193 {offsets = [0, 64], sizes = [16, 32], strides = [1, 1]} : vector<16x128xf32> to vector<16x32xf32>
    %210 = vector.shape_cast %209 : vector<16x32xf32> to vector<2x8x32xf32>
    %211 = vector.extract_strided_slice %193 {offsets = [0, 96], sizes = [16, 32], strides = [1, 1]} : vector<16x128xf32> to vector<16x32xf32>
    %212 = vector.shape_cast %211 : vector<16x32xf32> to vector<2x8x32xf32>
    %213 = tpu.concatenate %206, %208, %210, %212 in 0 : vector<2x8x32xf32>, vector<2x8x32xf32>, vector<2x8x32xf32>, vector<2x8x32xf32> -> vector<8x8x32xf32>
    %214 = arith.truncf %213 : vector<8x8x32xf32> to vector<8x8x32xbf16>
    %215 = vector.extract_strided_slice %194 {offsets = [0, 0], sizes = [16, 32], strides = [1, 1]} : vector<16x128xf32> to vector<16x32xf32>
    %216 = vector.shape_cast %215 : vector<16x32xf32> to vector<2x8x32xf32>
    %217 = vector.extract_strided_slice %194 {offsets = [0, 32], sizes = [16, 32], strides = [1, 1]} : vector<16x128xf32> to vector<16x32xf32>
    %218 = vector.shape_cast %217 : vector<16x32xf32> to vector<2x8x32xf32>
    %219 = vector.extract_strided_slice %194 {offsets = [0, 64], sizes = [16, 32], strides = [1, 1]} : vector<16x128xf32> to vector<16x32xf32>
    %220 = vector.shape_cast %219 : vector<16x32xf32> to vector<2x8x32xf32>
    %221 = vector.extract_strided_slice %194 {offsets = [0, 96], sizes = [16, 32], strides = [1, 1]} : vector<16x128xf32> to vector<16x32xf32>
    %222 = vector.shape_cast %221 : vector<16x32xf32> to vector<2x8x32xf32>
    %223 = tpu.concatenate %216, %218, %220, %222 in 0 : vector<2x8x32xf32>, vector<2x8x32xf32>, vector<2x8x32xf32>, vector<2x8x32xf32> -> vector<8x8x32xf32>
    %224 = arith.truncf %223 : vector<8x8x32xf32> to vector<8x8x32xbf16>
    "tpu.trace_start"() <{level = 10 : i32, message = "bqd,bkd->bqk"}> : () -> ()
    %cst_77 = arith.constant dense<0.000000e+00> : vector<8x8x8xf32>
    %225 = tpu.matmul %204, %214, %cst_77 {dimension_numbers = #tpu.dot_dimension_numbers<[2], [2], [1], [1], [0, 0, 0, 1, 1, 1], [0], [0]>} : vector<8x8x32xbf16>, vector<8x8x32xbf16>, vector<8x8x8xf32> -> vector<8x8x8xf32>
    "tpu.trace_stop"() : () -> ()
    %cst_78 = arith.constant 0.176776692 : f32
    %226 = vector.broadcast %cst_78 : f32 to vector<8x8x8xf32>
    %227 = arith.mulf %225, %226 : vector<8x8x8xf32>
    %228 = vector.broadcast %25 : vector<8x1x8xf32> to vector<8x8x8xf32>
    %229 = arith.addf %227, %228 : vector<8x8x8xf32>
    %cst_79 = arith.constant dense<0xFF800000> : vector<8x8xf32>
    %230 = vector.multi_reduction <maximumf>, %229, %cst_79 [2] : vector<8x8x8xf32> to vector<8x8xf32>
    %231 = vector.shape_cast %230 : vector<8x8xf32> to vector<8x8x1xf32>
    %232 = vector.broadcast %231 : vector<8x8x1xf32> to vector<8x8x8xf32>
    %233 = arith.subf %229, %232 : vector<8x8x8xf32>
    %234 = math.exp %233 : vector<8x8x8xf32>
    %cst_80 = arith.constant dense<0.000000e+00> : vector<8x8xf32>
    %235 = vector.multi_reduction <add>, %234, %cst_80 [2] : vector<8x8x8xf32> to vector<8x8xf32>
    %236 = vector.shape_cast %235 : vector<8x8xf32> to vector<8x8x1xf32>
    %237 = tpu.reciprocal %236 {approx = true} : vector<8x8x1xf32> -> vector<8x8x1xf32>
    %238 = vector.broadcast %237 : vector<8x8x1xf32> to vector<8x8x8xf32>
    %239 = arith.mulf %234, %238 : vector<8x8x8xf32>
    %240 = arith.truncf %239 : vector<8x8x8xf32> to vector<8x8x8xbf16>
    "tpu.trace_start"() <{level = 10 : i32, message = "bqk,bkd->bqd"}> : () -> ()
    %cst_81 = arith.constant dense<0.000000e+00> : vector<8x8x32xf32>
    %241 = tpu.matmul %240, %224, %cst_81 {dimension_numbers = #tpu.dot_dimension_numbers<[2], [1], [1], [2], [0, 0, 0, 1, 1, 2], [0], [0]>} : vector<8x8x8xbf16>, vector<8x8x32xbf16>, vector<8x8x32xf32> -> vector<8x8x32xf32>
    "tpu.trace_stop"() : () -> ()
    %242 = vector.extract_strided_slice %241 {offsets = [0, 0, 0], sizes = [2, 8, 32], strides = [1, 1, 1]} : vector<8x8x32xf32> to vector<2x8x32xf32>
    %243 = vector.shape_cast %242 : vector<2x8x32xf32> to vector<16x32xf32>
    %244 = vector.extract_strided_slice %241 {offsets = [2, 0, 0], sizes = [2, 8, 32], strides = [1, 1, 1]} : vector<8x8x32xf32> to vector<2x8x32xf32>
    %245 = vector.shape_cast %244 : vector<2x8x32xf32> to vector<16x32xf32>
    %246 = vector.extract_strided_slice %241 {offsets = [4, 0, 0], sizes = [2, 8, 32], strides = [1, 1, 1]} : vector<8x8x32xf32> to vector<2x8x32xf32>
    %247 = vector.shape_cast %246 : vector<2x8x32xf32> to vector<16x32xf32>
    %248 = vector.extract_strided_slice %241 {offsets = [6, 0, 0], sizes = [2, 8, 32], strides = [1, 1, 1]} : vector<8x8x32xf32> to vector<2x8x32xf32>
    %249 = vector.shape_cast %248 : vector<2x8x32xf32> to vector<16x32xf32>
    %250 = tpu.concatenate %243, %245, %247, %249 in 1 : vector<16x32xf32>, vector<16x32xf32>, vector<16x32xf32>, vector<16x32xf32> -> vector<16x128xf32>
    %251 = arith.truncf %250 : vector<16x128xf32> to vector<16x128xbf16>
    %c1_82 = arith.constant 1 : index
    %c0_83 = arith.constant 0 : index
    %c0_84 = arith.constant 0 : index
    %252 = vector.load %arg6[%c1_82, %c0_83, %c0_84] : memref<2x128x128xbf16, #tpu.memory_space<vmem>>, vector<1x128x128xbf16>
    %253 = vector.shape_cast %252 : vector<1x128x128xbf16> to vector<128x128xbf16>
    %cst_85 = arith.constant dense<0.000000e+00> : vector<16x128xf32>
    %254 = tpu.matmul %251, %253, %cst_85 {dimension_numbers = #tpu.dot_dimension_numbers<[1], [0], [0], [1], [0, 0, 1, 1], [], []>} : vector<16x128xbf16>, vector<128x128xbf16>, vector<16x128xf32> -> vector<16x128xf32>
    %c1_86 = arith.constant 1 : index
    %c0_87 = arith.constant 0 : index
    %c0_88 = arith.constant 0 : index
    %255 = vector.load %arg7[%c1_86, %c0_87, %c0_88] : memref<2x1x128xf32, #tpu.memory_space<vmem>>, vector<1x1x128xf32>
    %256 = vector.shape_cast %255 : vector<1x1x128xf32> to vector<1x128xf32>
    %257 = vector.broadcast %256 : vector<1x128xf32> to vector<16x128xf32>
    %258 = arith.addf %254, %257 : vector<16x128xf32>
    %259 = arith.addf %183, %258 : vector<16x128xf32>
    %c1_89 = arith.constant 1 : index
    %c0_90 = arith.constant 0 : index
    %c0_91 = arith.constant 0 : index
    %260 = vector.load %arg8[%c1_89, %c0_90, %c0_91] : memref<2x1x128xf32, #tpu.memory_space<vmem>>, vector<1x1x128xf32>
    %261 = vector.shape_cast %260 : vector<1x1x128xf32> to vector<1x128xf32>
    %c1_92 = arith.constant 1 : index
    %c0_93 = arith.constant 0 : index
    %c0_94 = arith.constant 0 : index
    %262 = vector.load %arg9[%c1_92, %c0_93, %c0_94] : memref<2x1x128xf32, #tpu.memory_space<vmem>>, vector<1x1x128xf32>
    %263 = vector.shape_cast %262 : vector<1x1x128xf32> to vector<1x128xf32>
    %cst_95 = arith.constant dense<0.000000e+00> : vector<16xf32>
    %264 = vector.multi_reduction <add>, %259, %cst_95 [1] : vector<16x128xf32> to vector<16xf32>
    %265 = vector.shape_cast %264 : vector<16xf32> to vector<16x1xf32>
    %cst_96 = arith.constant 1.280000e+02 : f32
    %266 = vector.broadcast %cst_96 : f32 to vector<16x1xf32>
    %267 = arith.divf %265, %266 : vector<16x1xf32>
    %268 = vector.broadcast %267 : vector<16x1xf32> to vector<16x128xf32>
    %269 = arith.subf %259, %268 : vector<16x128xf32>
    %270 = arith.mulf %269, %269 : vector<16x128xf32>
    %cst_97 = arith.constant dense<0.000000e+00> : vector<16xf32>
    %271 = vector.multi_reduction <add>, %270, %cst_97 [1] : vector<16x128xf32> to vector<16xf32>
    %272 = vector.shape_cast %271 : vector<16xf32> to vector<16x1xf32>
    %cst_98 = arith.constant 1.280000e+02 : f32
    %273 = vector.broadcast %cst_98 : f32 to vector<16x1xf32>
    %274 = arith.divf %272, %273 : vector<16x1xf32>
    %275 = vector.broadcast %267 : vector<16x1xf32> to vector<16x128xf32>
    %276 = arith.subf %259, %275 : vector<16x128xf32>
    %cst_99 = arith.constant 9.99999996E-13 : f32
    %277 = vector.broadcast %cst_99 : f32 to vector<16x1xf32>
    %278 = arith.addf %274, %277 : vector<16x1xf32>
    %279 = math.rsqrt %278 : vector<16x1xf32>
    %280 = vector.broadcast %279 : vector<16x1xf32> to vector<16x128xf32>
    %281 = arith.mulf %276, %280 : vector<16x128xf32>
    %282 = vector.broadcast %261 : vector<1x128xf32> to vector<16x128xf32>
    %283 = arith.mulf %281, %282 : vector<16x128xf32>
    %284 = vector.broadcast %263 : vector<1x128xf32> to vector<16x128xf32>
    %285 = arith.addf %283, %284 : vector<16x128xf32>
    %286 = arith.truncf %285 : vector<16x128xf32> to vector<16x128xbf16>
    %c1_100 = arith.constant 1 : index
    %c0_101 = arith.constant 0 : index
    %c0_102 = arith.constant 0 : index
    %287 = vector.load %arg10[%c1_100, %c0_101, %c0_102] : memref<2x128x512xbf16, #tpu.memory_space<vmem>>, vector<1x128x512xbf16>
    %288 = vector.shape_cast %287 : vector<1x128x512xbf16> to vector<128x512xbf16>
    %cst_103 = arith.constant dense<0.000000e+00> : vector<16x512xf32>
    %289 = tpu.matmul %286, %288, %cst_103 {dimension_numbers = #tpu.dot_dimension_numbers<[1], [0], [0], [1], [0, 0, 1, 1], [], []>} : vector<16x128xbf16>, vector<128x512xbf16>, vector<16x512xf32> -> vector<16x512xf32>
    %c1_104 = arith.constant 1 : index
    %c0_105 = arith.constant 0 : index
    %c0_106 = arith.constant 0 : index
    %290 = vector.load %arg11[%c1_104, %c0_105, %c0_106] : memref<2x1x512xf32, #tpu.memory_space<vmem>>, vector<1x1x512xf32>
    %291 = vector.shape_cast %290 : vector<1x1x512xf32> to vector<1x512xf32>
    %292 = vector.broadcast %291 : vector<1x512xf32> to vector<16x512xf32>
    %293 = arith.addf %289, %292 : vector<16x512xf32>
    %294 = arith.mulf %293, %293 : vector<16x512xf32>
    %295 = arith.mulf %293, %294 : vector<16x512xf32>
    %cst_107 = arith.constant 4.471500e-02 : f32
    %296 = vector.broadcast %cst_107 : f32 to vector<16x512xf32>
    %297 = arith.mulf %296, %295 : vector<16x512xf32>
    %298 = arith.addf %293, %297 : vector<16x512xf32>
    %cst_108 = arith.constant 0.797884583 : f32
    %299 = vector.broadcast %cst_108 : f32 to vector<16x512xf32>
    %300 = arith.mulf %299, %298 : vector<16x512xf32>
    %301 = math.tanh %300 : vector<16x512xf32>
    %cst_109 = arith.constant 1.000000e+00 : f32
    %302 = vector.broadcast %cst_109 : f32 to vector<16x512xf32>
    %303 = arith.addf %302, %301 : vector<16x512xf32>
    %cst_110 = arith.constant 5.000000e-01 : f32
    %304 = vector.broadcast %cst_110 : f32 to vector<16x512xf32>
    %305 = arith.mulf %304, %303 : vector<16x512xf32>
    %306 = arith.mulf %293, %305 : vector<16x512xf32>
    %307 = arith.truncf %306 : vector<16x512xf32> to vector<16x512xbf16>
    %c1_111 = arith.constant 1 : index
    %c0_112 = arith.constant 0 : index
    %c0_113 = arith.constant 0 : index
    %308 = vector.load %arg12[%c1_111, %c0_112, %c0_113] : memref<2x512x128xbf16, #tpu.memory_space<vmem>>, vector<1x512x128xbf16>
    %309 = vector.shape_cast %308 : vector<1x512x128xbf16> to vector<512x128xbf16>
    %cst_114 = arith.constant dense<0.000000e+00> : vector<16x128xf32>
    %310 = tpu.matmul %307, %309, %cst_114 {dimension_numbers = #tpu.dot_dimension_numbers<[1], [0], [0], [1], [0, 0, 1, 1], [], []>} : vector<16x512xbf16>, vector<512x128xbf16>, vector<16x128xf32> -> vector<16x128xf32>
    %c1_115 = arith.constant 1 : index
    %c0_116 = arith.constant 0 : index
    %c0_117 = arith.constant 0 : index
    %311 = vector.load %arg13[%c1_115, %c0_116, %c0_117] : memref<2x1x128xf32, #tpu.memory_space<vmem>>, vector<1x1x128xf32>
    %312 = vector.shape_cast %311 : vector<1x1x128xf32> to vector<1x128xf32>
    %313 = vector.broadcast %312 : vector<1x128xf32> to vector<16x128xf32>
    %314 = arith.addf %310, %313 : vector<16x128xf32>
    %315 = arith.addf %285, %314 : vector<16x128xf32>
    %c1_118 = arith.constant 1 : index
    %c0_119 = arith.constant 0 : index
    %c0_120 = arith.constant 0 : index
    %316 = vector.load %arg14[%c1_118, %c0_119, %c0_120] : memref<2x1x128xf32, #tpu.memory_space<vmem>>, vector<1x1x128xf32>
    %317 = vector.shape_cast %316 : vector<1x1x128xf32> to vector<1x128xf32>
    %c1_121 = arith.constant 1 : index
    %c0_122 = arith.constant 0 : index
    %c0_123 = arith.constant 0 : index
    %318 = vector.load %arg15[%c1_121, %c0_122, %c0_123] : memref<2x1x128xf32, #tpu.memory_space<vmem>>, vector<1x1x128xf32>
    %319 = vector.shape_cast %318 : vector<1x1x128xf32> to vector<1x128xf32>
    %cst_124 = arith.constant dense<0.000000e+00> : vector<16xf32>
    %320 = vector.multi_reduction <add>, %315, %cst_124 [1] : vector<16x128xf32> to vector<16xf32>
    %321 = vector.shape_cast %320 : vector<16xf32> to vector<16x1xf32>
    %cst_125 = arith.constant 1.280000e+02 : f32
    %322 = vector.broadcast %cst_125 : f32 to vector<16x1xf32>
    %323 = arith.divf %321, %322 : vector<16x1xf32>
    %324 = vector.broadcast %323 : vector<16x1xf32> to vector<16x128xf32>
    %325 = arith.subf %315, %324 : vector<16x128xf32>
    %326 = arith.mulf %325, %325 : vector<16x128xf32>
    %cst_126 = arith.constant dense<0.000000e+00> : vector<16xf32>
    %327 = vector.multi_reduction <add>, %326, %cst_126 [1] : vector<16x128xf32> to vector<16xf32>
    %328 = vector.shape_cast %327 : vector<16xf32> to vector<16x1xf32>
    %cst_127 = arith.constant 1.280000e+02 : f32
    %329 = vector.broadcast %cst_127 : f32 to vector<16x1xf32>
    %330 = arith.divf %328, %329 : vector<16x1xf32>
    %331 = vector.broadcast %323 : vector<16x1xf32> to vector<16x128xf32>
    %332 = arith.subf %315, %331 : vector<16x128xf32>
    %cst_128 = arith.constant 9.99999996E-13 : f32
    %333 = vector.broadcast %cst_128 : f32 to vector<16x1xf32>
    %334 = arith.addf %330, %333 : vector<16x1xf32>
    %335 = math.rsqrt %334 : vector<16x1xf32>
    %336 = vector.broadcast %335 : vector<16x1xf32> to vector<16x128xf32>
    %337 = arith.mulf %332, %336 : vector<16x128xf32>
    %338 = vector.broadcast %317 : vector<1x128xf32> to vector<16x128xf32>
    %339 = arith.mulf %337, %338 : vector<16x128xf32>
    %340 = vector.broadcast %319 : vector<1x128xf32> to vector<16x128xf32>
    %341 = arith.addf %339, %340 : vector<16x128xf32>
    %c0_129 = arith.constant 0 : index
    %c0_130 = arith.constant 0 : index
    %342 = vector.load %arg16[%c0_129, %c0_130] : memref<16x128xf32, #tpu.memory_space<vmem>>, vector<16x128xf32>
    tpu.vector_store %arg16[%c0_129, %c0_130], %341 {strides = array<i32>} : memref<16x128xf32, #tpu.memory_space<vmem>>, vector<16x128xf32>,
    return
  }
}

</mosaic_0001>

<bundles_post_ra>
// kernel: tpu_custom_call.1
= control target key start
LH: loop header
LB: loop body
LE: loop exit
PB: predicated region body
PF: predicated region fallthrough
CT: control target
= control target key end

     0   :  { %s6774_s0 = inlined_call_operand.hbm [shape: f32[16,128], index: 0, kind: input, shape index: {}, may-alias: {0,16}]   ;;  %s6775_s1 = inlined_call_operand.vmem [shape: f32[8,1,8], index: 1, kind: input, shape index: {}]   ;;  %s6776_s2 = inlined_call_operand.vmem [shape: f32[1,128], index: 2, kind: input, shape index: {}]   ;;  %s6777_s3 = inlined_call_operand.vmem [shape: f32[1,128], index: 3, kind: input, shape index: {}]   ;;  %s6778_s4 = inlined_call_operand.hbm [shape: bf16[2,128,384], index: 4, kind: input, shape index: {}]   ;;  %s6779_s5 = inlined_call_operand.vmem [shape: f32[2,1,384], index: 5, kind: input, shape index: {}]   ;;  %s6780_s6 = inlined_call_operand.hbm [shape: bf16[2,128,128], index: 6, kind: input, shape index: {}]   ;;  %s6781_s7 = inlined_call_operand.vmem [shape: f32[2,1,128], index: 7, kind: input, shape index: {}]   ;;  %s6782_s8 = inlined_call_operand.vmem [shape: f32[2,1,128], index: 8, kind: input, shape index: {}]   ;;  %s6783_s9 = inlined_call_operand.vmem [shape: f32[2,1,128], index: 9, kind: input, shape index: {}]   ;;  %s6784_s10 = inlined_call_operand.hbm [shape: bf16[2,128,512], index: 10, kind: input, shape index: {}]   ;;  %s6785_s11 = inlined_call_operand.vmem [shape: f32[2,1,512], index: 11, kind: input, shape index: {}]   ;;  %s6786_s12 = inlined_call_operand.hbm [shape: bf16[2,512,128], index: 12, kind: input, shape index: {}]   ;;  %s6787_s13 = inlined_call_operand.vmem [shape: f32[2,1,128], index: 13, kind: input, shape index: {}]   ;;  %s6788_s14 = inlined_call_operand.vmem [shape: f32[2,1,128], index: 14, kind: input, shape index: {}]   ;;  %s6789_s15 = inlined_call_operand.vmem [shape: f32[2,1,128], index: 15, kind: input, shape index: {}]   ;;  %s6790_s16 = inlined_call_operand.hbm [shape: f32[16,128], index: 16, kind: output, shape index: {}, may-alias: {0,16}]  }
   0x1   :  { %6792 = sst [smem:[#allocation16_spill]] %s6774_s0 }
   0x2   :  { %21 = vsyncpa [#allocation3], 0 }
   0x3   :  { %22 = vsyncpa [#allocation6], 0 }
   0x4   :  { %23 = vsyncpa [#allocation9], 0 }
   0x5   :  { %24 = vsyncpa [#allocation4], 0  ;;  %s5893_s21 = smov [#allocation5]   ;;  %s5753_s25 = scalar_lea.hbm %s6778_s4, 6144 }
   0x6   :  { %s48_s22 = sshll.u32 %s5893_s21, 4  ;;  %p5754_p0 = scmp.ne.s32.totalorder %s6778_s4, %s5753_s25  ;;  %s49_s22 = int_to_ptr.vmem [resolvable:$true] %s48_s22 }
   0x7   :  { %p5757_p1 = scmp.lt.u32.totalorder %s5753_s25, %s6778_s4 }
   0x9   :  { %p5759_p2 = pnand %p5757_p1, %p5754_p0 }
   0xb   :  { %5762 = shalt.err (!%p5759_p2)
}
   0xc   :  { %s5763_s30 = scalar_lea.vmem %s49_s22, 6144  ;;  %p5768_p4 = scmp.lt.s32.totalorder %s49_s22, %s49_s22 }
   0xd   :  { %p5764_p3 = scmp.ne.s32.totalorder %s49_s22, %s5763_s30  ;;  %p5769_p5 = scmp.lt.s32.totalorder %s5763_s30, %s5763_s30 }
   0xf   :  { %p5770_p6 = por %p5769_p5, %p5768_p4 }
  0x11   :  { %p5771_p7 = pnand %p5770_p6, %p5764_p3 }
  0x13   :  { %5774 = shalt.err (!%p5771_p7)
}
  0x14   :  { %s5894_s0 = smov 192   ;;  %s5895_s17 = smov 12  }
  0x15   :  { %54 = dma.hbm_to_vmem [thread:$0]  %s6778_s4, 6144, %s49_s22, [#allocation6], %s5894_s0, %s5894_s0, %s5895_s17  }
  0x16   :  { %s5896_s20 = smov [#allocation8]   ;;  %s5775_s25 = scalar_lea.hbm %s6784_s10, 8192 }
  0x17   :  { %s80_s21 = sshll.u32 %s5896_s20, 4  ;;  %p5776_p8 = scmp.ne.s32.totalorder %s6784_s10, %s5775_s25  ;;  %s81_s21 = int_to_ptr.vmem [resolvable:$true] %s80_s21 }
  0x18   :  { %p5779_p9 = scmp.lt.u32.totalorder %s5775_s25, %s6784_s10 }
  0x1a   :  { %p5781_p10 = pnand %p5779_p9, %p5776_p8 }
  0x1c   :  { %5784 = shalt.err (!%p5781_p10)
}
  0x1d   :  { %s5785_s30 = scalar_lea.vmem %s81_s21, 8192  ;;  %p5790_p12 = scmp.lt.s32.totalorder %s81_s21, %s81_s21 }
  0x1e   :  { %p5786_p11 = scmp.ne.s32.totalorder %s81_s21, %s5785_s30  ;;  %p5791_p13 = scmp.lt.s32.totalorder %s5785_s30, %s5785_s30 }
  0x20   :  { %p5792_p0 = por %p5791_p13, %p5790_p12 }
  0x22   :  { %p5793_p1 = pnand %p5792_p0, %p5786_p11 }
  0x24   :  { %5796 = shalt.err (!%p5793_p1)
}
  0x25   :  { %s5897_s4 = smov 256   ;;  %s5898_s22 = smov 16  }
  0x26   :  { %86 = dma.hbm_to_vmem [thread:$0]  %s6784_s10, 8192, %s81_s21, [#allocation9], %s5897_s4, %s5897_s4, %s5898_s22  }
  0x27   :  { %s5899_s18 = smov [#allocation2]   ;;  %s6793_s24 = sld [smem:[#allocation16_spill]] }
  0x28   :  { %s30_s19 = sshll.u32 %s5899_s18, 4  ;;  %s31_s19 = int_to_ptr.vmem [resolvable:$true] %s30_s19 }
  0x2d   :  { %s5797_s25 = scalar_lea.hbm %s6793_s24, 256 }
  0x2e   :  { %p5798_p2 = scmp.ne.s32.totalorder %s6793_s24, %s5797_s25  ;;  %p5801_p3 = scmp.lt.u32.totalorder %s5797_s25, %s6793_s24 }
  0x30   :  { %p5803_p4 = pnand %p5801_p3, %p5798_p2 }
  0x32   :  { %5806 = shalt.err (!%p5803_p4)
}
  0x33   :  { %s5807_s30 = scalar_lea.vmem %s31_s19, 256  ;;  %p5812_p6 = scmp.lt.s32.totalorder %s31_s19, %s31_s19 }
  0x34   :  { %p5808_p5 = scmp.ne.s32.totalorder %s31_s19, %s5807_s30  ;;  %p5813_p7 = scmp.lt.s32.totalorder %s5807_s30, %s5807_s30 }
  0x36   :  { %p5814_p8 = por %p5813_p7, %p5812_p6 }
  0x38   :  { %p5815_p9 = pnand %p5814_p8, %p5808_p5 }
  0x3a   :  { %5818 = shalt.err (!%p5815_p9)
}
  0x3b   :  { %s5900_s10 = smov 128   ;;  %s5901_s21 = smov 8  }
  0x3c   :  { %36 = dma.hbm_to_vmem [thread:$0]  %s6793_s24, 256, %s31_s19, [#allocation3], %s5900_s10, %s5900_s10, %s5901_s21  }
  0x3d   :  { %s5902_s0 = smov [#allocation7]   ;;  %s5819_s23 = scalar_lea.hbm %s6780_s6, 2048 }
  0x3e   :  { %s62_s17 = sshll.u32 %s5902_s0, 4  ;;  %p5820_p10 = scmp.ne.s32.totalorder %s6780_s6, %s5819_s23  ;;  %s63_s17 = int_to_ptr.vmem [resolvable:$true] %s62_s17 }
  0x3f   :  { %p5823_p11 = scmp.lt.u32.totalorder %s5819_s23, %s6780_s6 }
  0x41   :  { %p5825_p12 = pnand %p5823_p11, %p5820_p10 }
  0x43   :  { %5828 = shalt.err (!%p5825_p12)
}
  0x44   :  { %s5829_s29 = scalar_lea.vmem %s63_s17, 2048  ;;  %p5834_p0 = scmp.lt.s32.totalorder %s63_s17, %s63_s17 }
  0x45   :  { %p5830_p13 = scmp.ne.s32.totalorder %s63_s17, %s5829_s29  ;;  %p5835_p1 = scmp.lt.s32.totalorder %s5829_s29, %s5829_s29 }
  0x47   :  { %p5836_p2 = por %p5835_p1, %p5834_p0 }
  0x49   :  { %p5837_p3 = pnand %p5836_p2, %p5830_p13 }
  0x4b   :  { %5840 = shalt.err (!%p5837_p3)
}
  0x4c   :  { %s5903_s19 = smov 64   ;;  %s5904_s24 = smov 4  }
  0x4d   :  { %68 = dma.hbm_to_vmem [thread:$0]  %s6780_s6, 2048, %s63_s17, [#allocation6], %s5903_s19, %s5903_s19, %s5904_s24  }
  0x4e   :  { %s5905_s22 = smov [#allocation10]   ;;  %s5841_s23 = scalar_lea.hbm %s6786_s12, 8192 }
  0x4f   :  { %s94_s0 = sshll.u32 %s5905_s22, 4  ;;  %p5842_p4 = scmp.ne.s32.totalorder %s6786_s12, %s5841_s23  ;;  %s95_s0 = int_to_ptr.vmem [resolvable:$true] %s94_s0 }
  0x50   :  { %p5845_p5 = scmp.lt.u32.totalorder %s5841_s23, %s6786_s12 }
  0x52   :  { %p5847_p6 = pnand %p5845_p5, %p5842_p4 }
  0x54   :  { %5850 = shalt.err (!%p5847_p6)
}
  0x55   :  { %s5851_s29 = scalar_lea.vmem %s95_s0, 8192  ;;  %p5856_p8 = scmp.lt.s32.totalorder %s95_s0, %s95_s0 }
  0x56   :  { %p5852_p7 = scmp.ne.s32.totalorder %s95_s0, %s5851_s29  ;;  %p5857_p9 = scmp.lt.s32.totalorder %s5851_s29, %s5851_s29 }
  0x58   :  { %p5858_p10 = por %p5857_p9, %p5856_p8 }
  0x5a   :  { %p5859_p11 = pnand %p5858_p10, %p5852_p7 }
  0x5c   :  { %5862 = shalt.err (!%p5859_p11)
}
  0x5d   :  { %100 = dma.hbm_to_vmem [thread:$0]  %s6786_s12, 8192, %s95_s0, [#allocation9], %s5903_s19, %s5903_s19, %s5904_s24  }
  0x5e   :  { %5885 = dma.done.wait [#allocation3], 256  }
  0x5f   :  { %5886 = vsyncadd [#allocation3], 4294967040 }
  0x60   :  { %5887 = dma.done.wait [#allocation6], 8192  }
  0x61   :  { %5888 = vsyncadd [#allocation6], 4294959104 }
  0x62   :  { %5889 = dma.done.wait [#allocation9], 16384  }
  0x63   :  { %5890 = vsyncadd [#allocation9], 4294950912  ;;  %v123_v0 = vld [vmem:[#allocation2] sm:$0xff]  ;;  %v124_v1 = vld [vmem:[#allocation2 + $0x8] sm:$0xff]  ;;  %v5906_v4 = vmov 0.0   ;;  %v5907_v30 = vmov 0   ;;  %v209_v53 = vlaneseq }
  0x64   :  { %127 = vadd.xlane.f32.xlu0 %v123_v0  ;;  %v5389_v2 = vld [vmem:[#allocation5 + $0x4] ss:$12 sps:$4 sm:$0xff]   ;;  %v5391_v3 = vld [vmem:[#allocation5] ss:$12 sps:$4 sm:$0xff]   ;;  %4988 = vmatprep.subr.bf16.mxu1 %v5906_v4  ;;  %v5392_v5 = vld [vmem:[#allocation5 + $0x8] ss:$12 sps:$4 sm:$0xff]  }
  0x65   :  { %v5393_v6 = vld [vmem:[#allocation5 + $0x1c] ss:$12 sps:$4 sm:$0xff]   ;;  %352 = vmatprep.subr.bf16.mxu0 %v5389_v2  ;;  %4989 = vmatpush3.bf16.msra.mxu1 %v5392_v5  ;;  %v5395_v15 = vld [vmem:[#allocation5 + $0x18] ss:$12 sps:$4 sm:$0xff]   ;;  %v5396_v16 = vld [vmem:[#allocation5 + $0x20] ss:$12 sps:$4 sm:$0xff]  }
  0x66   :  { %353 = vmatpush1.bf16.msra.mxu0 %v5391_v3  ;;  %4990 = vmatprep.subr.bf16.mxu1 %v5906_v4  ;;  %v5397_v17 = vld [vmem:[#allocation5 + $0x34] ss:$12 sps:$4 sm:$0xff]   ;;  %v5399_v18 = vld [vmem:[#allocation5 + $0x30] ss:$12 sps:$4 sm:$0xff]   ;;  %v5400_v19 = vld [vmem:[#allocation5 + $0x38] ss:$12 sps:$4 sm:$0xff]  }
  0x67   :  { %354 = vmatprep.subr.bf16.mxu0 %v5393_v6  ;;  %v5401_v20 = vld [vmem:[#allocation5 + $0x4c] ss:$12 sps:$4 sm:$0xff]   ;;  %v5403_v21 = vld [vmem:[#allocation5 + $0x48] ss:$12 sps:$4 sm:$0xff]   ;;  %v5404_v22 = vld [vmem:[#allocation5 + $0x50] ss:$12 sps:$4 sm:$0xff]   ;;  %384 = vmatprep.mubr.bf16.mxu0 %v5907_v30 }
  0x68   :  { %129 = vadd.xlane.f32.xlu0 %v124_v1  ;;  %v5405_v23 = vld [vmem:[#allocation5 + $0x64] ss:$12 sps:$4 sm:$0xff]   ;;  %v5407_v24 = vld [vmem:[#allocation5 + $0x60] ss:$12 sps:$4 sm:$0xff]   ;;  %v5408_v25 = vld [vmem:[#allocation5 + $0x68] ss:$12 sps:$4 sm:$0xff]  }
  0x69   :  { %4991 = vmatpush3.bf16.msra.mxu1 %v5396_v16  ;;  %v5409_v26 = vld [vmem:[#allocation5 + $0x7c] ss:$12 sps:$4 sm:$0xff]   ;;  %v5411_v27 = vld [vmem:[#allocation5 + $0x78] ss:$12 sps:$4 sm:$0xff]   ;;  %v5412_v28 = vld [vmem:[#allocation5 + $0x80] ss:$12 sps:$4 sm:$0xff]  }
  0x6a   :  { %355 = vmatpush1.bf16.msra.mxu0 %v5395_v15  ;;  %4992 = vmatprep.subr.bf16.mxu1 %v5906_v4  ;;  %v5413_v29 = vld [vmem:[#allocation5 + $0x94] ss:$12 sps:$4 sm:$0xff]   ;;  %vm5908_vm0 = vmmov 0   ;;  %v5415_v31 = vld [vmem:[#allocation5 + $0x90] ss:$12 sps:$4 sm:$0xff]   ;;  %v6103_v54 = vshrl.u32 %v209_v53, 7 }
  0x6b   :  { %356 = vmatprep.subr.bf16.mxu0 %v5397_v17  ;;  %5004 = vmatprep.mubr.msk.bf16.mxu1 %vm5908_vm0, %v5906_v4  ;;  %v5416_v32 = vld [vmem:[#allocation5 + $0x98] ss:$12 sps:$4 sm:$0xff]   ;;  %v5419_v34 = vld [vmem:[#allocation5 + $0xa8] ss:$12 sps:$4 sm:$0xff]   ;;  %v5420_v35 = vld [vmem:[#allocation5 + $0xb0] ss:$12 sps:$4 sm:$0xff]  }
  0x6c   :  { %v5417_v33 = vld [vmem:[#allocation5 + $0xac] ss:$12 sps:$4 sm:$0xff]   ;;  %v4546_v44 = vld [vmem:[%s6776_s2] ss:$0 sm:$0xff]  ;;  %v6106_v55 = vsub.s32 1, %v6103_v54  ;;  %v6112_v57 = vsub.s32 0, %v6103_v54 }
  0x6d   :  { %4993 = vmatpush3.bf16.msra.mxu1 %v5400_v19  ;;  %v4547_v48 = vld [vmem:[%s6777_s3] ss:$0 sm:$0xff]  ;;  %v6115_v58 = vsub.s32 2, %v6103_v54  ;;  %vm520_vm1 = vcmask 261120   ;;  %s5909_s22 = smov 96   ;;  %s5910_s0 = smov 32  }
  0x6e   :  { %357 = vmatpush1.bf16.msra.mxu0 %v5399_v18  ;;  %4994 = vmatprep.subr.bf16.mxu1 %v5906_v4  ;;  %v207_v56 = vld [vmem:[%s6779_s5] sm:$0x7]  ;;  %vm1053_vm2 = vcmask 1043456   ;;  %vm953_vm3 = vcmask 64512   ;;  %vm1445_vm4 = vcmask 523264   ;;  %vm1448_vm5 = vcmask 785408  }
  0x6f   :  { %358 = vmatprep.subr.bf16.mxu0 %v5401_v20  ;;  %v216_v59 = vrot.slane %v207_v56, %v6106_v55  ;;  %v212_v60 = vrot.slane %v207_v56, %v6112_v57  ;;  %v220_v63 = vrot.slane %v207_v56, %v6115_v58  ;;  %s5911_s25 = smov [#allocation11]  }
  0x70   :  { %s4532_s26 = sshll.u32 %s5911_s25, 4  ;;  %s4533_s26 = int_to_ptr.vmem [resolvable:$true] %s4532_s26 }
  0x71   :  { %4995 = vmatpush3.bf16.msra.mxu1 %v5404_v22  ;;  %s5863_s27 = scalar_lea.vmem %s4533_s26, 256  ;;  %p5868_p13 = scmp.lt.s32.totalorder %s4533_s26, %s4533_s26 }
  0x72   :  { %359 = vmatpush1.bf16.msra.mxu0 %v5403_v21  ;;  %4996 = vmatprep.subr.bf16.mxu1 %v5906_v4  ;;  %p5864_p12 = scmp.ne.s32.totalorder %s4533_s26, %s5863_s27  ;;  %p5869_p0 = scmp.lt.s32.totalorder %s5863_s27, %s5863_s27 }
  0x73   :  { %360 = vmatprep.subr.bf16.mxu0 %v5405_v23 }
  0x74   :  { %p5870_p1 = por %p5869_p0, %p5868_p13 }
  0x75   :  { %4997 = vmatpush3.bf16.msra.mxu1 %v5408_v25 }
  0x76   :  { %361 = vmatpush1.bf16.msra.mxu0 %v5407_v24  ;;  %4998 = vmatprep.subr.bf16.mxu1 %v5906_v4  ;;  %p5871_p2 = pnand %p5870_p1, %p5864_p12 }
  0x77   :  { %362 = vmatprep.subr.bf16.mxu0 %v5409_v26 }
  0x79   :  { %4999 = vmatpush3.bf16.msra.mxu1 %v5412_v28 }
  0x7a   :  { %363 = vmatpush1.bf16.msra.mxu0 %v5411_v27  ;;  %5000 = vmatprep.subr.bf16.mxu1 %v5906_v4 }
  0x7b   :  { %364 = vmatprep.subr.bf16.mxu0 %v5413_v29 }
  0x7d   :  { %5001 = vmatpush3.bf16.msra.mxu1 %v5416_v32 }
  0x7e   :  { %365 = vmatpush1.bf16.msra.mxu0 %v5415_v31  ;;  %5002 = vmatprep.subr.bf16.mxu1 %v5906_v4 }
  0x7f   :  { %366 = vmatprep.subr.bf16.mxu0 %v5417_v33 }
  0x81   :  { %5003 = vmatpush3.bf16.msra.mxu1 %v5420_v35 }
  0x82   :  { %367 = vmatpush1.bf16.msra.mxu0 %v5419_v34  ;;  %5008 = vmatprep.subr.bf16.mxu1 %v5906_v4 }
  0x83   :  { %5032 = vmatprep.subr.bf16.mxu0 %v5906_v4 }
  0xf1   :  { %v128_v7 = vpop.xlane.xlu0 %127 }
  0xf2   :  { %v132_v8 = vmul.f32 0.0078125, %v128_v7 }
  0xf4   :  { %v6066_v9 = vsub.f32 %v123_v0, %v132_v8 }
  0xf5   :  { %v130_v10 = vpop.xlane.xlu0 %129 }
  0xf6   :  { %v133_v11 = vmul.f32 0.0078125, %v130_v10  ;;  %v136_v12 = vmul.f32 %v6066_v9, %v6066_v9 }
  0xf8   :  { %v6070_v13 = vsub.f32 %v124_v1, %v133_v11  ;;  %138 = vadd.xlane.f32.xlu1 %v136_v12 }
  0xfa   :  { %v137_v14 = vmul.f32 %v6070_v13, %v6070_v13 }
  0xfc   :  { %140 = vadd.xlane.f32.xlu1 %v137_v14 }
 0x185   :  { %v139_v36 = vpop.xlane.xlu1 %138 }
 0x186   :  { %v142_v37 = vmul.f32 0.0078125, %v139_v36 }
 0x188   :  { %v144_v38 = vadd.f32 1e-12, %v142_v37 }
 0x189   :  { %v141_v39 = vpop.xlane.xlu1 %140 }
 0x18a   :  { %5629 = vrsqrt.f32 %v144_v38  ;;  %v143_v40 = vmul.f32 0.0078125, %v141_v39 }
 0x18c   :  { %v145_v41 = vadd.f32 1e-12, %v143_v40 }
 0x18e   :  { %5631 = vrsqrt.f32 %v145_v41 }
 0x194   :  { %v5630_v42 = vpop.eup %5629 }
 0x195   :  { %v148_v43 = vmul.f32 %v5630_v42, %v6066_v9 }
 0x197   :  { %v156_v47 = vmul.f32 %v4546_v44, %v148_v43 }
 0x198   :  { %v5632_v45 = vpop.eup %5631 }
 0x199   :  { %v149_v46 = vmul.f32 %v5632_v45, %v6070_v13  ;;  %v6093_v50 = vadd.f32 %v4547_v48, %v156_v47 }
 0x19b   :  { %v157_v49 = vmul.f32 %v4546_v44, %v149_v46 }
 0x19d   :  { %v6095_v51 = vadd.f32 %v4547_v48, %v157_v49 }
 0x19f   :  { %v174_v52 = vpack.c.bf16 %v6095_v51, %v6093_v50 }
 0x1a1   :  { %385 = vmatmul.mubr.bf16.vlgmr.msra.gmra.mrb[0].mxu0 %v174_v52  ;;  %5005 = vmatmul.mubr.bf16.vlgmr.msra.gmra.mrb[0].mxu1 %v174_v52 }
 0x1a2   :  { %5010 = vmatprep.mubr.msk.bf16.mxu1 %vm5908_vm0, %v5906_v4  ;;  %5034 = vmatprep.mubr.msk.bf16.mxu0 %vm5908_vm0, %v5906_v4 }
 0x274   :  { %v386_v61 = vpop.f32.mrb[0].mxu0  ;;  %v429_v62 = vpop.f32.mrb[0].mxu1 }
 0x275   :  { %v388_v0 = vpop.f32.mrb[1].mxu0  ;;  %v5006_v1 = vpop.f32.mrb[1].mxu1  ;;  %v387_v6 = vadd.f32 %v386_v61, %v212_v60  ;;  %v6123_v13 = vadd.f32 %v429_v62, %v220_v63 }
 0x276   :  { %v389_v2 = vadd.f32 %v388_v0, %v216_v59  ;;  %v390_v3 = vpop.f32.mrb[2].mxu0  ;;  %v432_v5 = vpop.f32.mrb[2].mxu1 }
 0x277   :  { %v391_v7 = vadd.f32 %v390_v3, %v212_v60  ;;  %v6120_v8 = vadd.f32 %v432_v5, %v220_v63  ;;  %v392_v9 = vpop.f32.mrb[3].mxu0  ;;  %v5007_v10 = vpop.f32.mrb[3].mxu1  ;;  %v456_v20 = vpack.c.bf16 %v387_v6, %v387_v6  ;;  %v512_v63 = vpack.c.bf16 %v6123_v13, %v6123_v13 }
 0x278   :  { %v393_v11 = vadd.f32 %v392_v9, %v216_v59  ;;  %466 = vrot.lane.b32.xlu0 %v389_v2, %s5909_s22  ;;  %v484_v12 = vpack.c.bf16 %v389_v2, %v389_v2 }
 0x279   :  { %v5289_v14 = vpack.i.bf16 %v391_v7, %v387_v6  ;;  %v6128_v18 = vpack.i.bf16 %v6120_v8, %v6123_v13  ;;  %v457_v22 = vpack.c.bf16 %v391_v7, %v391_v7  ;;  %v513_v1 = vpack.c.bf16 %v6120_v8, %v6120_v8 }
 0x27a   :  { %v525_v15 = vsel %vm520_vm1, %v484_v12, 0  ;;  %v5279_v16 = vpack.i.bf16 %v393_v11, %v387_v6  ;;  %v5284_v17 = vpack.i.bf16 %v393_v11, %v389_v2  ;;  %v485_v19 = vpack.c.bf16 %v393_v11, %v393_v11 }
 0x27b   :  { %5009 = vmatpush3.bf16.xpose.msra.mxu1 %v525_v15  ;;  %v1055_v3 = vsel %vm1053_vm2, %v512_v63, 0  ;;  %v1101_v5 = vsel %vm1053_vm2, %v513_v1, 0  ;;  %v4581_v15 = vld [vmem:[%s6775_s1 + $0x1] ss:$0 sm:$0xff]  ;;  %v4586_v63 = vld [vmem:[%s6775_s1 + $0x6] ss:$0 sm:$0xff] }
 0x27c   :  { %5290 = vrot.lane.b32.xlu0 %v5289_v14, %s5903_s19  ;;  %5280 = vrot.lane.b32.xlu1 %v5279_v16, %s5909_s22  ;;  %v571_v21 = vsel %vm520_vm1, %v485_v19, 0 }
 0x27d   :  { %5014 = vmatprep.subr.bf16.mxu1 %v5906_v4 }
 0x280   :  { %5300 = vrot.lane.b32.xlu0 %v5289_v14, %s5910_s0  ;;  %440 = vrot.lane.b32.xlu1 %v391_v7, %s5909_s22  ;;  %v4580_v7 = vld [vmem:[%s6775_s1] ss:$0 sm:$0xff] }
 0x282   :  { %5011 = vmatmul.mubr.msk.bf16.vlgmr.msra.gmra.mrb[4].mxu1 %vm520_vm1, %v456_v20 }
 0x283   :  { %5015 = vmatpush3.bf16.xpose.msra.mxu1 %v571_v21  ;;  %5016 = vmatprep.mubr.msk.bf16.mxu1 %vm5908_vm0, %v5906_v4 }
 0x284   :  { %5285 = vrot.lane.b32.xlu1 %v5284_v17, %s5903_s19  ;;  %5020 = vmatprep.subr.bf16.mxu1 %v5906_v4 }
 0x288   :  { %5295 = vrot.lane.b32.xlu1 %v5284_v17, %s5910_s0 }
 0x28a   :  { %5017 = vmatmul.mubr.msk.bf16.vlgmr.msra.gmra.mrb[8].mxu1 %vm520_vm1, %v457_v22 }
 0x28b   :  { %5022 = vmatprep.mubr.msk.bf16.mxu1 %vm5908_vm0, %v5906_v4 }
 0x2ea   :  { %v467_v23 = vpop.permute.xlu0 %466 }
 0x2eb   :  { %v486_v24 = vpack.c.bf16 %v467_v23, %v467_v23 }
 0x2ed   :  { %v617_v25 = vsel %vm520_vm1, %v486_v24, 0  ;;  %v4582_v24 = vld [vmem:[%s6775_s1 + $0x2] ss:$0 sm:$0xff] }
 0x2ee   :  { %v5281_v26 = vpop.permute.xlu1 %5280  ;;  %5021 = vmatpush3.bf16.xpose.msra.mxu1 %v617_v25  ;;  %v5291_v39 = vpop.permute.xlu0 %5290 }
 0x2ef   :  { %v5283_v27 = vunpack.i.h.bf16 %v5281_v26  ;;  %v5282_v28 = vunpack.i.l.bf16 %v5281_v26  ;;  %5026 = vmatprep.subr.bf16.mxu1 %v5906_v4  ;;  %v5292_v44 = vunpack.i.l.bf16 %v5291_v39  ;;  %v5293_v47 = vunpack.i.h.bf16 %v5291_v39 }
 0x2f1   :  { %v487_v29 = vpack.c.bf16 %v5283_v27, %v5283_v27  ;;  %v458_v32 = vpack.c.bf16 %v5282_v28, %v5282_v28  ;;  %v460_v49 = vpack.c.bf16 %v5292_v44, %v5292_v44  ;;  %v461_v56 = vpack.c.bf16 %v5293_v47, %v5293_v47 }
 0x2f2   :  { %v441_v31 = vpop.permute.xlu1 %440  ;;  %v5301_v53 = vpop.permute.xlu0 %5300 }
 0x2f3   :  { %v663_v33 = vsel %vm520_vm1, %v487_v29, 0  ;;  %v459_v41 = vpack.c.bf16 %v441_v31, %v441_v31  ;;  %v5302_v60 = vunpack.i.l.bf16 %v5301_v53  ;;  %v5303_v62 = vunpack.i.h.bf16 %v5301_v53 }
 0x2f5   :  { %5023 = vmatmul.mubr.msk.bf16.vlgmr.msra.gmra.mrb[12].mxu1 %vm520_vm1, %v458_v32  ;;  %v462_v0 = vpack.c.bf16 %v5302_v60, %v5302_v60  ;;  %v463_v2 = vpack.c.bf16 %v5303_v62, %v5303_v62 }
 0x2f6   :  { %v5286_v34 = vpop.permute.xlu1 %5285  ;;  %5027 = vmatpush3.bf16.xpose.msra.mxu1 %v663_v33  ;;  %5028 = vmatprep.mubr.msk.bf16.mxu1 %vm5908_vm0, %v5906_v4  ;;  %v4583_v33 = vld [vmem:[%s6775_s1 + $0x3] ss:$0 sm:$0xff] }
 0x2f7   :  { %v5288_v35 = vunpack.i.h.bf16 %v5286_v34  ;;  %v5287_v36 = vunpack.i.l.bf16 %v5286_v34  ;;  %5038 = vmatprep.subr.bf16.mxu1 %v5906_v4 }
 0x2f9   :  { %v489_v37 = vpack.c.bf16 %v5288_v35, %v5288_v35  ;;  %v488_v38 = vpack.c.bf16 %v5287_v36, %v5287_v36 }
 0x2fa   :  { %v5296_v40 = vpop.permute.xlu1 %5295 }
 0x2fb   :  { %v5297_v42 = vunpack.i.l.bf16 %v5296_v40  ;;  %v709_v43 = vsel %vm520_vm1, %v488_v38, 0  ;;  %v5298_v45 = vunpack.i.h.bf16 %v5296_v40  ;;  %v755_v46 = vsel %vm520_vm1, %v489_v37, 0 }
 0x2fc   :  { %5033 = vmatpush3.bf16.xpose.msra.mxu0 %v709_v43 }
 0x2fd   :  { %5029 = vmatmul.mubr.msk.bf16.vlgmr.msra.gmra.mrb[16].mxu1 %vm520_vm1, %v459_v41  ;;  %5044 = vmatprep.subr.bf16.mxu0 %v5906_v4  ;;  %v490_v48 = vpack.c.bf16 %v5297_v42, %v5297_v42  ;;  %v491_v52 = vpack.c.bf16 %v5298_v45, %v5298_v45  ;;  %v4584_v41 = vld [vmem:[%s6775_s1 + $0x4] ss:$0 sm:$0xff] }
 0x2fe   :  { %5039 = vmatpush3.bf16.xpose.msra.mxu1 %v755_v46  ;;  %5040 = vmatprep.mubr.msk.bf16.mxu1 %vm5908_vm0, %v5906_v4  ;;  %v4585_v46 = vld [vmem:[%s6775_s1 + $0x5] ss:$0 sm:$0xff] }
 0x2ff   :  { %5050 = vmatprep.subr.bf16.mxu1 %v5906_v4  ;;  %v801_v59 = vsel %vm520_vm1, %v490_v48, 0  ;;  %v847_v61 = vsel %vm520_vm1, %v491_v52, 0 }
 0x303   :  { %5035 = vmatmul.mubr.msk.bf16.vlgmr.msra.gmra.mrb[4].mxu0 %vm520_vm1, %v460_v49 }
 0x304   :  { %5045 = vmatpush3.bf16.xpose.msra.mxu0 %v801_v59  ;;  %5046 = vmatprep.mubr.msk.bf16.mxu0 %vm5908_vm0, %v5906_v4 }
 0x305   :  { %5041 = vmatmul.mubr.msk.bf16.vlgmr.msra.gmra.mrb[20].mxu1 %vm520_vm1, %v461_v56  ;;  %5056 = vmatprep.subr.bf16.mxu0 %v5906_v4 }
 0x306   :  { %5051 = vmatpush3.bf16.xpose.msra.mxu1 %v847_v61  ;;  %5052 = vmatprep.mubr.msk.bf16.mxu1 %vm5908_vm0, %v5906_v4 }
 0x307   :  { %5062 = vmatprep.subr.bf16.mxu1 %v5906_v4 }
 0x30b   :  { %5047 = vmatmul.mubr.msk.bf16.vlgmr.msra.gmra.mrb[8].mxu0 %vm520_vm1, %v462_v0 }
 0x30c   :  { %5057 = vmatpush3.bf16.msra.mxu0 %v1055_v3  ;;  %5058 = vmatprep.mubr.msk.bf16.mxu0 %vm5908_vm0, %v5906_v4 }
 0x30d   :  { %5053 = vmatmul.mubr.msk.bf16.vlgmr.msra.gmra.mrb[24].mxu1 %vm520_vm1, %v463_v2  ;;  %5068 = vmatprep.subr.bf16.mxu0 %v5906_v4 }
 0x30e   :  { %5063 = vmatpush3.bf16.msra.mxu1 %v1101_v5  ;;  %5064 = vmatprep.mubr.msk.bf16.mxu1 %vm5908_vm0, %v5906_v4  ;;  %v4587_v5 = vld [vmem:[%s6775_s1 + $0x7] ss:$0 sm:$0xff] }
 0x30f   :  { %5074 = vmatprep.subr.bf16.mxu1 %v5906_v4 }
 0x355   :  { %v561_v6 = vpop.f32.mrb[4].mxu1 }
 0x356   :  { %v889_v8 = vmul.f32 0.17677669, %v561_v6  ;;  %v5012_v9 = vpop.f32.mrb[5].mxu1 }
 0x357   :  { %v564_v10 = vpop.f32.mrb[6].mxu1 }
 0x358   :  { %v5013_v11 = vpop.f32.mrb[7].mxu1  ;;  %v6186_v12 = vadd.f32 %v4580_v7, %v889_v8 }
 0x35a   :  { %v954_v13 = vsel %vm953_vm3, %v6186_v12, -inf }
 0x35b   :  { %955 = vmax.xlane.f32.xlu1 %v954_v13 }
 0x35d   :  { %v607_v14 = vpop.f32.mrb[8].mxu1 }
 0x35e   :  { %v890_v16 = vmul.f32 0.17677669, %v607_v14  ;;  %v5018_v17 = vpop.f32.mrb[9].mxu1 }
 0x35f   :  { %v610_v19 = vpop.f32.mrb[10].mxu1 }
 0x360   :  { %v5019_v20 = vpop.f32.mrb[11].mxu1  ;;  %v946_v21 = vadd.f32 %v4581_v15, %v890_v16 }
 0x362   :  { %v957_v22 = vsel %vm953_vm3, %v946_v21, -inf }
 0x363   :  { %958 = vmax.xlane.f32.xlu0 %v957_v22 }
 0x3c8   :  { %v653_v23 = vpop.f32.mrb[12].mxu1 }
 0x3c9   :  { %v891_v25 = vmul.f32 0.17677669, %v653_v23  ;;  %v5024_v26 = vpop.f32.mrb[13].mxu1 }
 0x3ca   :  { %v656_v27 = vpop.f32.mrb[14].mxu1 }
 0x3cb   :  { %v5025_v28 = vpop.f32.mrb[15].mxu1  ;;  %v6197_v29 = vadd.f32 %v4582_v24, %v891_v25 }
 0x3cd   :  { %v960_v31 = vsel %vm953_vm3, %v6197_v29, -inf }
 0x3ce   :  { %961 = vmax.xlane.f32.xlu0 %v960_v31 }
 0x3d0   :  { %v699_v32 = vpop.f32.mrb[16].mxu1 }
 0x3d1   :  { %v892_v34 = vmul.f32 0.17677669, %v699_v32  ;;  %v5030_v35 = vpop.f32.mrb[17].mxu1 }
 0x3d2   :  { %v702_v36 = vpop.f32.mrb[18].mxu1 }
 0x3d3   :  { %v5031_v37 = vpop.f32.mrb[19].mxu1  ;;  %v948_v38 = vadd.f32 %v4583_v33, %v892_v34 }
 0x3d5   :  { %v963_v39 = vsel %vm953_vm3, %v948_v38, -inf }
 0x3d6   :  { %v745_v40 = vpop.f32.mrb[4].mxu0  ;;  %964 = vmax.xlane.f32.xlu0 %v963_v39 }
 0x3d7   :  { %v893_v42 = vmul.f32 0.17677669, %v745_v40  ;;  %v5036_v43 = vpop.f32.mrb[5].mxu0 }
 0x3d8   :  { %v748_v44 = vpop.f32.mrb[6].mxu0  ;;  %v791_v45 = vpop.f32.mrb[20].mxu1 }
 0x3d9   :  { %v894_v47 = vmul.f32 0.17677669, %v791_v45  ;;  %v5037_v48 = vpop.f32.mrb[7].mxu0  ;;  %v5042_v49 = vpop.f32.mrb[21].mxu1  ;;  %v949_v52 = vadd.f32 %v4584_v41, %v893_v42 }
 0x3da   :  { %v794_v53 = vpop.f32.mrb[22].mxu1 }
 0x3db   :  { %v5043_v56 = vpop.f32.mrb[23].mxu1  ;;  %v966_v59 = vsel %vm953_vm3, %v949_v52, -inf  ;;  %v950_v60 = vadd.f32 %v4585_v46, %v894_v47 }
 0x3dc   :  { %967 = vmax.xlane.f32.xlu1 %v966_v59 }
 0x3dd   :  { %v969_v61 = vsel %vm953_vm3, %v950_v60, -inf }
 0x3de   :  { %v837_v62 = vpop.f32.mrb[8].mxu0  ;;  %970 = vmax.xlane.f32.xlu0 %v969_v61 }
 0x3df   :  { %v895_v0 = vmul.f32 0.17677669, %v837_v62  ;;  %v5048_v1 = vpop.f32.mrb[9].mxu0 }
 0x3e0   :  { %v840_v2 = vpop.f32.mrb[10].mxu0  ;;  %v883_v3 = vpop.f32.mrb[24].mxu1 }
 0x3e1   :  { %v896_v6 = vmul.f32 0.17677669, %v883_v3  ;;  %v5049_v7 = vpop.f32.mrb[11].mxu0  ;;  %v5054_v8 = vpop.f32.mrb[25].mxu1  ;;  %v951_v9 = vadd.f32 %v4586_v63, %v895_v0 }
 0x3e2   :  { %v886_v10 = vpop.f32.mrb[26].mxu1 }
 0x3e3   :  { %v5055_v11 = vpop.f32.mrb[27].mxu1  ;;  %v972_v13 = vsel %vm953_vm3, %v951_v9, -inf  ;;  %v952_v14 = vadd.f32 %v4587_v5, %v896_v6 }
 0x3e4   :  { %973 = vmax.xlane.f32.xlu1 %v972_v13 }
 0x3e5   :  { %v975_v15 = vsel %vm953_vm3, %v952_v14, -inf }
 0x3e6   :  { %976 = vmax.xlane.f32.xlu0 %v975_v15 }
 0x3e8   :  { %v956_v22 = vpop.xlane.xlu1 %955 }
 0x3e9   :  { %v978_v24 = vsub.f32 %v6186_v12, %v956_v22 }
 0x3eb   :  { %v986_v25 = vmul.f32 1.442695, %v978_v24 }
 0x3f0   :  { %v959_v16 = vpop.xlane.xlu0 %958 }
 0x3f1   :  { %v979_v17 = vsub.f32 %v946_v21, %v959_v16 }
 0x3f3   :  { %v988_v19 = vmul.f32 1.442695, %v979_v17 }
 0x3f5   :  { %5633 = vpow2.f32 %v988_v19  ;;  %5305 = vrot.lane.b32.xlu1 %v6128_v18, %s5909_s22 }
 0x3f6   :  { %5635 = vpow2.f32 %v986_v25 }
 0x3ff   :  { %v5634_v20 = vpop.eup %5633 }
 0x400   :  { %v1005_v23 = vsel %vm953_vm3, %v5634_v20, 0.0  ;;  %v6225_v26 = vpop.eup %5635 }
 0x401   :  { %1006 = vadd.xlane.f32.xlu0 %v1005_v23  ;;  %v1002_v27 = vsel %vm953_vm3, %v6225_v26, 0.0 }
 0x419   :  { %1003 = vadd.xlane.f32.xlu1 %v1002_v27 }
 0x45b   :  { %v962_v21 = vpop.xlane.xlu0 %961 }
 0x45c   :  { %v980_v28 = vsub.f32 %v6197_v29, %v962_v21 }
 0x45e   :  { %v990_v31 = vmul.f32 1.442695, %v980_v28 }
 0x460   :  { %5637 = vpow2.f32 %v990_v31 }
 0x463   :  { %v965_v32 = vpop.xlane.xlu0 %964 }
 0x464   :  { %v981_v33 = vsub.f32 %v948_v38, %v965_v32 }
 0x466   :  { %v992_v34 = vmul.f32 1.442695, %v981_v33 }
 0x468   :  { %5639 = vpow2.f32 %v992_v34 }
 0x469   :  { %v968_v35 = vpop.xlane.xlu1 %967 }
 0x46a   :  { %v6230_v36 = vpop.eup %5637  ;;  %v982_v12 = vsub.f32 %v949_v52, %v968_v35 }
 0x46b   :  { %v971_v37 = vpop.xlane.xlu0 %970  ;;  %v1008_v39 = vsel %vm953_vm3, %v6230_v36, 0.0 }
 0x46c   :  { %v994_v40 = vmul.f32 1.442695, %v982_v12  ;;  %v983_v41 = vsub.f32 %v950_v60, %v971_v37  ;;  %1009 = vadd.xlane.f32.xlu1 %v1008_v39 }
 0x46e   :  { %5641 = vpow2.f32 %v994_v40  ;;  %v996_v42 = vmul.f32 1.442695, %v983_v41 }
 0x470   :  { %5643 = vpow2.f32 %v996_v42 }
 0x471   :  { %v974_v29 = vpop.xlane.xlu1 %973 }
 0x472   :  { %v6234_v43 = vpop.eup %5639  ;;  %v984_v38 = vsub.f32 %v951_v9, %v974_v29 }
 0x473   :  { %v977_v44 = vpop.xlane.xlu0 %976  ;;  %v1011_v45 = vsel %vm953_vm3, %v6234_v43, 0.0 }
 0x474   :  { %v998_v46 = vmul.f32 1.442695, %v984_v38  ;;  %v985_v47 = vsub.f32 %v952_v14, %v977_v44  ;;  %1012 = vadd.xlane.f32.xlu0 %v1011_v45 }
 0x475   :  { %v5306_v0 = vpop.permute.xlu1 %5305 }
 0x476   :  { %5645 = vpow2.f32 %v998_v46  ;;  %v1000_v48 = vmul.f32 1.442695, %v985_v47  ;;  %v5308_v1 = vunpack.i.h.bf16 %v5306_v0  ;;  %v5307_v9 = vunpack.i.l.bf16 %v5306_v0  ;;  %v5421_v0 = vld [vmem:[#allocation7] sm:$0xff]  }
 0x478   :  { %v6238_v49 = vpop.eup %5641  ;;  %5647 = vpow2.f32 %v1000_v48  ;;  %v515_v3 = vpack.c.bf16 %v5308_v1, %v5308_v1  ;;  %v514_v11 = vpack.c.bf16 %v5307_v9, %v5307_v9  ;;  %v5422_v1 = vld [vmem:[#allocation7 + $0x8] sm:$0xff]  }
 0x479   :  { %v1014_v52 = vsel %vm953_vm3, %v6238_v49, 0.0 }
 0x47a   :  { %v6242_v53 = vpop.eup %5643  ;;  %1015 = vadd.xlane.f32.xlu1 %v1014_v52  ;;  %v1193_v7 = vsel %vm1053_vm2, %v515_v3, 0 }
 0x47b   :  { %v1017_v56 = vsel %vm953_vm3, %v6242_v53, 0.0 }
 0x47c   :  { %1018 = vadd.xlane.f32.xlu0 %v1017_v56 }
 0x480   :  { %v6246_v59 = vpop.eup %5645 }
 0x481   :  { %v1020_v60 = vsel %vm953_vm3, %v6246_v59, 0.0 }
 0x482   :  { %v6250_v61 = vpop.eup %5647  ;;  %1021 = vadd.xlane.f32.xlu1 %v1020_v60 }
 0x483   :  { %v1023_v62 = vsel %vm953_vm3, %v6250_v61, 0.0 }
 0x484   :  { %1024 = vadd.xlane.f32.xlu0 %v1023_v62 }
 0x48e   :  { %v1007_v63 = vpop.xlane.xlu0 %1006 }
 0x48f   :  { %5649 = vrcp.f32 %v1007_v63 }
 0x493   :  { %5315 = vrot.lane.b32.xlu1 %v6128_v18, %s5910_s0 }
 0x499   :  { %v5650_v2 = vpop.eup %5649 }
 0x49a   :  { %v1035_v5 = vmul.f32 %v5650_v2, %v5634_v20  ;;  %5310 = vrot.lane.b32.xlu0 %v6128_v18, %s5903_s19  ;;  %v1147_v18 = vsel %vm1053_vm2, %v514_v11, 0  ;;  %v5424_v11 = vld [vmem:[#allocation7 + $0x18] sm:$0xff]  }
 0x49c   :  { %v1043_v6 = vpack.c.bf16 %v1035_v5, %v1035_v5 }
 0x49e   :  { %5065 = vmatmul.mubr.msk.bf16.vlgmr.msra.gmra.mrb[28].mxu1 %vm953_vm3, %v1043_v6 }
 0x49f   :  { %5075 = vmatpush3.bf16.msra.mxu1 %v1193_v7  ;;  %5076 = vmatprep.mubr.msk.bf16.mxu1 %vm5908_vm0, %v5906_v4 }
 0x4a0   :  { %5086 = vmatprep.subr.bf16.mxu1 %v5906_v4 }
 0x4a6   :  { %v1004_v8 = vpop.xlane.xlu1 %1003 }
 0x4a7   :  { %5651 = vrcp.f32 %v1004_v8  ;;  %v5423_v8 = vld [vmem:[#allocation7 + $0x10] sm:$0xff]  }
 0x4b1   :  { %v5652_v10 = vpop.eup %5651 }
 0x4b2   :  { %v1034_v13 = vmul.f32 %v5652_v10, %v6225_v26 }
 0x4b4   :  { %v1042_v14 = vpack.c.bf16 %v1034_v13, %v1034_v13 }
 0x4b6   :  { %5059 = vmatmul.mubr.msk.bf16.vlgmr.msra.gmra.mrb[12].mxu0 %vm953_vm3, %v1042_v14  ;;  %v5425_v14 = vld [vmem:[#allocation7 + $0x20] sm:$0xff]  }
 0x4b7   :  { %5069 = vmatpush3.bf16.msra.mxu0 %v1147_v18  ;;  %5070 = vmatprep.mubr.msk.bf16.mxu0 %vm5908_vm0, %v5906_v4 }
 0x4b8   :  { %5080 = vmatprep.subr.bf16.mxu0 %v5906_v4 }
 0x4f9   :  { %v1010_v15 = vpop.xlane.xlu1 %1009 }
 0x4fa   :  { %5653 = vrcp.f32 %v1010_v15 }
 0x501   :  { %v1013_v16 = vpop.xlane.xlu0 %1012 }
 0x502   :  { %5655 = vrcp.f32 %v1013_v16 }
 0x504   :  { %v5654_v17 = vpop.eup %5653 }
 0x505   :  { %v1036_v19 = vmul.f32 %v5654_v17, %v6230_v36 }
 0x507   :  { %v1016_v20 = vpop.xlane.xlu1 %1015  ;;  %v1044_v22 = vpack.c.bf16 %v1036_v19, %v1036_v19 }
 0x508   :  { %5657 = vrcp.f32 %v1016_v20  ;;  %v5426_v20 = vld [vmem:[#allocation7 + $0x28] sm:$0xff]  }
 0x509   :  { %5071 = vmatmul.mubr.msk.bf16.vlgmr.msra.gmra.mrb[16].mxu0 %vm953_vm3, %v1044_v22  ;;  %v1019_v23 = vpop.xlane.xlu0 %1018  ;;  %v5427_v22 = vld [vmem:[#allocation7 + $0x30] sm:$0xff]  }
 0x50a   :  { %5082 = vmatprep.mubr.msk.bf16.mxu0 %vm5908_vm0, %v5906_v4  ;;  %5659 = vrcp.f32 %v1019_v23 }
 0x50c   :  { %v5656_v24 = vpop.eup %5655 }
 0x50d   :  { %v1037_v25 = vmul.f32 %v5656_v24, %v6234_v43 }
 0x50f   :  { %v1022_v26 = vpop.xlane.xlu1 %1021  ;;  %v1045_v27 = vpack.c.bf16 %v1037_v25, %v1037_v25 }
 0x510   :  { %5661 = vrcp.f32 %v1022_v26 }
 0x511   :  { %5077 = vmatmul.mubr.msk.bf16.vlgmr.msra.gmra.mrb[32].mxu1 %vm953_vm3, %v1045_v27  ;;  %v1025_v21 = vpop.xlane.xlu0 %1024 }
 0x512   :  { %5088 = vmatprep.mubr.msk.bf16.mxu1 %vm5908_vm0, %v5906_v4  ;;  %5663 = vrcp.f32 %v1025_v21  ;;  %v5658_v31 = vpop.eup %5657  ;;  %v5428_v21 = vld [vmem:[#allocation7 + $0x38] sm:$0xff]  }
 0x513   :  { %v5316_v28 = vpop.permute.xlu1 %5315  ;;  %v1038_v37 = vmul.f32 %v5658_v31, %v6238_v49 }
 0x514   :  { %v5660_v32 = vpop.eup %5659  ;;  %v5318_v34 = vunpack.i.h.bf16 %v5316_v28  ;;  %v5317_v35 = vunpack.i.l.bf16 %v5316_v28 }
 0x515   :  { %v5311_v33 = vpop.permute.xlu0 %5310  ;;  %v1039_v39 = vmul.f32 %v5660_v32, %v6242_v53  ;;  %v1046_v45 = vpack.c.bf16 %v1038_v37, %v1038_v37 }
 0x516   :  { %v5313_v36 = vunpack.i.h.bf16 %v5311_v33  ;;  %v5312_v12 = vunpack.i.l.bf16 %v5311_v33  ;;  %v519_v42 = vpack.c.bf16 %v5318_v34, %v5318_v34  ;;  %v518_v29 = vpack.c.bf16 %v5317_v35, %v5317_v35 }
 0x517   :  { %v1047_v46 = vpack.c.bf16 %v1039_v39, %v1039_v39 }
 0x518   :  { %v517_v40 = vpack.c.bf16 %v5313_v36, %v5313_v36  ;;  %v516_v41 = vpack.c.bf16 %v5312_v12, %v5312_v12  ;;  %v1331_v48 = vsel %vm1053_vm2, %v518_v29, 0  ;;  %v1377_v49 = vsel %vm1053_vm2, %v519_v42, 0 }
 0x51a   :  { %v1239_v43 = vsel %vm1053_vm2, %v516_v41, 0  ;;  %v1285_v38 = vsel %vm1053_vm2, %v517_v40, 0  ;;  %v5662_v44 = vpop.eup %5661 }
 0x51b   :  { %5081 = vmatpush3.bf16.msra.mxu0 %v1239_v43  ;;  %5087 = vmatpush3.bf16.msra.mxu1 %v1285_v38  ;;  %v1040_v52 = vmul.f32 %v5662_v44, %v6246_v59 }
 0x51c   :  { %5092 = vmatprep.subr.bf16.mxu0 %v5906_v4  ;;  %5098 = vmatprep.subr.bf16.mxu1 %v5906_v4  ;;  %v5664_v47 = vpop.eup %5663 }
 0x51d   :  { %v1041_v53 = vmul.f32 %v5664_v47, %v6250_v61  ;;  %v1048_v56 = vpack.c.bf16 %v1040_v52, %v1040_v52 }
 0x51e   :  { %5083 = vmatmul.mubr.msk.bf16.vlgmr.msra.gmra.mrb[20].mxu0 %vm953_vm3, %v1046_v45  ;;  %5089 = vmatmul.mubr.msk.bf16.vlgmr.msra.gmra.mrb[36].mxu1 %vm953_vm3, %v1047_v46 }
 0x51f   :  { %5093 = vmatpush3.bf16.msra.mxu0 %v1331_v48  ;;  %5099 = vmatpush3.bf16.msra.mxu1 %v1377_v49  ;;  %v1049_v60 = vpack.c.bf16 %v1041_v53, %v1041_v53 }
 0x520   :  { %5094 = vmatprep.mubr.msk.bf16.mxu0 %vm5908_vm0, %v5906_v4  ;;  %5100 = vmatprep.mubr.msk.bf16.mxu1 %vm5908_vm0, %v5906_v4 }
 0x521   :  { %5104 = vmatprep.subr.bf16.mxu0 %v5906_v4 }
 0x526   :  { %5095 = vmatmul.mubr.msk.bf16.vlgmr.msra.gmra.mrb[24].mxu0 %vm953_vm3, %v1048_v56  ;;  %5101 = vmatmul.mubr.msk.bf16.vlgmr.msra.gmra.mrb[40].mxu1 %vm953_vm3, %v1049_v60 }
 0x527   :  { %5120 = vmatprep.mubr.msk.bf16.mxu0 %vm5908_vm0, %v5906_v4  ;;  %1853 = vmatprep.mubr.bf16.mxu1 %v5907_v30 }
 0x528   :  { %5105 = vmatpush3.bf16.msra.mxu0 %v5421_v0 }
 0x529   :  { %5106 = vmatprep.subr.bf16.mxu0 %v5906_v4 }
 0x52c   :  { %5107 = vmatpush3.bf16.msra.mxu0 %v5422_v1 }
 0x52d   :  { %5108 = vmatprep.subr.bf16.mxu0 %v5906_v4 }
 0x530   :  { %5109 = vmatpush3.bf16.msra.mxu0 %v5423_v8 }
 0x531   :  { %5110 = vmatprep.subr.bf16.mxu0 %v5906_v4 }
 0x534   :  { %5111 = vmatpush3.bf16.msra.mxu0 %v5424_v11  ;;  %v5432_v11 = vld [vmem:[#allocation8 + $0x8] ss:$16 sps:$4 sm:$0xff]  }
 0x535   :  { %5112 = vmatprep.subr.bf16.mxu0 %v5906_v4 }
 0x538   :  { %5113 = vmatpush3.bf16.msra.mxu0 %v5425_v14  ;;  %v5437_v14 = vld [vmem:[#allocation8 + $0x24] ss:$16 sps:$4 sm:$0xff]  }
 0x539   :  { %5114 = vmatprep.subr.bf16.mxu0 %v5906_v4 }
 0x53c   :  { %5115 = vmatpush3.bf16.msra.mxu0 %v5426_v20 }
 0x53d   :  { %5116 = vmatprep.subr.bf16.mxu0 %v5906_v4 }
 0x540   :  { %5117 = vmatpush3.bf16.msra.mxu0 %v5427_v22 }
 0x541   :  { %5118 = vmatprep.subr.bf16.mxu0 %v5906_v4 }
 0x544   :  { %5119 = vmatpush3.bf16.msra.mxu0 %v5428_v21  ;;  %v5444_v21 = vld [vmem:[#allocation8 + $0x48] ss:$16 sps:$4 sm:$0xff]  }
 0x571   :  { %v6299_v59 = vpop.f32.mrb[28].mxu1 }
 0x572   :  { %v5066_v61 = vpop.f32.mrb[29].mxu1 }
 0x573   :  { %v1140_v62 = vpop.f32.mrb[30].mxu1 }
 0x574   :  { %v5067_v63 = vpop.f32.mrb[31].mxu1 }
 0x589   :  { %v1091_v2 = vpop.f32.mrb[12].mxu0 }
 0x58a   :  { %v5060_v3 = vpop.f32.mrb[13].mxu0 }
 0x58b   :  { %v1094_v5 = vpop.f32.mrb[14].mxu0 }
 0x58c   :  { %v5061_v6 = vpop.f32.mrb[15].mxu0 }
 0x5dc   :  { %v1183_v7 = vpop.f32.mrb[16].mxu0 }
 0x5dd   :  { %v5072_v9 = vpop.f32.mrb[17].mxu0 }
 0x5de   :  { %v1186_v10 = vpop.f32.mrb[18].mxu0  ;;  %v5429_v9 = vld [vmem:[#allocation8] ss:$16 sps:$4 sm:$0xff]  }
 0x5df   :  { %v5073_v13 = vpop.f32.mrb[19].mxu0  ;;  %v5431_v10 = vld [vmem:[#allocation8 + $0x4] ss:$16 sps:$4 sm:$0xff]  }
 0x5e0   :  { %v5434_v13 = vld [vmem:[#allocation8 + $0xc] ss:$16 sps:$4 sm:$0xff]   ;;  %1821 = vmatprep.subr.bf16.mxu1 %v5431_v10  ;;  %v5479_v10 = vld [vmem:[#allocation10] sm:$0xff]  }
 0x5e1   :  { %1864 = vmatprep.subr.bf16.mxu0 %v5434_v13  ;;  %1822 = vmatpush1.bf16.msra.mxu1 %v5429_v9  ;;  %v5478_v9 = vld [vmem:[#allocation10 + $0xc0] sm:$0xff]   ;;  %v5481_v13 = vld [vmem:[#allocation10 + $0x48] sm:$0xff]  }
 0x5e2   :  { %1823 = vmatprep.subr.bf16.mxu1 %v5437_v14  ;;  %v5482_v14 = vld [vmem:[#allocation10 + $0xc8] sm:$0xff]  }
 0x5e4   :  { %v1229_v18 = vpop.f32.mrb[32].mxu1 }
 0x5e5   :  { %v5319_v15 = vpack.i.bf16 %v1229_v18, %v1183_v7  ;;  %v5078_v16 = vpop.f32.mrb[33].mxu1  ;;  %v5440_v18 = vld [vmem:[#allocation8 + $0x2c] ss:$16 sps:$4 sm:$0xff]  }
 0x5e6   :  { %v1232_v17 = vpop.f32.mrb[34].mxu1  ;;  %v5438_v16 = vld [vmem:[#allocation8 + $0x28] ss:$16 sps:$4 sm:$0xff]  }
 0x5e7   :  { %5320 = vrot.lane.b32.xlu1 %v5319_v15, %s5910_s0  ;;  %v5079_v19 = vpop.f32.mrb[35].mxu1  ;;  %v5435_v15 = vld [vmem:[#allocation8 + $0x20] ss:$16 sps:$4 sm:$0xff]  }
 0x5e8   :  { %1824 = vmatpush1.bf16.msra.mxu1 %v5435_v15  ;;  %v5484_v15 = vld [vmem:[#allocation10 + $0x88] sm:$0xff]  }
 0x5f1   :  { %v1275_v23 = vpop.f32.mrb[20].mxu0  ;;  %v1321_v24 = vpop.f32.mrb[36].mxu1 }
 0x5f2   :  { %v5324_v25 = vpack.i.bf16 %v1321_v24, %v1275_v23  ;;  %v5084_v26 = vpop.f32.mrb[21].mxu0  ;;  %v5090_v27 = vpop.f32.mrb[37].mxu1 }
 0x5f3   :  { %v1278_v28 = vpop.f32.mrb[22].mxu0  ;;  %v1324_v31 = vpop.f32.mrb[38].mxu1  ;;  %v5446_v26 = vld [vmem:[#allocation8 + $0x4c] ss:$16 sps:$4 sm:$0xff]   ;;  %v5441_v27 = vld [vmem:[#allocation8 + $0x40] ss:$16 sps:$4 sm:$0xff]  }
 0x5f4   :  { %v5085_v32 = vpop.f32.mrb[23].mxu0  ;;  %5325 = vrot.lane.b32.xlu1 %v5324_v25, %s5903_s19  ;;  %v5091_v33 = vpop.f32.mrb[39].mxu1  ;;  %v5443_v25 = vld [vmem:[#allocation8 + $0x44] ss:$16 sps:$4 sm:$0xff]   ;;  %v5452_v31 = vld [vmem:[#allocation8 + $0x6c] ss:$16 sps:$4 sm:$0xff]  }
 0x5f5   :  { %1825 = vmatprep.subr.bf16.mxu1 %v5443_v25  ;;  %v5449_v28 = vld [vmem:[#allocation8 + $0x64] ss:$16 sps:$4 sm:$0xff]   ;;  %v5447_v32 = vld [vmem:[#allocation8 + $0x60] ss:$16 sps:$4 sm:$0xff]   ;;  %v5450_v33 = vld [vmem:[#allocation8 + $0x68] ss:$16 sps:$4 sm:$0xff]  }
 0x5f6   :  { %1826 = vmatpush1.bf16.msra.mxu1 %v5441_v27  ;;  %v5494_v25 = vld [vmem:[#allocation10 + $0xe0] sm:$0xff]  }
 0x5f7   :  { %1827 = vmatprep.subr.bf16.mxu1 %v5449_v28  ;;  %v5496_v27 = vld [vmem:[#allocation10 + $0xa0] sm:$0xff]   ;;  %v5498_v28 = vld [vmem:[#allocation10 + $0xe8] sm:$0xff]  }
 0x5f9   :  { %v1367_v34 = vpop.f32.mrb[24].mxu0  ;;  %v1413_v35 = vpop.f32.mrb[40].mxu1 }
 0x5fa   :  { %v5329_v36 = vpack.i.bf16 %v1413_v35, %v1367_v34  ;;  %v5096_v12 = vpop.f32.mrb[25].mxu0  ;;  %v5102_v37 = vpop.f32.mrb[41].mxu1  ;;  %1828 = vmatpush1.bf16.msra.mxu1 %v5447_v32  ;;  %v5455_v34 = vld [vmem:[#allocation8 + $0x84] ss:$16 sps:$4 sm:$0xff]   ;;  %v5458_v35 = vld [vmem:[#allocation8 + $0x8c] ss:$16 sps:$4 sm:$0xff]  }
 0x5fb   :  { %v1370_v39 = vpop.f32.mrb[26].mxu0  ;;  %v1416_v40 = vpop.f32.mrb[42].mxu1  ;;  %v5456_v12 = vld [vmem:[#allocation8 + $0x88] ss:$16 sps:$4 sm:$0xff]   ;;  %1829 = vmatprep.subr.bf16.mxu1 %v5455_v34  ;;  %v5461_v37 = vld [vmem:[#allocation8 + $0xa4] ss:$16 sps:$4 sm:$0xff]  }
 0x5fc   :  { %v5097_v41 = vpop.f32.mrb[27].mxu0  ;;  %5330 = vrot.lane.b32.xlu0 %v5329_v36, %s5909_s22  ;;  %v5103_v42 = vpop.f32.mrb[43].mxu1  ;;  %v5453_v36 = vld [vmem:[#allocation8 + $0x80] ss:$16 sps:$4 sm:$0xff]   ;;  %v5464_v39 = vld [vmem:[#allocation8 + $0xac] ss:$16 sps:$4 sm:$0xff]  }
 0x5fd   :  { %v5459_v40 = vld [vmem:[#allocation8 + $0xa0] ss:$16 sps:$4 sm:$0xff]   ;;  %v5462_v41 = vld [vmem:[#allocation8 + $0xa8] ss:$16 sps:$4 sm:$0xff]  }
 0x5fe   :  { %1830 = vmatpush1.bf16.msra.mxu1 %v5453_v36  ;;  %v5465_v42 = vld [vmem:[#allocation8 + $0xc0] ss:$16 sps:$4 sm:$0xff]   ;;  %v5500_v32 = vld [vmem:[#allocation10 + $0xa8] sm:$0xff]  }
 0x5ff   :  { %1831 = vmatprep.subr.bf16.mxu1 %v5461_v37  ;;  %v5502_v34 = vld [vmem:[#allocation10 + $0xf0] sm:$0xff]   ;;  %v5506_v37 = vld [vmem:[#allocation10 + $0xf8] sm:$0xff]  }
 0x600   :  { %v5504_v36 = vld [vmem:[#allocation10 + $0xb0] sm:$0xff]  }
 0x602   :  { %1832 = vmatpush1.bf16.msra.mxu1 %v5459_v40  ;;  %v5508_v40 = vld [vmem:[#allocation10 + $0xb8] sm:$0xff]  }
 0x659   :  { %v5321_v29 = vpop.permute.xlu1 %5320 }
 0x65a   :  { %v5323_v38 = vunpack.i.h.bf16 %v5321_v29  ;;  %v5322_v44 = vunpack.i.l.bf16 %v5321_v29  ;;  %v5467_v29 = vld [vmem:[#allocation8 + $0xc4] ss:$16 sps:$4 sm:$0xff]  }
 0x65b   :  { %1833 = vmatprep.subr.bf16.mxu1 %v5467_v29 }
 0x65c   :  { %v1444_v48 = vsel %vm520_vm1, %v6299_v59, %v5323_v38  ;;  %v1443_v49 = vsel %vm520_vm1, %v1091_v2, %v5322_v44  ;;  %v4596_v59 = vld [vmem:[%s6781_s7] ss:$0 sm:$0xff]  ;;  %v5470_v38 = vld [vmem:[#allocation8 + $0xcc] ss:$16 sps:$4 sm:$0xff]   ;;  %v5473_v44 = vld [vmem:[#allocation8 + $0xe4] ss:$16 sps:$4 sm:$0xff]   ;;  %1834 = vmatpush1.bf16.msra.mxu1 %v5465_v42 }
 0x65d   :  { %1835 = vmatprep.subr.bf16.mxu1 %v5473_v44  ;;  %v1655_v42 = vsub.s32 3, %v6103_v54 }
 0x666   :  { %v5326_v43 = vpop.permute.xlu1 %5325 }
 0x667   :  { %v5328_v45 = vunpack.i.h.bf16 %v5326_v43  ;;  %v5327_v46 = vunpack.i.l.bf16 %v5326_v43  ;;  %v5468_v43 = vld [vmem:[#allocation8 + $0xc8] ss:$16 sps:$4 sm:$0xff]  }
 0x669   :  { %v1447_v56 = vsel %vm1445_vm4, %v1444_v48, %v5328_v45  ;;  %v1446_v60 = vsel %vm1445_vm4, %v1443_v49, %v5327_v46  ;;  %v5476_v45 = vld [vmem:[#allocation8 + $0xec] ss:$16 sps:$4 sm:$0xff]   ;;  %v5471_v46 = vld [vmem:[#allocation8 + $0xe0] ss:$16 sps:$4 sm:$0xff]  }
 0x66a   :  { %1836 = vmatpush1.bf16.msra.mxu1 %v5471_v46 }
 0x66e   :  { %v5331_v47 = vpop.permute.xlu0 %5330 }
 0x66f   :  { %v5333_v52 = vunpack.i.h.bf16 %v5331_v47  ;;  %v5332_v53 = vunpack.i.l.bf16 %v5331_v47  ;;  %v5474_v47 = vld [vmem:[#allocation8 + $0xe8] ss:$16 sps:$4 sm:$0xff]  }
 0x671   :  { %v1450_v61 = vsel %vm1448_vm5, %v1447_v56, %v5333_v52  ;;  %v1449_v62 = vsel %vm1448_vm5, %v1446_v60, %v5332_v53 }
 0x672   :  { %v1451_v63 = vpack.c.bf16 %v1450_v61, %v1449_v62 }
 0x674   :  { %5121 = vmatmul.mubr.bf16.vlgmr.msra.gmra.mrb[28].mxu0 %v1451_v63  ;;  %v4605_v63 = vld [vmem:[%s6782_s8] ss:$0 sm:$0xff] }
 0x675   :  { %1896 = vmatprep.mubr.bf16.mxu0 %v5907_v30  ;;  %1865 = vmatpush1.bf16.msra.mxu0 %v5432_v11  ;;  %v5480_v11 = vld [vmem:[#allocation10 + $0x80] sm:$0xff]  }
 0x676   :  { %1866 = vmatprep.subr.bf16.mxu0 %v5440_v18  ;;  %v5483_v18 = vld [vmem:[#allocation10 + $0x8] sm:$0xff]  }
 0x679   :  { %1867 = vmatpush1.bf16.msra.mxu0 %v5438_v16  ;;  %v5485_v16 = vld [vmem:[#allocation10 + $0x50] sm:$0xff]  }
 0x67a   :  { %1868 = vmatprep.subr.bf16.mxu0 %v5446_v26  ;;  %v5495_v26 = vld [vmem:[#allocation10 + $0x20] sm:$0xff]  }
 0x67d   :  { %1869 = vmatpush1.bf16.msra.mxu0 %v5444_v21  ;;  %v5497_v21 = vld [vmem:[#allocation10 + $0x68] sm:$0xff]  }
 0x67e   :  { %1870 = vmatprep.subr.bf16.mxu0 %v5452_v31  ;;  %v5499_v31 = vld [vmem:[#allocation10 + $0x28] sm:$0xff]  }
 0x681   :  { %1871 = vmatpush1.bf16.msra.mxu0 %v5450_v33  ;;  %v5501_v33 = vld [vmem:[#allocation10 + $0x70] sm:$0xff]  }
 0x682   :  { %1872 = vmatprep.subr.bf16.mxu0 %v5458_v35  ;;  %v5503_v35 = vld [vmem:[#allocation10 + $0x30] sm:$0xff]  }
 0x685   :  { %1873 = vmatpush1.bf16.msra.mxu0 %v5456_v12  ;;  %v5505_v12 = vld [vmem:[#allocation10 + $0x78] sm:$0xff]  }
 0x686   :  { %1874 = vmatprep.subr.bf16.mxu0 %v5464_v39  ;;  %v5507_v39 = vld [vmem:[#allocation10 + $0x38] sm:$0xff]  }
 0x689   :  { %1875 = vmatpush1.bf16.msra.mxu0 %v5462_v41  ;;  %v1639_v41 = vld [vmem:[%s6785_s11] sm:$0xf] }
 0x68a   :  { %1876 = vmatprep.subr.bf16.mxu0 %v5470_v38  ;;  %v1644_v29 = vrot.slane %v1639_v41, %v6112_v57  ;;  %v1648_v38 = vrot.slane %v1639_v41, %v6106_v55  ;;  %v1656_v44 = vrot.slane %v1639_v41, %v1655_v42 }
 0x68d   :  { %1877 = vmatpush1.bf16.msra.mxu0 %v5468_v43  ;;  %v1652_v43 = vrot.slane %v1639_v41, %v6115_v58 }
 0x68e   :  { %1878 = vmatprep.subr.bf16.mxu0 %v5476_v45 }
 0x691   :  { %1879 = vmatpush1.bf16.msra.mxu0 %v5474_v47 }
 0x692   :  { %4872 = vmatprep.subr.bf16.mxu0 %v5478_v9 }
 0x747   :  { %v1557_v0 = vpop.f32.mrb[28].mxu0 }
 0x748   :  { %v1558_v1 = vadd.f32 %v4596_v59, %v1557_v0  ;;  %v5122_v2 = vpop.f32.mrb[29].mxu0 }
 0x749   :  { %v1560_v3 = vpop.f32.mrb[30].mxu0  ;;  %v4606_v2 = vld [vmem:[%s6783_s9] ss:$0 sm:$0xff] }
 0x74a   :  { %v1561_v5 = vadd.f32 %v4596_v59, %v1560_v3  ;;  %v5123_v6 = vpop.f32.mrb[31].mxu0  ;;  %v1564_v7 = vadd.f32 %v1558_v1, %v6093_v50 }
 0x74c   :  { %1568 = vadd.xlane.f32.xlu1 %v1564_v7  ;;  %v1565_v8 = vadd.f32 %v1561_v5, %v6095_v51 }
 0x74e   :  { %1570 = vadd.xlane.f32.xlu0 %v1565_v8 }
 0x7d9   :  { %v1569_v50 = vpop.xlane.xlu1 %1568 }
 0x7da   :  { %v1572_v17 = vmul.f32 0.0078125, %v1569_v50  ;;  %v5486_v50 = vld [vmem:[#allocation10 + $0xd0] sm:$0xff]  }
 0x7db   :  { %v1571_v51 = vpop.xlane.xlu0 %1570 }
 0x7dc   :  { %v6324_v19 = vsub.f32 %v1564_v7, %v1572_v17  ;;  %v1573_v20 = vmul.f32 0.0078125, %v1571_v51  ;;  %v5487_v17 = vld [vmem:[#allocation10 + $0x10] sm:$0xff]  }
 0x7dd   :  { %v5488_v51 = vld [vmem:[#allocation10 + $0x90] sm:$0xff]  }
 0x7de   :  { %v6326_v22 = vsub.f32 %v1565_v8, %v1573_v20  ;;  %v1576_v23 = vmul.f32 %v6324_v19, %v6324_v19  ;;  %v5477_v8 = vld [vmem:[#allocation10 + $0x40] sm:$0xff]   ;;  %v5490_v20 = vld [vmem:[#allocation10 + $0xd8] sm:$0xff]  }
 0x7df   :  { %4850 = vmatprep.subr.bf16.mxu1 %v5477_v8 }
 0x7e0   :  { %1578 = vadd.xlane.f32.xlu0 %v1576_v23  ;;  %v1577_v24 = vmul.f32 %v6326_v22, %v6326_v22  ;;  %v5492_v23 = vld [vmem:[#allocation10 + $0x98] sm:$0xff]  }
 0x7e4   :  { %1580 = vadd.xlane.f32.xlu0 %v1577_v24  ;;  %v5493_v24 = vld [vmem:[#allocation10 + $0x60] sm:$0xff]  }
 0x86d   :  { %v1579_v48 = vpop.xlane.xlu0 %1578 }
 0x86e   :  { %v1582_v49 = vmul.f32 0.0078125, %v1579_v48 }
 0x870   :  { %v1584_v52 = vadd.f32 1e-12, %v1582_v49 }
 0x871   :  { %v1581_v53 = vpop.xlane.xlu0 %1580 }
 0x872   :  { %5665 = vrsqrt.f32 %v1584_v52  ;;  %v1583_v56 = vmul.f32 0.0078125, %v1581_v53 }
 0x874   :  { %v1585_v60 = vadd.f32 1e-12, %v1583_v56 }
 0x876   :  { %5667 = vrsqrt.f32 %v1585_v60 }
 0x87c   :  { %v5666_v61 = vpop.eup %5665 }
 0x87d   :  { %v1588_v62 = vmul.f32 %v5666_v61, %v6324_v19  ;;  %v5489_v19 = vld [vmem:[#allocation10 + $0x58] sm:$0xff]  }
 0x87f   :  { %v1596_v1 = vmul.f32 %v4605_v63, %v1588_v62 }
 0x880   :  { %v5668_v59 = vpop.eup %5667 }
 0x881   :  { %v1589_v0 = vmul.f32 %v5668_v59, %v6326_v22  ;;  %v6340_v5 = vadd.f32 %v4606_v2, %v1596_v1  ;;  %v5491_v22 = vld [vmem:[#allocation10 + $0x18] sm:$0xff]  }
 0x883   :  { %v1597_v3 = vmul.f32 %v4605_v63, %v1589_v0 }
 0x885   :  { %v6342_v6 = vadd.f32 %v4606_v2, %v1597_v3 }
 0x887   :  { %v1606_v7 = vpack.c.bf16 %v6342_v6, %v6340_v5 }
 0x889   :  { %1854 = vmatmul.mubr.bf16.vlgmr.msra.gmra.mrb[44].mxu1 %v1606_v7  ;;  %1897 = vmatmul.mubr.bf16.vlgmr.msra.gmra.mrb[32].mxu0 %v1606_v7 }
 0x88a   :  { %4851 = vmatpush3.bf16.msra.mxu1 %v5479_v10  ;;  %4873 = vmatpush3.bf16.msra.mxu0 %v5480_v11 }
 0x88b   :  { %4852 = vmatprep.subr.bf16.mxu1 %v5481_v13  ;;  %4874 = vmatprep.subr.bf16.mxu0 %v5482_v14 }
 0x88e   :  { %4853 = vmatpush3.bf16.msra.mxu1 %v5483_v18  ;;  %4875 = vmatpush3.bf16.msra.mxu0 %v5484_v15 }
 0x88f   :  { %4854 = vmatprep.subr.bf16.mxu1 %v5485_v16  ;;  %4876 = vmatprep.subr.bf16.mxu0 %v5486_v50 }
 0x892   :  { %4855 = vmatpush3.bf16.msra.mxu1 %v5487_v17  ;;  %4877 = vmatpush3.bf16.msra.mxu0 %v5488_v51 }
 0x893   :  { %4856 = vmatprep.subr.bf16.mxu1 %v5489_v19  ;;  %4878 = vmatprep.subr.bf16.mxu0 %v5490_v20 }
 0x896   :  { %4857 = vmatpush3.bf16.msra.mxu1 %v5491_v22  ;;  %4879 = vmatpush3.bf16.msra.mxu0 %v5492_v23 }
 0x897   :  { %4858 = vmatprep.subr.bf16.mxu1 %v5493_v24  ;;  %4880 = vmatprep.subr.bf16.mxu0 %v5494_v25 }
 0x89a   :  { %4859 = vmatpush3.bf16.msra.mxu1 %v5495_v26  ;;  %4881 = vmatpush3.bf16.msra.mxu0 %v5496_v27 }
 0x89b   :  { %4860 = vmatprep.subr.bf16.mxu1 %v5497_v21  ;;  %4882 = vmatprep.subr.bf16.mxu0 %v5498_v28 }
 0x89e   :  { %4861 = vmatpush3.bf16.msra.mxu1 %v5499_v31  ;;  %4883 = vmatpush3.bf16.msra.mxu0 %v5500_v32 }
 0x89f   :  { %4862 = vmatprep.subr.bf16.mxu1 %v5501_v33  ;;  %4884 = vmatprep.subr.bf16.mxu0 %v5502_v34 }
 0x8a2   :  { %4863 = vmatpush3.bf16.msra.mxu1 %v5503_v35  ;;  %4885 = vmatpush3.bf16.msra.mxu0 %v5504_v36 }
 0x8a3   :  { %4864 = vmatprep.subr.bf16.mxu1 %v5505_v12  ;;  %4886 = vmatprep.subr.bf16.mxu0 %v5506_v37 }
 0x8a6   :  { %4865 = vmatpush3.bf16.msra.mxu1 %v5507_v39  ;;  %4887 = vmatpush3.bf16.msra.mxu0 %v5508_v40 }
 0x8a7   :  { %5124 = vmatprep.subr.bf16.mxu0 %v5906_v4 }
 0x95c   :  { %v1855_v45 = vpop.f32.mrb[44].mxu1  ;;  %v1898_v46 = vpop.f32.mrb[32].mxu0 }
 0x95d   :  { %v6356_v47 = vadd.f32 %v1855_v45, %v1644_v29  ;;  %v6358_v48 = vadd.f32 %v1898_v46, %v1652_v43  ;;  %v1857_v49 = vpop.f32.mrb[45].mxu1  ;;  %v1900_v52 = vpop.f32.mrb[33].mxu0 }
 0x95e   :  { %v6360_v53 = vadd.f32 %v1857_v49, %v1648_v38  ;;  %v6362_v56 = vadd.f32 %v1900_v52, %v1656_v44  ;;  %v1859_v60 = vpop.f32.mrb[46].mxu1  ;;  %v1902_v61 = vpop.f32.mrb[34].mxu0 }
 0x95f   :  { %v1907_v62 = vmul.f32 %v6356_v47, %v6356_v47  ;;  %v1909_v63 = vmul.f32 %v6358_v48, %v6358_v48  ;;  %v6368_v59 = vadd.f32 %v1859_v60, %v1644_v29  ;;  %v6370_v0 = vadd.f32 %v1902_v61, %v1652_v43  ;;  %v1861_v1 = vpop.f32.mrb[47].mxu1  ;;  %v1904_v2 = vpop.f32.mrb[35].mxu0 }
 0x960   :  { %v1908_v3 = vmul.f32 %v6360_v53, %v6360_v53  ;;  %v1910_v7 = vmul.f32 %v6362_v56, %v6362_v56  ;;  %v6376_v8 = vadd.f32 %v1861_v1, %v1648_v38  ;;  %v6378_v9 = vadd.f32 %v1904_v2, %v1656_v44 }
 0x961   :  { %v1915_v10 = vmul.f32 %v1907_v62, %v6356_v47  ;;  %v1917_v11 = vmul.f32 %v1909_v63, %v6358_v48  ;;  %v1911_v13 = vmul.f32 %v6368_v59, %v6368_v59  ;;  %v1913_v14 = vmul.f32 %v6370_v0, %v6370_v0 }
 0x962   :  { %v1916_v18 = vmul.f32 %v1908_v3, %v6360_v53  ;;  %v1918_v15 = vmul.f32 %v1910_v7, %v6362_v56  ;;  %v1912_v16 = vmul.f32 %v6376_v8, %v6376_v8  ;;  %v1914_v50 = vmul.f32 %v6378_v9, %v6378_v9 }
 0x963   :  { %v1923_v17 = vmul.f32 0.044715, %v1915_v10  ;;  %v1925_v51 = vmul.f32 0.044715, %v1917_v11  ;;  %v1919_v19 = vmul.f32 %v1911_v13, %v6368_v59  ;;  %v1921_v20 = vmul.f32 %v1913_v14, %v6370_v0 }
 0x964   :  { %v1924_v22 = vmul.f32 0.044715, %v1916_v18  ;;  %v1926_v23 = vmul.f32 0.044715, %v1918_v15  ;;  %v1920_v24 = vmul.f32 %v1912_v16, %v6376_v8  ;;  %v1922_v25 = vmul.f32 %v1914_v50, %v6378_v9 }
 0x965   :  { %v1931_v26 = vadd.f32 %v1923_v17, %v6356_v47  ;;  %v1933_v27 = vadd.f32 %v1925_v51, %v6358_v48  ;;  %v1927_v21 = vmul.f32 0.044715, %v1919_v19  ;;  %v1929_v28 = vmul.f32 0.044715, %v1921_v20 }
 0x966   :  { %v1932_v31 = vadd.f32 %v1924_v22, %v6360_v53  ;;  %v1934_v32 = vadd.f32 %v1926_v23, %v6362_v56  ;;  %v1928_v33 = vmul.f32 0.044715, %v1920_v24  ;;  %v1930_v34 = vmul.f32 0.044715, %v1922_v25 }
 0x967   :  { %v1939_v35 = vmul.f32 0.7978846, %v1931_v26  ;;  %v1941_v36 = vmul.f32 0.7978846, %v1933_v27  ;;  %v1935_v12 = vadd.f32 %v1927_v21, %v6368_v59  ;;  %v1937_v37 = vadd.f32 %v1929_v28, %v6370_v0 }
 0x968   :  { %v1940_v39 = vmul.f32 0.7978846, %v1932_v31  ;;  %v1942_v40 = vmul.f32 0.7978846, %v1934_v32  ;;  %v1936_v41 = vadd.f32 %v1928_v33, %v6376_v8  ;;  %v1938_v29 = vadd.f32 %v1930_v34, %v6378_v9 }
 0x969   :  { %5669 = vtanh.f32 %v1939_v35  ;;  %v1943_v43 = vmul.f32 0.7978846, %v1935_v12  ;;  %v1945_v38 = vmul.f32 0.7978846, %v1937_v37 }
 0x96a   :  { %5671 = vtanh.f32 %v1941_v36  ;;  %v1944_v44 = vmul.f32 0.7978846, %v1936_v41  ;;  %v1946_v45 = vmul.f32 0.7978846, %v1938_v29 }
 0x96b   :  { %5673 = vtanh.f32 %v1940_v39 }
 0x96c   :  { %5675 = vtanh.f32 %v1942_v40 }
 0x96d   :  { %5677 = vtanh.f32 %v1943_v43 }
 0x96e   :  { %5679 = vtanh.f32 %v1945_v38 }
 0x96f   :  { %5681 = vtanh.f32 %v1944_v44 }
 0x970   :  { %5683 = vtanh.f32 %v1946_v45 }
 0x973   :  { %v5670_v46 = vpop.eup %5669 }
 0x974   :  { %v5672_v49 = vpop.eup %5671  ;;  %v1955_v52 = vadd.f32 1.0, %v5670_v46  ;;  %v5509_v46 = vld [vmem:[#allocation5 + $0xc0] ss:$12 sps:$4 sm:$0xff]  }
 0x975   :  { %v5674_v60 = vpop.eup %5673  ;;  %v1957_v61 = vadd.f32 1.0, %v5672_v49  ;;  %v5511_v49 = vld [vmem:[#allocation5 + $0xc4] ss:$12 sps:$4 sm:$0xff]  }
 0x976   :  { %v5676_v62 = vpop.eup %5675  ;;  %v1956_v63 = vadd.f32 1.0, %v5674_v60  ;;  %v1963_v7 = vmul.f32 0.5, %v1955_v52  ;;  %v5512_v52 = vld [vmem:[#allocation5 + $0xc8] ss:$12 sps:$4 sm:$0xff]   ;;  %2550 = vmatprep.subr.bf16.mxu1 %v5511_v49 }
 0x977   :  { %v5678_v1 = vpop.eup %5677  ;;  %v1958_v2 = vadd.f32 1.0, %v5676_v62  ;;  %v1965_v13 = vmul.f32 0.5, %v1957_v61  ;;  %v5515_v60 = vld [vmem:[#allocation5 + $0xdc] ss:$12 sps:$4 sm:$0xff]   ;;  %v5516_v61 = vld [vmem:[#allocation5 + $0xe0] ss:$12 sps:$4 sm:$0xff]  }
 0x978   :  { %v5680_v3 = vpop.eup %5679  ;;  %v1959_v10 = vadd.f32 1.0, %v5678_v1  ;;  %v1964_v50 = vmul.f32 0.5, %v1956_v63  ;;  %v1971_v20 = vmul.f32 %v1963_v7, %v6356_v47  ;;  %v5513_v62 = vld [vmem:[#allocation5 + $0xd8] ss:$12 sps:$4 sm:$0xff]  }
 0x979   :  { %v5682_v11 = vpop.eup %5681  ;;  %v1961_v14 = vadd.f32 1.0, %v5680_v3  ;;  %v1966_v19 = vmul.f32 0.5, %v1958_v2  ;;  %v1973_v24 = vmul.f32 %v1965_v13, %v6358_v48  ;;  %v5517_v13 = vld [vmem:[#allocation5 + $0xf0] ss:$12 sps:$4 sm:$0xff]  }
 0x97a   :  { %v5684_v18 = vpop.eup %5683  ;;  %v1967_v15 = vmul.f32 0.5, %v1959_v10  ;;  %v1960_v16 = vadd.f32 1.0, %v5682_v11  ;;  %v1972_v27 = vmul.f32 %v1964_v50, %v6360_v53  ;;  %v5519_v11 = vld [vmem:[#allocation5 + $0xf4] ss:$12 sps:$4 sm:$0xff]   ;;  %v5527_v50 = vld [vmem:[#allocation5 + $0x124] ss:$12 sps:$4 sm:$0xff]  }
 0x97b   :  { %v1969_v17 = vmul.f32 0.5, %v1961_v14  ;;  %v1962_v51 = vadd.f32 1.0, %v5684_v18  ;;  %v1974_v31 = vmul.f32 %v1966_v19, %v6362_v56  ;;  %v4639_v56 = vld [vmem:[%s6787_s13] ss:$0 sm:$0xff]  ;;  %v5520_v14 = vld [vmem:[#allocation5 + $0xf8] ss:$12 sps:$4 sm:$0xff]  }
 0x97c   :  { %v1975_v22 = vmul.f32 %v1967_v15, %v6368_v59  ;;  %v1968_v23 = vmul.f32 0.5, %v1960_v16  ;;  %v5523_v18 = vld [vmem:[#allocation5 + $0x10c] ss:$12 sps:$4 sm:$0xff]   ;;  %v5521_v15 = vld [vmem:[#allocation5 + $0x108] ss:$12 sps:$4 sm:$0xff]  }
 0x97d   :  { %v1977_v25 = vmul.f32 %v1969_v17, %v6370_v0  ;;  %v1970_v26 = vmul.f32 0.5, %v1962_v51  ;;  %v5524_v16 = vld [vmem:[#allocation5 + $0x110] ss:$12 sps:$4 sm:$0xff]   ;;  %v5525_v17 = vld [vmem:[#allocation5 + $0x120] ss:$12 sps:$4 sm:$0xff]  }
 0x97e   :  { %v1976_v21 = vmul.f32 %v1968_v23, %v6376_v8  ;;  %v1979_v28 = vpack.c.bf16 %v1975_v22, %v1971_v20  ;;  %v5528_v51 = vld [vmem:[#allocation5 + $0x128] ss:$12 sps:$4 sm:$0xff]   ;;  %v5529_v20 = vld [vmem:[#allocation5 + $0x138] ss:$12 sps:$4 sm:$0xff]   ;;  %v5532_v22 = vld [vmem:[#allocation5 + $0x140] ss:$12 sps:$4 sm:$0xff]  }
 0x97f   :  { %v1978_v32 = vmul.f32 %v1970_v26, %v6378_v9  ;;  %v1981_v33 = vpack.c.bf16 %v1977_v25, %v1973_v24  ;;  %v5531_v19 = vld [vmem:[#allocation5 + $0x13c] ss:$12 sps:$4 sm:$0xff]   ;;  %v5535_v23 = vld [vmem:[#allocation5 + $0x154] ss:$12 sps:$4 sm:$0xff]   ;;  %v5536_v25 = vld [vmem:[#allocation5 + $0x158] ss:$12 sps:$4 sm:$0xff]  }
 0x980   :  { %v1980_v34 = vpack.c.bf16 %v1976_v21, %v1972_v27  ;;  %v5533_v24 = vld [vmem:[#allocation5 + $0x150] ss:$12 sps:$4 sm:$0xff]   ;;  %v5539_v26 = vld [vmem:[#allocation5 + $0x16c] ss:$12 sps:$4 sm:$0xff]   ;;  %v5537_v27 = vld [vmem:[#allocation5 + $0x168] ss:$12 sps:$4 sm:$0xff]  }
 0x981   :  { %v1982_v47 = vpack.c.bf16 %v1978_v32, %v1974_v31  ;;  %v5540_v21 = vld [vmem:[#allocation5 + $0x170] ss:$12 sps:$4 sm:$0xff]  }
 0x982   :  { %2278 = vmatprep.mubr.bf16.mxu1 %v1980_v34 }
 0x983   :  { %2319 = vmatprep.mubr.bf16.mxu0 %v1982_v47  ;;  %2279 = vmatmul.mubr.bf16.vlgmr.msra.gmra.mrb[48].mxu1 %v1979_v28 }
 0x984   :  { %2320 = vmatmul.mubr.bf16.vlgmr.msra.gmra.mrb[36].mxu0 %v1981_v33  ;;  %2582 = vmatprep.mubr.bf16.mxu1 %v5907_v30 }
 0x985   :  { %5140 = vmatprep.mubr.msk.bf16.mxu0 %vm5908_vm0, %v5906_v4  ;;  %5125 = vmatpush3.bf16.msra.mxu0 %v5512_v52 }
 0x986   :  { %2551 = vmatpush1.bf16.msra.mxu1 %v5509_v46  ;;  %5126 = vmatprep.subr.bf16.mxu0 %v5906_v4 }
 0x987   :  { %2552 = vmatprep.subr.bf16.mxu1 %v5515_v60 }
 0x989   :  { %5127 = vmatpush3.bf16.msra.mxu0 %v5516_v61 }
 0x98a   :  { %2553 = vmatpush1.bf16.msra.mxu1 %v5513_v62  ;;  %5128 = vmatprep.subr.bf16.mxu0 %v5906_v4 }
 0x98b   :  { %2554 = vmatprep.subr.bf16.mxu1 %v5519_v11 }
 0x98d   :  { %5129 = vmatpush3.bf16.msra.mxu0 %v5520_v14 }
 0x98e   :  { %2555 = vmatpush1.bf16.msra.mxu1 %v5517_v13  ;;  %5130 = vmatprep.subr.bf16.mxu0 %v5906_v4 }
 0x98f   :  { %2556 = vmatprep.subr.bf16.mxu1 %v5523_v18 }
 0x991   :  { %5131 = vmatpush3.bf16.msra.mxu0 %v5524_v16 }
 0x992   :  { %2557 = vmatpush1.bf16.msra.mxu1 %v5521_v15  ;;  %5132 = vmatprep.subr.bf16.mxu0 %v5906_v4 }
 0x993   :  { %2558 = vmatprep.subr.bf16.mxu1 %v5527_v50 }
 0x995   :  { %5133 = vmatpush3.bf16.msra.mxu0 %v5528_v51 }
 0x996   :  { %2559 = vmatpush1.bf16.msra.mxu1 %v5525_v17  ;;  %5134 = vmatprep.subr.bf16.mxu0 %v5906_v4 }
 0x997   :  { %2560 = vmatprep.subr.bf16.mxu1 %v5531_v19 }
 0x999   :  { %5135 = vmatpush3.bf16.msra.mxu0 %v5532_v22 }
 0x99a   :  { %2561 = vmatpush1.bf16.msra.mxu1 %v5529_v20  ;;  %5136 = vmatprep.subr.bf16.mxu0 %v5906_v4 }
 0x99b   :  { %2562 = vmatprep.subr.bf16.mxu1 %v5535_v23 }
 0x99d   :  { %5137 = vmatpush3.bf16.msra.mxu0 %v5536_v25 }
 0x99e   :  { %2563 = vmatpush1.bf16.msra.mxu1 %v5533_v24  ;;  %5138 = vmatprep.subr.bf16.mxu0 %v5906_v4 }
 0x99f   :  { %2564 = vmatprep.subr.bf16.mxu1 %v5539_v26 }
 0x9a1   :  { %5139 = vmatpush3.bf16.msra.mxu0 %v5540_v21 }
 0x9a2   :  { %2565 = vmatpush1.bf16.msra.mxu1 %v5537_v27  ;;  %5168 = vmatprep.subr.bf16.mxu0 %v5906_v4 }
 0x9a3   :  { %5144 = vmatprep.subr.bf16.mxu1 %v5906_v4 }
 0xa56   :  { %v4866_v48 = vpop.f32.mrb[48].mxu1 }
 0xa57   :  { %v4888_v53 = vpop.f32.mrb[36].mxu0  ;;  %v4867_v59 = vpop.f32.mrb[49].mxu1 }
 0xa58   :  { %v4868_v0 = vadd.f32 %v4867_v59, %v4866_v48  ;;  %v4889_v8 = vpop.f32.mrb[37].mxu0  ;;  %v4869_v9 = vpop.f32.mrb[50].mxu1 }
 0xa59   :  { %v4890_v35 = vadd.f32 %v4889_v8, %v4888_v53  ;;  %v4891_v36 = vpop.f32.mrb[38].mxu0  ;;  %v4870_v12 = vpop.f32.mrb[51].mxu1  ;;  %v4672_v53 = vld [vmem:[%s6788_s14] ss:$0 sm:$0xff] }
 0xa5a   :  { %v2281_v37 = vadd.f32 %v4868_v0, %v4639_v56  ;;  %v4871_v39 = vadd.f32 %v4870_v12, %v4869_v9  ;;  %v4892_v40 = vpop.f32.mrb[39].mxu0  ;;  %v4673_v9 = vld [vmem:[%s6789_s15] ss:$0 sm:$0xff] }
 0xa5b   :  { %v4893_v41 = vadd.f32 %v4892_v40, %v4891_v36 }
 0xa5c   :  { %v2322_v29 = vadd.f32 %v4890_v35, %v2281_v37  ;;  %v2284_v43 = vadd.f32 %v4871_v39, %v4639_v56  ;;  %v4674_v39 = vld [vmem:[%s6779_s5 + $0x3] sm:$0x7] }
 0xa5d   :  { %v2414_v40 = vrot.slane %v4674_v39, %v6106_v55 }
 0xa5e   :  { %v2325_v38 = vadd.f32 %v4893_v41, %v2284_v43  ;;  %v2328_v44 = vadd.f32 %v2322_v29, %v6340_v5  ;;  %v2410_v41 = vrot.slane %v4674_v39, %v6112_v57 }
 0xa60   :  { %2332 = vadd.xlane.f32.xlu1 %v2328_v44  ;;  %v2329_v45 = vadd.f32 %v2325_v38, %v6342_v6  ;;  %v2418_v38 = vrot.slane %v4674_v39, %v6115_v58 }
 0xa62   :  { %2334 = vadd.xlane.f32.xlu0 %v2329_v45 }
 0xaed   :  { %v2333_v5 = vpop.xlane.xlu1 %2332 }
 0xaee   :  { %v2336_v63 = vmul.f32 0.0078125, %v2333_v5 }
 0xaef   :  { %v2335_v6 = vpop.xlane.xlu0 %2334 }
 0xaf0   :  { %v2338_v1 = vsub.f32 %v2328_v44, %v2336_v63  ;;  %v2337_v2 = vmul.f32 0.0078125, %v2335_v6 }
 0xaf2   :  { %v2339_v3 = vsub.f32 %v2329_v45, %v2337_v2  ;;  %v2340_v7 = vmul.f32 %v2338_v1, %v2338_v1 }
 0xaf4   :  { %2342 = vadd.xlane.f32.xlu1 %v2340_v7  ;;  %v2341_v10 = vmul.f32 %v2339_v3, %v2339_v3 }
 0xaf6   :  { %2344 = vadd.xlane.f32.xlu0 %v2341_v10 }
 0xb81   :  { %v2343_v28 = vpop.xlane.xlu1 %2342 }
 0xb82   :  { %v2346_v31 = vmul.f32 0.0078125, %v2343_v28 }
 0xb83   :  { %v2345_v32 = vpop.xlane.xlu0 %2344 }
 0xb84   :  { %v2348_v33 = vadd.f32 1e-12, %v2346_v31  ;;  %v2347_v34 = vmul.f32 0.0078125, %v2345_v32 }
 0xb86   :  { %5685 = vrsqrt.f32 %v2348_v33  ;;  %v2349_v47 = vadd.f32 1e-12, %v2347_v34 }
 0xb88   :  { %5687 = vrsqrt.f32 %v2349_v47 }
 0xb90   :  { %v5686_v48 = vpop.eup %5685 }
 0xb91   :  { %v2352_v56 = vmul.f32 %v5686_v48, %v2338_v1 }
 0xb92   :  { %v5688_v59 = vpop.eup %5687 }
 0xb93   :  { %v2353_v0 = vmul.f32 %v5688_v59, %v2339_v3  ;;  %v2360_v8 = vmul.f32 %v4672_v53, %v2352_v56 }
 0xb95   :  { %v2361_v35 = vmul.f32 %v4672_v53, %v2353_v0  ;;  %v6435_v36 = vadd.f32 %v4673_v9, %v2360_v8 }
 0xb97   :  { %v6437_v12 = vadd.f32 %v4673_v9, %v2361_v35 }
 0xb99   :  { %v2370_v37 = vpack.c.bf16 %v6437_v12, %v6435_v36 }
 0xb9b   :  { %2583 = vmatmul.mubr.bf16.vlgmr.msra.gmra.mrb[52].mxu1 %v2370_v37  ;;  %5141 = vmatmul.mubr.bf16.vlgmr.msra.gmra.mrb[40].mxu0 %v2370_v37 }
 0xb9c   :  { %5146 = vmatprep.mubr.msk.bf16.mxu1 %vm5908_vm0, %v5906_v4  ;;  %5170 = vmatprep.mubr.msk.bf16.mxu0 %vm5908_vm0, %v5906_v4 }
 0xc6e   :  { %v2584_v29 = vpop.f32.mrb[52].mxu1  ;;  %v2627_v43 = vpop.f32.mrb[40].mxu0 }
 0xc6f   :  { %v2586_v44 = vpop.f32.mrb[53].mxu1  ;;  %v5142_v45 = vpop.f32.mrb[41].mxu0  ;;  %v2585_v60 = vadd.f32 %v2584_v29, %v2410_v41  ;;  %v6454_v2 = vadd.f32 %v2627_v43, %v2418_v38 }
 0xc70   :  { %v2587_v46 = vadd.f32 %v2586_v44, %v2414_v40  ;;  %v2588_v49 = vpop.f32.mrb[54].mxu1  ;;  %v2630_v52 = vpop.f32.mrb[42].mxu0 }
 0xc71   :  { %v2589_v61 = vadd.f32 %v2588_v49, %v2410_v41  ;;  %v6451_v62 = vadd.f32 %v2630_v52, %v2418_v38  ;;  %v2590_v5 = vpop.f32.mrb[55].mxu1  ;;  %v5143_v63 = vpop.f32.mrb[43].mxu0  ;;  %v2654_v18 = vpack.c.bf16 %v2585_v60, %v2585_v60  ;;  %v2710_v43 = vpack.c.bf16 %v6454_v2, %v6454_v2 }
 0xc72   :  { %v2591_v6 = vadd.f32 %v2590_v5, %v2414_v40  ;;  %2664 = vrot.lane.b32.xlu1 %v2587_v46, %s5909_s22  ;;  %v2682_v1 = vpack.c.bf16 %v2587_v46, %v2587_v46 }
 0xc73   :  { %v5344_v3 = vpack.i.bf16 %v2589_v61, %v2585_v60  ;;  %v6459_v13 = vpack.i.bf16 %v6451_v62, %v6454_v2  ;;  %v2655_v16 = vpack.c.bf16 %v2589_v61, %v2589_v61  ;;  %v2711_v49 = vpack.c.bf16 %v6451_v62, %v6451_v62  ;;  %v5745_v62 = vld [vmem:[%s6775_s1] ss:$0 sm:$0xff] }
 0xc74   :  { %v2722_v7 = vsel %vm520_vm1, %v2682_v1, 0  ;;  %v5334_v10 = vpack.i.bf16 %v2591_v6, %v2585_v60  ;;  %v5339_v11 = vpack.i.bf16 %v2591_v6, %v2587_v46  ;;  %v2683_v14 = vpack.c.bf16 %v2591_v6, %v2591_v6 }
 0xc75   :  { %5145 = vmatpush3.bf16.xpose.msra.mxu1 %v2722_v7  ;;  %v3202_v46 = vsel %vm1053_vm2, %v2710_v43, 0  ;;  %v3248_v60 = vsel %vm1053_vm2, %v2711_v49, 0 }
 0xc76   :  { %2638 = vrot.lane.b32.xlu1 %v2589_v61, %s5909_s22  ;;  %5335 = vrot.lane.b32.xlu0 %v5334_v10, %s5909_s22  ;;  %v2768_v15 = vsel %vm520_vm1, %v2683_v14, 0 }
 0xc77   :  { %5150 = vmatprep.subr.bf16.mxu1 %v5906_v4 }
 0xc7a   :  { %5340 = vrot.lane.b32.xlu1 %v5339_v11, %s5903_s19  ;;  %5350 = vrot.lane.b32.xlu0 %v5339_v11, %s5910_s0 }
 0xc7c   :  { %5147 = vmatmul.mubr.msk.bf16.vlgmr.msra.gmra.mrb[56].mxu1 %vm520_vm1, %v2654_v18 }
 0xc7d   :  { %5151 = vmatpush3.bf16.xpose.msra.mxu1 %v2768_v15  ;;  %5152 = vmatprep.mubr.msk.bf16.mxu1 %vm5908_vm0, %v5906_v4  ;;  %v5746_v15 = vld [vmem:[%s6775_s1 + $0x1] ss:$0 sm:$0xff] }
 0xc7e   :  { %5345 = vrot.lane.b32.xlu1 %v5344_v3, %s5903_s19  ;;  %5156 = vmatprep.subr.bf16.mxu1 %v5906_v4 }
 0xc82   :  { %5355 = vrot.lane.b32.xlu1 %v5344_v3, %s5910_s0 }
 0xc84   :  { %5153 = vmatmul.mubr.msk.bf16.vlgmr.msra.gmra.mrb[60].mxu1 %vm520_vm1, %v2655_v16 }
 0xc85   :  { %5158 = vmatprep.mubr.msk.bf16.mxu1 %vm5908_vm0, %v5906_v4 }
 0xce4   :  { %v2665_v50 = vpop.permute.xlu1 %2664 }
 0xce5   :  { %v2684_v17 = vpack.c.bf16 %v2665_v50, %v2665_v50 }
 0xce7   :  { %v2814_v51 = vsel %vm520_vm1, %v2684_v17, 0 }
 0xce8   :  { %v2639_v19 = vpop.permute.xlu1 %2638  ;;  %v5336_v20 = vpop.permute.xlu0 %5335  ;;  %5157 = vmatpush3.bf16.xpose.msra.mxu1 %v2814_v51 }
 0xce9   :  { %v5338_v22 = vunpack.i.h.bf16 %v5336_v20  ;;  %v5337_v23 = vunpack.i.l.bf16 %v5336_v20  ;;  %5162 = vmatprep.subr.bf16.mxu1 %v5906_v4  ;;  %v2657_v56 = vpack.c.bf16 %v2639_v19, %v2639_v19 }
 0xceb   :  { %v2685_v24 = vpack.c.bf16 %v5338_v22, %v5338_v22  ;;  %v2656_v26 = vpack.c.bf16 %v5337_v23, %v5337_v23  ;;  %v5747_v23 = vld [vmem:[%s6775_s1 + $0x2] ss:$0 sm:$0xff] }
 0xcec   :  { %v5341_v25 = vpop.permute.xlu1 %5340  ;;  %v5351_v21 = vpop.permute.xlu0 %5350 }
 0xced   :  { %v5342_v27 = vunpack.i.l.bf16 %v5341_v25  ;;  %v5343_v28 = vunpack.i.h.bf16 %v5341_v25  ;;  %v2860_v32 = vsel %vm520_vm1, %v2685_v24, 0  ;;  %v5352_v34 = vunpack.i.l.bf16 %v5351_v21 }
 0xcee   :  { %v5353_v0 = vunpack.i.h.bf16 %v5351_v21 }
 0xcef   :  { %v2686_v31 = vpack.c.bf16 %v5342_v27, %v5342_v27  ;;  %5159 = vmatmul.mubr.msk.bf16.vlgmr.msra.gmra.mrb[64].mxu1 %vm520_vm1, %v2656_v26  ;;  %v2687_v48 = vpack.c.bf16 %v5343_v28, %v5343_v28  ;;  %v2688_v59 = vpack.c.bf16 %v5352_v34, %v5352_v34 }
 0xcf0   :  { %v5346_v33 = vpop.permute.xlu1 %5345  ;;  %5163 = vmatpush3.bf16.xpose.msra.mxu1 %v2860_v32  ;;  %5164 = vmatprep.mubr.msk.bf16.mxu1 %vm5908_vm0, %v5906_v4  ;;  %v2689_v40 = vpack.c.bf16 %v5353_v0, %v5353_v0  ;;  %v5749_v0 = vld [vmem:[%s6775_s1 + $0x4] ss:$0 sm:$0xff] }
 0xcf1   :  { %v2906_v47 = vsel %vm520_vm1, %v2686_v31, 0  ;;  %5174 = vmatprep.subr.bf16.mxu1 %v5906_v4  ;;  %v5347_v53 = vunpack.i.l.bf16 %v5346_v33  ;;  %v2952_v9 = vsel %vm520_vm1, %v2687_v48, 0  ;;  %v5348_v37 = vunpack.i.h.bf16 %v5346_v33 }
 0xcf2   :  { %5169 = vmatpush3.bf16.xpose.msra.mxu0 %v2906_v47  ;;  %v2998_v39 = vsel %vm520_vm1, %v2688_v59, 0  ;;  %v3044_v44 = vsel %vm520_vm1, %v2689_v40, 0  ;;  %v5748_v47 = vld [vmem:[%s6775_s1 + $0x3] ss:$0 sm:$0xff] }
 0xcf3   :  { %5180 = vmatprep.subr.bf16.mxu0 %v5906_v4  ;;  %v2658_v8 = vpack.c.bf16 %v5347_v53, %v5347_v53  ;;  %v2659_v29 = vpack.c.bf16 %v5348_v37, %v5348_v37 }
 0xcf4   :  { %v5356_v35 = vpop.permute.xlu1 %5355 }
 0xcf5   :  { %v5357_v41 = vunpack.i.l.bf16 %v5356_v35  ;;  %v5358_v45 = vunpack.i.h.bf16 %v5356_v35 }
 0xcf7   :  { %5165 = vmatmul.mubr.msk.bf16.vlgmr.msra.gmra.mrb[68].mxu1 %vm520_vm1, %v2657_v56  ;;  %v2660_v38 = vpack.c.bf16 %v5357_v41, %v5357_v41  ;;  %v2661_v52 = vpack.c.bf16 %v5358_v45, %v5358_v45 }
 0xcf8   :  { %5175 = vmatpush3.bf16.xpose.msra.mxu1 %v2952_v9  ;;  %5176 = vmatprep.mubr.msk.bf16.mxu1 %vm5908_vm0, %v5906_v4 }
 0xcf9   :  { %5171 = vmatmul.mubr.msk.bf16.vlgmr.msra.gmra.mrb[44].mxu0 %vm520_vm1, %v2658_v8  ;;  %5186 = vmatprep.subr.bf16.mxu1 %v5906_v4 }
 0xcfa   :  { %5181 = vmatpush3.bf16.xpose.msra.mxu0 %v2998_v39  ;;  %5182 = vmatprep.mubr.msk.bf16.mxu0 %vm5908_vm0, %v5906_v4 }
 0xcfb   :  { %5192 = vmatprep.subr.bf16.mxu0 %v5906_v4 }
 0xcff   :  { %5177 = vmatmul.mubr.msk.bf16.vlgmr.msra.gmra.mrb[72].mxu1 %vm520_vm1, %v2659_v29 }
 0xd00   :  { %5187 = vmatpush3.bf16.xpose.msra.mxu1 %v3044_v44  ;;  %5188 = vmatprep.mubr.msk.bf16.mxu1 %vm5908_vm0, %v5906_v4  ;;  %v5750_v44 = vld [vmem:[%s6775_s1 + $0x5] ss:$0 sm:$0xff] }
 0xd01   :  { %5183 = vmatmul.mubr.msk.bf16.vlgmr.msra.gmra.mrb[48].mxu0 %vm520_vm1, %v2660_v38  ;;  %5198 = vmatprep.subr.bf16.mxu1 %v5906_v4 }
 0xd02   :  { %5193 = vmatpush3.bf16.msra.mxu0 %v3202_v46  ;;  %5194 = vmatprep.mubr.msk.bf16.mxu0 %vm5908_vm0, %v5906_v4 }
 0xd03   :  { %5204 = vmatprep.subr.bf16.mxu0 %v5906_v4 }
 0xd07   :  { %5189 = vmatmul.mubr.msk.bf16.vlgmr.msra.gmra.mrb[76].mxu1 %vm520_vm1, %v2661_v52 }
 0xd08   :  { %5199 = vmatpush3.bf16.msra.mxu1 %v3248_v60  ;;  %5200 = vmatprep.mubr.msk.bf16.mxu1 %vm5908_vm0, %v5906_v4  ;;  %v5751_v60 = vld [vmem:[%s6775_s1 + $0x6] ss:$0 sm:$0xff] }
 0xd09   :  { %5210 = vmatprep.subr.bf16.mxu1 %v5906_v4 }
 0xd4f   :  { %v2758_v61 = vpop.f32.mrb[56].mxu1 }
 0xd50   :  { %v3086_v5 = vmul.f32 0.17677669, %v2758_v61  ;;  %v5148_v63 = vpop.f32.mrb[57].mxu1 }
 0xd51   :  { %v2761_v6 = vpop.f32.mrb[58].mxu1 }
 0xd52   :  { %v5149_v1 = vpop.f32.mrb[59].mxu1  ;;  %v6517_v2 = vadd.f32 %v5745_v62, %v3086_v5 }
 0xd54   :  { %v3102_v3 = vsel %vm953_vm3, %v6517_v2, -inf }
 0xd55   :  { %3103 = vmax.xlane.f32.xlu0 %v3102_v3 }
 0xd57   :  { %v2804_v7 = vpop.f32.mrb[60].mxu1 }
 0xd58   :  { %v3087_v10 = vmul.f32 0.17677669, %v2804_v7  ;;  %v5154_v11 = vpop.f32.mrb[61].mxu1  ;;  %v5752_v7 = vld [vmem:[%s6775_s1 + $0x7] ss:$0 sm:$0xff] }
 0xd59   :  { %v2807_v14 = vpop.f32.mrb[62].mxu1 }
 0xd5a   :  { %v5155_v18 = vpop.f32.mrb[63].mxu1  ;;  %v6524_v16 = vadd.f32 %v5746_v15, %v3087_v10 }
 0xd5c   :  { %v3105_v50 = vsel %vm953_vm3, %v6524_v16, -inf }
 0xd5d   :  { %3106 = vmax.xlane.f32.xlu1 %v3105_v50 }
 0xdc2   :  { %v2850_v17 = vpop.f32.mrb[64].mxu1 }
 0xdc3   :  { %v3088_v51 = vmul.f32 0.17677669, %v2850_v17  ;;  %v5160_v19 = vpop.f32.mrb[65].mxu1 }
 0xdc4   :  { %v2853_v20 = vpop.f32.mrb[66].mxu1 }
 0xdc5   :  { %v5161_v22 = vpop.f32.mrb[67].mxu1  ;;  %v6531_v24 = vadd.f32 %v5747_v23, %v3088_v51 }
 0xdc7   :  { %v3108_v25 = vsel %vm953_vm3, %v6531_v24, -inf }
 0xdc8   :  { %3109 = vmax.xlane.f32.xlu0 %v3108_v25 }
 0xdca   :  { %v2896_v26 = vpop.f32.mrb[68].mxu1 }
 0xdcb   :  { %v3089_v27 = vmul.f32 0.17677669, %v2896_v26  ;;  %v5166_v21 = vpop.f32.mrb[69].mxu1 }
 0xdcc   :  { %v2899_v28 = vpop.f32.mrb[70].mxu1  ;;  %v2942_v31 = vpop.f32.mrb[44].mxu0 }
 0xdcd   :  { %v3090_v32 = vmul.f32 0.17677669, %v2942_v31  ;;  %v5167_v33 = vpop.f32.mrb[71].mxu1  ;;  %v5172_v34 = vpop.f32.mrb[45].mxu0  ;;  %v3097_v48 = vadd.f32 %v5748_v47, %v3089_v27 }
 0xdce   :  { %v2945_v53 = vpop.f32.mrb[46].mxu0 }
 0xdcf   :  { %v5173_v56 = vpop.f32.mrb[47].mxu0  ;;  %v3111_v59 = vsel %vm953_vm3, %v3097_v48, -inf  ;;  %v3098_v8 = vadd.f32 %v5749_v0, %v3090_v32 }
 0xdd0   :  { %3112 = vmax.xlane.f32.xlu0 %v3111_v59 }
 0xdd1   :  { %v3114_v39 = vsel %vm953_vm3, %v3098_v8, -inf }
 0xdd2   :  { %v2988_v9 = vpop.f32.mrb[72].mxu1 }
 0xdd3   :  { %v3091_v35 = vmul.f32 0.17677669, %v2988_v9  ;;  %v5178_v37 = vpop.f32.mrb[73].mxu1 }
 0xdd4   :  { %v3034_v40 = vpop.f32.mrb[48].mxu0  ;;  %3115 = vmax.xlane.f32.xlu0 %v3114_v39  ;;  %v2991_v41 = vpop.f32.mrb[74].mxu1 }
 0xdd5   :  { %v3092_v29 = vmul.f32 0.17677669, %v3034_v40  ;;  %v5179_v43 = vpop.f32.mrb[75].mxu1  ;;  %v5184_v38 = vpop.f32.mrb[49].mxu0  ;;  %v6546_v45 = vadd.f32 %v5750_v44, %v3091_v35 }
 0xdd6   :  { %v3037_v46 = vpop.f32.mrb[50].mxu0 }
 0xdd7   :  { %v5185_v49 = vpop.f32.mrb[51].mxu0  ;;  %v3117_v52 = vsel %vm953_vm3, %v6546_v45, -inf  ;;  %v3100_v61 = vadd.f32 %v5751_v60, %v3092_v29 }
 0xdd8   :  { %3118 = vmax.xlane.f32.xlu1 %v3117_v52 }
 0xdd9   :  { %v3120_v5 = vsel %vm953_vm3, %v3100_v61, -inf }
 0xdda   :  { %3121 = vmax.xlane.f32.xlu0 %v3120_v5  ;;  %v3080_v63 = vpop.f32.mrb[76].mxu1 }
 0xddb   :  { %v3093_v6 = vmul.f32 0.17677669, %v3080_v63  ;;  %v5190_v1 = vpop.f32.mrb[77].mxu1 }
 0xddc   :  { %v3083_v62 = vpop.f32.mrb[78].mxu1 }
 0xddd   :  { %v5191_v3 = vpop.f32.mrb[79].mxu1  ;;  %v6557_v10 = vadd.f32 %v5752_v7, %v3093_v6 }
 0xddf   :  { %v3123_v11 = vsel %vm953_vm3, %v6557_v10, -inf }
 0xde0   :  { %3124 = vmax.xlane.f32.xlu1 %v3123_v11 }
 0xde2   :  { %v3104_v14 = vpop.xlane.xlu0 %3103 }
 0xde3   :  { %v3126_v18 = vsub.f32 %v6517_v2, %v3104_v14 }
 0xde5   :  { %v3134_v15 = vmul.f32 1.442695, %v3126_v18 }
 0xde7   :  { %5689 = vpow2.f32 %v3134_v15 }
 0xdea   :  { %v3107_v50 = vpop.xlane.xlu1 %3106 }
 0xdeb   :  { %v3127_v17 = vsub.f32 %v6524_v16, %v3107_v50 }
 0xded   :  { %v3136_v51 = vmul.f32 1.442695, %v3127_v17 }
 0xdef   :  { %5691 = vpow2.f32 %v3136_v51 }
 0xdf1   :  { %v5690_v19 = vpop.eup %5689 }
 0xdf2   :  { %v3150_v20 = vsel %vm953_vm3, %v5690_v19, 0.0 }
 0xdf3   :  { %3151 = vadd.xlane.f32.xlu0 %v3150_v20 }
 0xdf9   :  { %v5692_v22 = vpop.eup %5691 }
 0xdfa   :  { %v3153_v23 = vsel %vm953_vm3, %v5692_v22, 0.0 }
 0xdfb   :  { %3154 = vadd.xlane.f32.xlu1 %v3153_v23 }
 0xe55   :  { %v3110_v25 = vpop.xlane.xlu0 %3109 }
 0xe56   :  { %v3128_v26 = vsub.f32 %v6531_v24, %v3110_v25 }
 0xe58   :  { %v3138_v27 = vmul.f32 1.442695, %v3128_v26 }
 0xe5a   :  { %5693 = vpow2.f32 %v3138_v27 }
 0xe5d   :  { %v3113_v2 = vpop.xlane.xlu0 %3112 }
 0xe5e   :  { %v3129_v21 = vsub.f32 %v3097_v48, %v3113_v2 }
 0xe60   :  { %v3140_v28 = vmul.f32 1.442695, %v3129_v21 }
 0xe61   :  { %v3116_v31 = vpop.xlane.xlu0 %3115 }
 0xe62   :  { %5695 = vpow2.f32 %v3140_v28  ;;  %v3130_v16 = vsub.f32 %v3098_v8, %v3116_v31 }
 0xe64   :  { %v6566_v32 = vpop.eup %5693  ;;  %v3142_v33 = vmul.f32 1.442695, %v3130_v16 }
 0xe65   :  { %v3156_v34 = vsel %vm953_vm3, %v6566_v32, 0.0  ;;  %v3119_v35 = vpop.xlane.xlu1 %3118 }
 0xe66   :  { %5697 = vpow2.f32 %v3142_v33  ;;  %3157 = vadd.xlane.f32.xlu0 %v3156_v34  ;;  %v3131_v43 = vsub.f32 %v6546_v45, %v3119_v35 }
 0xe67   :  { %v3122_v47 = vpop.xlane.xlu0 %3121 }
 0xe68   :  { %v3132_v53 = vsub.f32 %v3100_v61, %v3122_v47  ;;  %v3144_v44 = vmul.f32 1.442695, %v3131_v43 }
 0xe6a   :  { %v3146_v56 = vmul.f32 1.442695, %v3132_v53 }
 0xe6c   :  { %v5696_v24 = vpop.eup %5695  ;;  %5699 = vpow2.f32 %v3146_v56 }
 0xe6d   :  { %v3159_v59 = vsel %vm953_vm3, %v5696_v24, 0.0  ;;  %v3125_v39 = vpop.xlane.xlu1 %3124 }
 0xe6e   :  { %3160 = vadd.xlane.f32.xlu1 %v3159_v59  ;;  %v3133_v46 = vsub.f32 %v6557_v10, %v3125_v39 }
 0xe70   :  { %v6571_v48 = vpop.eup %5697  ;;  %v3148_v60 = vmul.f32 1.442695, %v3133_v46 }
 0xe71   :  { %v3162_v0 = vsel %vm953_vm3, %v6571_v48, 0.0 }
 0xe72   :  { %3163 = vadd.xlane.f32.xlu0 %v3162_v0 }
 0xe76   :  { %v6575_v8 = vpop.eup %5699 }
 0xe77   :  { %v3168_v9 = vsel %vm953_vm3, %v6575_v8, 0.0 }
 0xe78   :  { %3169 = vadd.xlane.f32.xlu0 %v3168_v9 }
 0xe7f   :  { %5365 = vrot.lane.b32.xlu1 %v6459_v13, %s5903_s19 }
 0xe80   :  { %v3152_v37 = vpop.xlane.xlu0 %3151 }
 0xe81   :  { %5701 = vrcp.f32 %v3152_v37 }
 0xe88   :  { %v3155_v40 = vpop.xlane.xlu1 %3154 }
 0xe89   :  { %5703 = vrcp.f32 %v3155_v40 }
 0xe8a   :  { %5705 = vpow2.f32 %v3144_v44 }
 0xe8b   :  { %v5702_v41 = vpop.eup %5701  ;;  %5707 = vpow2.f32 %v3148_v60 }
 0xe8c   :  { %v3182_v29 = vmul.f32 %v5702_v41, %v5690_v19 }
 0xe8e   :  { %5360 = vrot.lane.b32.xlu0 %v6459_v13, %s5909_s22  ;;  %v3190_v38 = vpack.c.bf16 %v3182_v29, %v3182_v29 }
 0xe90   :  { %5195 = vmatmul.mubr.msk.bf16.vlgmr.msra.gmra.mrb[52].mxu0 %vm953_vm3, %v3190_v38 }
 0xe91   :  { %5206 = vmatprep.mubr.msk.bf16.mxu0 %vm5908_vm0, %v5906_v4 }
 0xe93   :  { %v5704_v49 = vpop.eup %5703 }
 0xe94   :  { %v3183_v52 = vmul.f32 %v5704_v49, %v5692_v22  ;;  %v6591_v45 = vpop.eup %5705 }
 0xe95   :  { %v3165_v5 = vsel %vm953_vm3, %v6591_v45, 0.0  ;;  %v6595_v63 = vpop.eup %5707 }
 0xe96   :  { %v3191_v61 = vpack.c.bf16 %v3183_v52, %v3183_v52  ;;  %v3171_v6 = vsel %vm953_vm3, %v6595_v63, 0.0 }
 0xe98   :  { %5201 = vmatmul.mubr.msk.bf16.vlgmr.msra.gmra.mrb[80].mxu1 %vm953_vm3, %v3191_v61 }
 0xe99   :  { %5212 = vmatprep.mubr.msk.bf16.mxu1 %vm5908_vm0, %v5906_v4 }
 0xea3   :  { %3166 = vadd.xlane.f32.xlu1 %v3165_v5 }
 0xea7   :  { %3172 = vadd.xlane.f32.xlu1 %v3171_v6  ;;  %v5542_v6 = vld [vmem:[#allocation7 + $0x48] sm:$0xff]  }
 0xeb8   :  { %5370 = vrot.lane.b32.xlu1 %v6459_v13, %s5910_s0 }
 0xef3   :  { %v3158_v1 = vpop.xlane.xlu0 %3157 }
 0xef4   :  { %5709 = vrcp.f32 %v3158_v1  ;;  %v5543_v1 = vld [vmem:[#allocation7 + $0x50] sm:$0xff]  }
 0xefb   :  { %v3161_v62 = vpop.xlane.xlu1 %3160 }
 0xefc   :  { %5711 = vrcp.f32 %v3161_v62 }
 0xefe   :  { %v5710_v11 = vpop.eup %5709 }
 0xeff   :  { %v3164_v3 = vpop.xlane.xlu0 %3163  ;;  %v5366_v10 = vpop.permute.xlu1 %5365  ;;  %v3184_v19 = vmul.f32 %v5710_v11, %v6566_v32 }
 0xf00   :  { %5713 = vrcp.f32 %v3164_v3  ;;  %v5368_v15 = vunpack.i.h.bf16 %v5366_v10  ;;  %v5367_v50 = vunpack.i.l.bf16 %v5366_v10 }
 0xf01   :  { %v3192_v2 = vpack.c.bf16 %v3184_v19, %v3184_v19 }
 0xf02   :  { %v2715_v23 = vpack.c.bf16 %v5368_v15, %v5368_v15  ;;  %v2714_v25 = vpack.c.bf16 %v5367_v50, %v5367_v50  ;;  %v5544_v15 = vld [vmem:[#allocation7 + $0x58] sm:$0xff]  }
 0xf04   :  { %v3386_v31 = vsel %vm1053_vm2, %v2714_v25, 0  ;;  %v3432_v16 = vsel %vm1053_vm2, %v2715_v23, 0  ;;  %v5546_v23 = vld [vmem:[#allocation7 + $0x68] sm:$0xff]   ;;  %v5547_v25 = vld [vmem:[#allocation7 + $0x70] sm:$0xff]  }
 0xf05   :  { %v3170_v7 = vpop.xlane.xlu0 %3169 }
 0xf06   :  { %v5712_v14 = vpop.eup %5711  ;;  %5715 = vrcp.f32 %v3170_v7 }
 0xf07   :  { %v3185_v20 = vmul.f32 %v5712_v14, %v5696_v24 }
 0xf09   :  { %v5361_v18 = vpop.permute.xlu0 %5360  ;;  %v3193_v21 = vpack.c.bf16 %v3185_v20, %v3185_v20 }
 0xf0a   :  { %v5363_v17 = vunpack.i.h.bf16 %v5361_v18  ;;  %v5362_v51 = vunpack.i.l.bf16 %v5361_v18  ;;  %v5714_v28 = vpop.eup %5713 }
 0xf0b   :  { %v3186_v32 = vmul.f32 %v5714_v28, %v6571_v48  ;;  %v5548_v28 = vld [vmem:[#allocation7 + $0x78] sm:$0xff]  }
 0xf0c   :  { %v2713_v22 = vpack.c.bf16 %v5363_v17, %v5363_v17  ;;  %v2712_v13 = vpack.c.bf16 %v5362_v51, %v5362_v51  ;;  %v5545_v51 = vld [vmem:[#allocation7 + $0x60] sm:$0xff]  }
 0xf0d   :  { %v3194_v33 = vpack.c.bf16 %v3186_v32, %v3186_v32 }
 0xf0e   :  { %v3294_v26 = vsel %vm1053_vm2, %v2712_v13, 0  ;;  %v3340_v27 = vsel %vm1053_vm2, %v2713_v22, 0 }
 0xf0f   :  { %5205 = vmatpush3.bf16.msra.mxu0 %v3294_v26  ;;  %5211 = vmatpush3.bf16.msra.mxu1 %v3340_v27 }
 0xf10   :  { %5216 = vmatprep.subr.bf16.mxu0 %v5906_v4  ;;  %5222 = vmatprep.subr.bf16.mxu1 %v5906_v4  ;;  %v5716_v53 = vpop.eup %5715 }
 0xf11   :  { %v3188_v0 = vmul.f32 %v5716_v53, %v6575_v8 }
 0xf12   :  { %5207 = vmatmul.mubr.msk.bf16.vlgmr.msra.gmra.mrb[56].mxu0 %vm953_vm3, %v3192_v2  ;;  %5213 = vmatmul.mubr.msk.bf16.vlgmr.msra.gmra.mrb[84].mxu1 %vm953_vm3, %v3193_v21 }
 0xf13   :  { %5217 = vmatpush3.bf16.msra.mxu0 %v3386_v31  ;;  %5223 = vmatpush3.bf16.msra.mxu1 %v3432_v16  ;;  %v3196_v29 = vpack.c.bf16 %v3188_v0, %v3188_v0 }
 0xf14   :  { %5218 = vmatprep.mubr.msk.bf16.mxu0 %vm5908_vm0, %v5906_v4  ;;  %5228 = vmatprep.subr.bf16.mxu0 %v5906_v4 }
 0xf15   :  { %5224 = vmatprep.mubr.msk.bf16.mxu1 %vm5908_vm0, %v5906_v4  ;;  %5234 = vmatprep.subr.bf16.mxu1 %v5906_v4 }
 0xf1a   :  { %5219 = vmatmul.mubr.msk.bf16.vlgmr.msra.gmra.mrb[60].mxu0 %vm953_vm3, %v3194_v33 }
 0xf1b   :  { %5230 = vmatprep.mubr.msk.bf16.mxu0 %vm5908_vm0, %v5906_v4 }
 0xf30   :  { %v3167_v34 = vpop.xlane.xlu1 %3166 }
 0xf31   :  { %5717 = vrcp.f32 %v3167_v34 }
 0xf34   :  { %v3173_v47 = vpop.xlane.xlu1 %3172 }
 0xf35   :  { %5719 = vrcp.f32 %v3173_v47 }
 0xf38   :  { %v5371_v56 = vpop.permute.xlu1 %5370 }
 0xf39   :  { %v5373_v24 = vunpack.i.h.bf16 %v5371_v56  ;;  %v5372_v59 = vunpack.i.l.bf16 %v5371_v56 }
 0xf3b   :  { %v5718_v48 = vpop.eup %5717  ;;  %v2716_v9 = vpack.c.bf16 %v5372_v59, %v5372_v59  ;;  %v2717_v37 = vpack.c.bf16 %v5373_v24, %v5373_v24 }
 0xf3c   :  { %v3187_v35 = vmul.f32 %v5718_v48, %v6591_v45 }
 0xf3d   :  { %v3478_v39 = vsel %vm1053_vm2, %v2716_v9, 0  ;;  %v3524_v43 = vsel %vm1053_vm2, %v2717_v37, 0 }
 0xf3e   :  { %5229 = vmatpush3.bf16.msra.mxu0 %v3478_v39  ;;  %v3195_v40 = vpack.c.bf16 %v3187_v35, %v3187_v35 }
 0xf3f   :  { %v5720_v41 = vpop.eup %5719  ;;  %5240 = vmatprep.subr.bf16.mxu0 %v5906_v4 }
 0xf40   :  { %5225 = vmatmul.mubr.msk.bf16.vlgmr.msra.gmra.mrb[88].mxu1 %vm953_vm3, %v3195_v40  ;;  %v3189_v8 = vmul.f32 %v5720_v41, %v6595_v63  ;;  %v5541_v63 = vld [vmem:[#allocation7 + $0x40] sm:$0xff]  }
 0xf41   :  { %5235 = vmatpush3.bf16.msra.mxu1 %v3524_v43  ;;  %5231 = vmatmul.mubr.msk.bf16.vlgmr.msra.gmra.mrb[64].mxu0 %vm953_vm3, %v3196_v29 }
 0xf42   :  { %5236 = vmatprep.mubr.msk.bf16.mxu1 %vm5908_vm0, %v5906_v4  ;;  %5256 = vmatprep.mubr.msk.bf16.mxu0 %vm5908_vm0, %v5906_v4  ;;  %v3197_v38 = vpack.c.bf16 %v3189_v8, %v3189_v8 }
 0xf43   :  { %5241 = vmatpush3.bf16.msra.mxu0 %v5541_v63 }
 0xf44   :  { %5242 = vmatprep.subr.bf16.mxu0 %v5906_v4 }
 0xf47   :  { %5243 = vmatpush3.bf16.msra.mxu0 %v5542_v6 }
 0xf48   :  { %5237 = vmatmul.mubr.msk.bf16.vlgmr.msra.gmra.mrb[92].mxu1 %vm953_vm3, %v3197_v38  ;;  %5244 = vmatprep.subr.bf16.mxu0 %v5906_v4 }
 0xf49   :  { %4004 = vmatprep.mubr.bf16.mxu1 %v5907_v30 }
 0xf4b   :  { %5245 = vmatpush3.bf16.msra.mxu0 %v5543_v1 }
 0xf4c   :  { %5246 = vmatprep.subr.bf16.mxu0 %v5906_v4 }
 0xf4f   :  { %5247 = vmatpush3.bf16.msra.mxu0 %v5544_v15  ;;  %v5558_v15 = vld [vmem:[#allocation8 + $0x128] ss:$16 sps:$4 sm:$0xff]  }
 0xf50   :  { %5248 = vmatprep.subr.bf16.mxu0 %v5906_v4 }
 0xf53   :  { %5249 = vmatpush3.bf16.msra.mxu0 %v5545_v51 }
 0xf54   :  { %5250 = vmatprep.subr.bf16.mxu0 %v5906_v4 }
 0xf57   :  { %5251 = vmatpush3.bf16.msra.mxu0 %v5546_v23  ;;  %v5566_v23 = vld [vmem:[#allocation8 + $0x14c] ss:$16 sps:$4 sm:$0xff]  }
 0xf58   :  { %5252 = vmatprep.subr.bf16.mxu0 %v5906_v4 }
 0xf5b   :  { %5253 = vmatpush3.bf16.msra.mxu0 %v5547_v25  ;;  %v5561_v25 = vld [vmem:[#allocation8 + $0x140] ss:$16 sps:$4 sm:$0xff]  }
 0xf5c   :  { %5254 = vmatprep.subr.bf16.mxu0 %v5906_v4 }
 0xf5f   :  { %5255 = vmatpush3.bf16.msra.mxu0 %v5548_v28  ;;  %v5570_v28 = vld [vmem:[#allocation8 + $0x168] ss:$16 sps:$4 sm:$0xff]  }
 0xf63   :  { %v6634_v44 = vpop.f32.mrb[52].mxu0 }
 0xf64   :  { %v5196_v46 = vpop.f32.mrb[53].mxu0 }
 0xf65   :  { %v3241_v49 = vpop.f32.mrb[54].mxu0 }
 0xf66   :  { %v5197_v52 = vpop.f32.mrb[55].mxu0 }
 0xf6b   :  { %v6636_v60 = vpop.f32.mrb[80].mxu1 }
 0xf6c   :  { %v5202_v61 = vpop.f32.mrb[81].mxu1 }
 0xf6d   :  { %v3287_v45 = vpop.f32.mrb[82].mxu1 }
 0xf6e   :  { %v5203_v5 = vpop.f32.mrb[83].mxu1 }
 0xfe5   :  { %v3330_v62 = vpop.f32.mrb[56].mxu0  ;;  %v3376_v3 = vpop.f32.mrb[84].mxu1 }
 0xfe6   :  { %v5374_v7 = vpack.i.bf16 %v3376_v3, %v3330_v62  ;;  %v5208_v10 = vpop.f32.mrb[57].mxu0  ;;  %v5214_v11 = vpop.f32.mrb[85].mxu1  ;;  %v5549_v3 = vld [vmem:[#allocation8 + $0x100] ss:$16 sps:$4 sm:$0xff]  }
 0xfe7   :  { %v3333_v14 = vpop.f32.mrb[58].mxu0  ;;  %v3379_v18 = vpop.f32.mrb[86].mxu1  ;;  %v5552_v10 = vld [vmem:[#allocation8 + $0x108] ss:$16 sps:$4 sm:$0xff]   ;;  %v5557_v11 = vld [vmem:[#allocation8 + $0x124] ss:$16 sps:$4 sm:$0xff]  }
 0xfe8   :  { %v5209_v50 = vpop.f32.mrb[59].mxu0  ;;  %5375 = vrot.lane.b32.xlu1 %v5374_v7, %s5910_s0  ;;  %v5215_v17 = vpop.f32.mrb[87].mxu1  ;;  %v5551_v7 = vld [vmem:[#allocation8 + $0x104] ss:$16 sps:$4 sm:$0xff]   ;;  %v5560_v14 = vld [vmem:[#allocation8 + $0x12c] ss:$16 sps:$4 sm:$0xff]  }
 0xfe9   :  { %3972 = vmatprep.subr.bf16.mxu1 %v5551_v7  ;;  %v5555_v18 = vld [vmem:[#allocation8 + $0x120] ss:$16 sps:$4 sm:$0xff]  }
 0xfea   :  { %3973 = vmatpush1.bf16.msra.mxu1 %v5549_v3  ;;  %v5599_v3 = vld [vmem:[#allocation10 + $0x100] sm:$0xff]  }
 0xfeb   :  { %3974 = vmatprep.subr.bf16.mxu1 %v5557_v11  ;;  %v5600_v7 = vld [vmem:[#allocation10 + $0x180] sm:$0xff]   ;;  %v5603_v11 = vld [vmem:[#allocation10 + $0x108] sm:$0xff]  }
 0xfed   :  { %v3422_v19 = vpop.f32.mrb[60].mxu0 }
 0xfee   :  { %v5220_v20 = vpop.f32.mrb[61].mxu0  ;;  %3975 = vmatpush1.bf16.msra.mxu1 %v5555_v18  ;;  %v5605_v18 = vld [vmem:[#allocation10 + $0x150] sm:$0xff]  }
 0xfef   :  { %v3425_v22 = vpop.f32.mrb[62].mxu0 }
 0xff0   :  { %v5221_v13 = vpop.f32.mrb[63].mxu0 }
 0xff1   :  { %v5563_v13 = vld [vmem:[#allocation8 + $0x144] ss:$16 sps:$4 sm:$0xff]  }
 0xff2   :  { %3976 = vmatprep.subr.bf16.mxu1 %v5563_v13  ;;  %v5615_v13 = vld [vmem:[#allocation10 + $0x120] sm:$0xff]  }
 0xff3   :  { %3977 = vmatpush1.bf16.msra.mxu1 %v5561_v25  ;;  %v5617_v25 = vld [vmem:[#allocation10 + $0x168] sm:$0xff]  }
0x1013   :  { %v3468_v26 = vpop.f32.mrb[88].mxu1 }
0x1014   :  { %v5379_v27 = vpack.i.bf16 %v3468_v26, %v3422_v19  ;;  %v5226_v2 = vpop.f32.mrb[89].mxu1  ;;  %v3514_v21 = vpop.f32.mrb[64].mxu0  ;;  %v5564_v26 = vld [vmem:[#allocation8 + $0x148] ss:$16 sps:$4 sm:$0xff]  }
0x1015   :  { %v3471_v31 = vpop.f32.mrb[90].mxu1  ;;  %v5232_v16 = vpop.f32.mrb[65].mxu0  ;;  %v5572_v2 = vld [vmem:[#allocation8 + $0x16c] ss:$16 sps:$4 sm:$0xff]  }
0x1016   :  { %v3517_v32 = vpop.f32.mrb[66].mxu0  ;;  %5380 = vrot.lane.b32.xlu0 %v5379_v27, %s5903_s19  ;;  %v5227_v33 = vpop.f32.mrb[91].mxu1  ;;  %v5569_v27 = vld [vmem:[#allocation8 + $0x164] ss:$16 sps:$4 sm:$0xff]   ;;  %v5578_v16 = vld [vmem:[#allocation8 + $0x18c] ss:$16 sps:$4 sm:$0xff]  }
0x1017   :  { %v5233_v34 = vpop.f32.mrb[67].mxu0  ;;  %3978 = vmatprep.subr.bf16.mxu1 %v5569_v27  ;;  %v5575_v31 = vld [vmem:[#allocation8 + $0x184] ss:$16 sps:$4 sm:$0xff]   ;;  %v5573_v32 = vld [vmem:[#allocation8 + $0x180] ss:$16 sps:$4 sm:$0xff]   ;;  %v5619_v27 = vld [vmem:[#allocation10 + $0x128] sm:$0xff]  }
0x1018   :  { %v5576_v33 = vld [vmem:[#allocation8 + $0x188] ss:$16 sps:$4 sm:$0xff]   ;;  %v5581_v34 = vld [vmem:[#allocation8 + $0x1a4] ss:$16 sps:$4 sm:$0xff]  }
0x101b   :  { %v3560_v47 = vpop.f32.mrb[92].mxu1 }
0x101c   :  { %v5384_v53 = vpack.i.bf16 %v3560_v47, %v3514_v21  ;;  %v5238_v56 = vpop.f32.mrb[93].mxu1  ;;  %v5567_v21 = vld [vmem:[#allocation8 + $0x160] ss:$16 sps:$4 sm:$0xff]   ;;  %v5584_v47 = vld [vmem:[#allocation8 + $0x1ac] ss:$16 sps:$4 sm:$0xff]  }
0x101d   :  { %v3563_v24 = vpop.f32.mrb[94].mxu1  ;;  %3979 = vmatpush1.bf16.msra.mxu1 %v5567_v21  ;;  %v5582_v56 = vld [vmem:[#allocation8 + $0x1a8] ss:$16 sps:$4 sm:$0xff]   ;;  %v5621_v21 = vld [vmem:[#allocation10 + $0x170] sm:$0xff]  }
0x101e   :  { %5385 = vrot.lane.b32.xlu1 %v5384_v53, %s5909_s22  ;;  %v5239_v4 = vpop.f32.mrb[95].mxu1  ;;  %3980 = vmatprep.subr.bf16.mxu1 %v5575_v31  ;;  %v5579_v53 = vld [vmem:[#allocation8 + $0x1a0] ss:$16 sps:$4 sm:$0xff]  }
0x101f   :  { %v5585_v24 = vld [vmem:[#allocation8 + $0x1c0] ss:$16 sps:$4 sm:$0xff]   ;;  %v5587_v4 = vld [vmem:[#allocation8 + $0x1c4] ss:$16 sps:$4 sm:$0xff]  }
0x1020   :  { %v5623_v31 = vld [vmem:[#allocation10 + $0x130] sm:$0xff]  }
0x1021   :  { %3981 = vmatpush1.bf16.msra.mxu1 %v5573_v32  ;;  %v5625_v32 = vld [vmem:[#allocation10 + $0x178] sm:$0xff]  }
0x1022   :  { %3982 = vmatprep.subr.bf16.mxu1 %v5581_v34  ;;  %v5627_v34 = vld [vmem:[#allocation10 + $0x138] sm:$0xff]  }
0x1025   :  { %3983 = vmatpush1.bf16.msra.mxu1 %v5579_v53  ;;  %v4729_v53 = vld [vmem:[%s6785_s11 + $0x4] sm:$0xf] }
0x1026   :  { %3984 = vmatprep.subr.bf16.mxu1 %v5587_v4  ;;  %v3799_v4 = vrot.slane %v4729_v53, %v6106_v55 }
0x1029   :  { %3985 = vmatpush1.bf16.msra.mxu1 %v5585_v24  ;;  %v3803_v24 = vrot.slane %v4729_v53, %v6115_v58 }
0x105a   :  { %v5376_v59 = vpop.permute.xlu1 %5375 }
0x105b   :  { %v5378_v0 = vunpack.i.h.bf16 %v5376_v59  ;;  %v5377_v9 = vunpack.i.l.bf16 %v5376_v59  ;;  %v5588_v59 = vld [vmem:[#allocation8 + $0x1c8] ss:$16 sps:$4 sm:$0xff]  }
0x105d   :  { %v3591_v40 = vsel %vm520_vm1, %v6636_v60, %v5378_v0  ;;  %v3590_v41 = vsel %vm520_vm1, %v6634_v44, %v5377_v9  ;;  %v4716_v60 = vld [vmem:[%s6781_s7 + $0x1] ss:$0 sm:$0xff]  ;;  %v5593_v0 = vld [vmem:[#allocation8 + $0x1e4] ss:$16 sps:$4 sm:$0xff]   ;;  %v5596_v9 = vld [vmem:[#allocation8 + $0x1ec] ss:$16 sps:$4 sm:$0xff]  }
0x105e   :  { %3986 = vmatprep.subr.bf16.mxu1 %v5593_v0 }
0x1088   :  { %v5381_v48 = vpop.permute.xlu0 %5380 }
0x1089   :  { %v5383_v35 = vunpack.i.h.bf16 %v5381_v48  ;;  %v5382_v37 = vunpack.i.l.bf16 %v5381_v48  ;;  %v5590_v48 = vld [vmem:[#allocation8 + $0x1cc] ss:$16 sps:$4 sm:$0xff]  }
0x108b   :  { %v3593_v8 = vsel %vm1445_vm4, %v3591_v40, %v5383_v35  ;;  %v3592_v38 = vsel %vm1445_vm4, %v3590_v41, %v5382_v37  ;;  %v5591_v35 = vld [vmem:[#allocation8 + $0x1e0] ss:$16 sps:$4 sm:$0xff]   ;;  %v5594_v37 = vld [vmem:[#allocation8 + $0x1e8] ss:$16 sps:$4 sm:$0xff]  }
0x108c   :  { %3987 = vmatpush1.bf16.msra.mxu1 %v5591_v35 }
0x1090   :  { %v5386_v39 = vpop.permute.xlu1 %5385 }
0x1091   :  { %v5388_v29 = vunpack.i.h.bf16 %v5386_v39  ;;  %v5387_v43 = vunpack.i.l.bf16 %v5386_v39 }
0x1093   :  { %v3595_v46 = vsel %vm1448_vm5, %v3593_v8, %v5388_v29  ;;  %v3594_v49 = vsel %vm1448_vm5, %v3592_v38, %v5387_v43 }
0x1094   :  { %v3596_v52 = vpack.c.bf16 %v3595_v46, %v3594_v49  ;;  %v4727_v49 = vld [vmem:[%s6782_s8 + $0x1] ss:$0 sm:$0xff] }
0x1096   :  { %5257 = vmatmul.mubr.bf16.vlgmr.msra.gmra.mrb[68].mxu0 %v3596_v52 }
0x1097   :  { %4047 = vmatprep.mubr.bf16.mxu0 %v5907_v30  ;;  %v5554_v30 = vld [vmem:[#allocation8 + $0x10c] ss:$16 sps:$4 sm:$0xff]  }
0x1098   :  { %4015 = vmatprep.subr.bf16.mxu0 %v5554_v30  ;;  %v5602_v30 = vld [vmem:[#allocation10 + $0x1c8] sm:$0xff]  }
0x1099   :  { %4016 = vmatpush1.bf16.msra.mxu0 %v5552_v10  ;;  %v5601_v10 = vld [vmem:[#allocation10 + $0x148] sm:$0xff]  }
0x109a   :  { %4017 = vmatprep.subr.bf16.mxu0 %v5560_v14  ;;  %v5604_v14 = vld [vmem:[#allocation10 + $0x188] sm:$0xff]  }
0x109d   :  { %4018 = vmatpush1.bf16.msra.mxu0 %v5558_v15  ;;  %v5606_v15 = vld [vmem:[#allocation10 + $0x1d0] sm:$0xff]  }
0x109e   :  { %4019 = vmatprep.subr.bf16.mxu0 %v5566_v23  ;;  %v5616_v23 = vld [vmem:[#allocation10 + $0x1a0] sm:$0xff]  }
0x10a1   :  { %4020 = vmatpush1.bf16.msra.mxu0 %v5564_v26  ;;  %v5618_v26 = vld [vmem:[#allocation10 + $0x1e8] sm:$0xff]  }
0x10a2   :  { %4021 = vmatprep.subr.bf16.mxu0 %v5572_v2  ;;  %v5620_v2 = vld [vmem:[#allocation10 + $0x1a8] sm:$0xff]  }
0x10a5   :  { %4022 = vmatpush1.bf16.msra.mxu0 %v5570_v28  ;;  %v5622_v28 = vld [vmem:[#allocation10 + $0x1f0] sm:$0xff]  }
0x10a6   :  { %4023 = vmatprep.subr.bf16.mxu0 %v5578_v16  ;;  %v5624_v16 = vld [vmem:[#allocation10 + $0x1b0] sm:$0xff]  }
0x10a9   :  { %4024 = vmatpush1.bf16.msra.mxu0 %v5576_v33  ;;  %v5626_v33 = vld [vmem:[#allocation10 + $0x1f8] sm:$0xff]  }
0x10aa   :  { %4025 = vmatprep.subr.bf16.mxu0 %v5584_v47  ;;  %v5628_v47 = vld [vmem:[#allocation10 + $0x1b8] sm:$0xff]  }
0x10ad   :  { %4026 = vmatpush1.bf16.msra.mxu0 %v5582_v56  ;;  %v3795_v56 = vrot.slane %v4729_v53, %v6112_v57 }
0x10ae   :  { %4027 = vmatprep.subr.bf16.mxu0 %v5590_v48 }
0x10b1   :  { %4028 = vmatpush1.bf16.msra.mxu0 %v5588_v59  ;;  %v3807_v59 = vrot.slane %v4729_v53, %v1655_v42 }
0x10b2   :  { %4029 = vmatprep.subr.bf16.mxu0 %v5596_v9 }
0x10b5   :  { %4030 = vmatpush1.bf16.msra.mxu0 %v5594_v37 }
0x1169   :  { %v3704_v61 = vpop.f32.mrb[68].mxu0 }
0x116a   :  { %v3705_v44 = vadd.f32 %v4716_v60, %v3704_v61  ;;  %v5258_v45 = vpop.f32.mrb[69].mxu0 }
0x116b   :  { %v3707_v5 = vpop.f32.mrb[70].mxu0 }
0x116c   :  { %v3708_v63 = vadd.f32 %v4716_v60, %v3707_v5  ;;  %v5259_v6 = vpop.f32.mrb[71].mxu0  ;;  %v3711_v1 = vadd.f32 %v3705_v44, %v6435_v36  ;;  %v4728_v44 = vld [vmem:[%s6783_s9 + $0x1] ss:$0 sm:$0xff] }
0x116e   :  { %3717 = vadd.xlane.f32.xlu0 %v3711_v1  ;;  %v3712_v62 = vadd.f32 %v3708_v63, %v6437_v12 }
0x1170   :  { %3719 = vadd.xlane.f32.xlu1 %v3712_v62 }
0x11fb   :  { %v3718_v36 = vpop.xlane.xlu0 %3717 }
0x11fc   :  { %v3721_v50 = vmul.f32 0.0078125, %v3718_v36  ;;  %v5607_v36 = vld [vmem:[#allocation10 + $0x110] sm:$0xff]  }
0x11fd   :  { %v3720_v12 = vpop.xlane.xlu1 %3719 }
0x11fe   :  { %v6662_v17 = vsub.f32 %v3711_v1, %v3721_v50  ;;  %v3722_v51 = vmul.f32 0.0078125, %v3720_v12  ;;  %v5597_v1 = vld [vmem:[#allocation10 + $0x140] sm:$0xff]   ;;  %v5608_v50 = vld [vmem:[#allocation10 + $0x190] sm:$0xff]   ;;  %v5609_v12 = vld [vmem:[#allocation10 + $0x158] sm:$0xff]  }
0x11ff   :  { %4944 = vmatprep.subr.bf16.mxu1 %v5597_v1 }
0x1200   :  { %v6664_v19 = vsub.f32 %v3712_v62, %v3722_v51  ;;  %v3725_v20 = vmul.f32 %v6662_v17, %v6662_v17  ;;  %v5598_v62 = vld [vmem:[#allocation10 + $0x1c0] sm:$0xff]   ;;  %v5611_v51 = vld [vmem:[#allocation10 + $0x118] sm:$0xff]  }
0x1201   :  { %4966 = vmatprep.subr.bf16.mxu0 %v5598_v62 }
0x1202   :  { %3727 = vadd.xlane.f32.xlu0 %v3725_v20  ;;  %v3726_v22 = vmul.f32 %v6664_v19, %v6664_v19  ;;  %v5613_v20 = vld [vmem:[#allocation10 + $0x160] sm:$0xff]  }
0x1206   :  { %3729 = vadd.xlane.f32.xlu0 %v3726_v22  ;;  %v5614_v22 = vld [vmem:[#allocation10 + $0x1e0] sm:$0xff]  }
0x128f   :  { %v3728_v39 = vpop.xlane.xlu0 %3727 }
0x1290   :  { %v3731_v40 = vmul.f32 0.0078125, %v3728_v39 }
0x1292   :  { %v3733_v41 = vadd.f32 1e-12, %v3731_v40 }
0x1293   :  { %v3730_v29 = vpop.xlane.xlu0 %3729 }
0x1294   :  { %5721 = vrsqrt.f32 %v3733_v41  ;;  %v3732_v43 = vmul.f32 0.0078125, %v3730_v29 }
0x1296   :  { %v3734_v8 = vadd.f32 1e-12, %v3732_v43 }
0x1298   :  { %5723 = vrsqrt.f32 %v3734_v8 }
0x129e   :  { %v5722_v38 = vpop.eup %5721 }
0x129f   :  { %v3737_v46 = vmul.f32 %v5722_v38, %v6662_v17  ;;  %v5610_v17 = vld [vmem:[#allocation10 + $0x1d8] sm:$0xff]  }
0x12a1   :  { %v3745_v61 = vmul.f32 %v4727_v49, %v3737_v46 }
0x12a2   :  { %v5724_v52 = vpop.eup %5723 }
0x12a3   :  { %v3738_v60 = vmul.f32 %v5724_v52, %v6664_v19  ;;  %v6678_v5 = vadd.f32 %v4728_v44, %v3745_v61  ;;  %v5612_v19 = vld [vmem:[#allocation10 + $0x198] sm:$0xff]  }
0x12a5   :  { %v3746_v45 = vmul.f32 %v4727_v49, %v3738_v60 }
0x12a7   :  { %v6680_v63 = vadd.f32 %v4728_v44, %v3746_v45 }
0x12a9   :  { %v3755_v6 = vpack.c.bf16 %v6680_v63, %v6678_v5 }
0x12ab   :  { %4005 = vmatmul.mubr.bf16.vlgmr.msra.gmra.mrb[96].mxu1 %v3755_v6  ;;  %4048 = vmatmul.mubr.bf16.vlgmr.msra.gmra.mrb[72].mxu0 %v3755_v6 }
0x12ac   :  { %4945 = vmatpush3.bf16.msra.mxu1 %v5599_v3  ;;  %4967 = vmatpush3.bf16.msra.mxu0 %v5600_v7 }
0x12ad   :  { %4946 = vmatprep.subr.bf16.mxu1 %v5601_v10  ;;  %4968 = vmatprep.subr.bf16.mxu0 %v5602_v30 }
0x12b0   :  { %4947 = vmatpush3.bf16.msra.mxu1 %v5603_v11  ;;  %4969 = vmatpush3.bf16.msra.mxu0 %v5604_v14 }
0x12b1   :  { %4948 = vmatprep.subr.bf16.mxu1 %v5605_v18  ;;  %4970 = vmatprep.subr.bf16.mxu0 %v5606_v15 }
0x12b4   :  { %4949 = vmatpush3.bf16.msra.mxu1 %v5607_v36  ;;  %4971 = vmatpush3.bf16.msra.mxu0 %v5608_v50 }
0x12b5   :  { %4950 = vmatprep.subr.bf16.mxu1 %v5609_v12  ;;  %4972 = vmatprep.subr.bf16.mxu0 %v5610_v17 }
0x12b8   :  { %4951 = vmatpush3.bf16.msra.mxu1 %v5611_v51  ;;  %4973 = vmatpush3.bf16.msra.mxu0 %v5612_v19 }
0x12b9   :  { %4952 = vmatprep.subr.bf16.mxu1 %v5613_v20  ;;  %4974 = vmatprep.subr.bf16.mxu0 %v5614_v22 }
0x12bc   :  { %4953 = vmatpush3.bf16.msra.mxu1 %v5615_v13  ;;  %4975 = vmatpush3.bf16.msra.mxu0 %v5616_v23 }
0x12bd   :  { %4954 = vmatprep.subr.bf16.mxu1 %v5617_v25  ;;  %4976 = vmatprep.subr.bf16.mxu0 %v5618_v26 }
0x12c0   :  { %4955 = vmatpush3.bf16.msra.mxu1 %v5619_v27  ;;  %4977 = vmatpush3.bf16.msra.mxu0 %v5620_v2 }
0x12c1   :  { %4956 = vmatprep.subr.bf16.mxu1 %v5621_v21  ;;  %4978 = vmatprep.subr.bf16.mxu0 %v5622_v28 }
0x12c4   :  { %4957 = vmatpush3.bf16.msra.mxu1 %v5623_v31  ;;  %4979 = vmatpush3.bf16.msra.mxu0 %v5624_v16 }
0x12c5   :  { %4958 = vmatprep.subr.bf16.mxu1 %v5625_v32  ;;  %4980 = vmatprep.subr.bf16.mxu0 %v5626_v33 }
0x12c8   :  { %4959 = vmatpush3.bf16.msra.mxu1 %v5627_v34  ;;  %4981 = vmatpush3.bf16.msra.mxu0 %v5628_v47 }
0x137e   :  { %v4006_v48 = vpop.f32.mrb[96].mxu1  ;;  %v4049_v0 = vpop.f32.mrb[72].mxu0 }
0x137f   :  { %v6692_v9 = vadd.f32 %v4006_v48, %v3795_v56  ;;  %v6694_v35 = vadd.f32 %v4049_v0, %v3803_v24  ;;  %v4008_v37 = vpop.f32.mrb[97].mxu1  ;;  %v4051_v39 = vpop.f32.mrb[73].mxu0 }
0x1380   :  { %v6696_v40 = vadd.f32 %v4008_v37, %v3799_v4  ;;  %v6698_v41 = vadd.f32 %v4051_v39, %v3807_v59  ;;  %v4010_v57 = vpop.f32.mrb[98].mxu1  ;;  %v4053_v29 = vpop.f32.mrb[74].mxu0 }
0x1381   :  { %v4058_v55 = vmul.f32 %v6692_v9, %v6692_v9  ;;  %v4060_v54 = vmul.f32 %v6694_v35, %v6694_v35  ;;  %v6704_v58 = vadd.f32 %v4010_v57, %v3795_v56  ;;  %v6706_v42 = vadd.f32 %v4053_v29, %v3803_v24  ;;  %v4012_v43 = vpop.f32.mrb[99].mxu1  ;;  %v4055_v8 = vpop.f32.mrb[75].mxu0 }
0x1382   :  { %v4059_v38 = vmul.f32 %v6696_v40, %v6696_v40  ;;  %v4061_v46 = vmul.f32 %v6698_v41, %v6698_v41  ;;  %v6712_v49 = vadd.f32 %v4012_v43, %v3799_v4  ;;  %v6714_v52 = vadd.f32 %v4055_v8, %v3807_v59 }
0x1383   :  { %v4066_v60 = vmul.f32 %v4058_v55, %v6692_v9  ;;  %v4068_v61 = vmul.f32 %v4060_v54, %v6694_v35  ;;  %v4062_v44 = vmul.f32 %v6704_v58, %v6704_v58  ;;  %v4064_v45 = vmul.f32 %v6706_v42, %v6706_v42 }
0x1384   :  { %v4067_v6 = vmul.f32 %v4059_v38, %v6696_v40  ;;  %v4069_v1 = vmul.f32 %v4061_v46, %v6698_v41  ;;  %v4063_v62 = vmul.f32 %v6712_v49, %v6712_v49  ;;  %v4065_v3 = vmul.f32 %v6714_v52, %v6714_v52 }
0x1385   :  { %v4074_v7 = vmul.f32 0.044715, %v4066_v60  ;;  %v4076_v10 = vmul.f32 0.044715, %v4068_v61  ;;  %v4070_v30 = vmul.f32 %v4062_v44, %v6704_v58  ;;  %v4072_v11 = vmul.f32 %v4064_v45, %v6706_v42 }
0x1386   :  { %v4075_v14 = vmul.f32 0.044715, %v4067_v6  ;;  %v4077_v18 = vmul.f32 0.044715, %v4069_v1  ;;  %v4071_v15 = vmul.f32 %v4063_v62, %v6712_v49  ;;  %v4073_v36 = vmul.f32 %v4065_v3, %v6714_v52 }
0x1387   :  { %v4082_v50 = vadd.f32 %v4074_v7, %v6692_v9  ;;  %v4084_v12 = vadd.f32 %v4076_v10, %v6694_v35  ;;  %v4078_v17 = vmul.f32 0.044715, %v4070_v30  ;;  %v4080_v51 = vmul.f32 0.044715, %v4072_v11 }
0x1388   :  { %v4083_v19 = vadd.f32 %v4075_v14, %v6696_v40  ;;  %v4085_v20 = vadd.f32 %v4077_v18, %v6698_v41  ;;  %v4079_v22 = vmul.f32 0.044715, %v4071_v15  ;;  %v4081_v13 = vmul.f32 0.044715, %v4073_v36 }
0x1389   :  { %v4090_v23 = vmul.f32 0.7978846, %v4082_v50  ;;  %v4092_v25 = vmul.f32 0.7978846, %v4084_v12  ;;  %v4086_v26 = vadd.f32 %v4078_v17, %v6704_v58  ;;  %v4088_v27 = vadd.f32 %v4080_v51, %v6706_v42 }
0x138a   :  { %v4091_v2 = vmul.f32 0.7978846, %v4083_v19  ;;  %v4093_v21 = vmul.f32 0.7978846, %v4085_v20  ;;  %v4087_v28 = vadd.f32 %v4079_v22, %v6712_v49  ;;  %v4089_v31 = vadd.f32 %v4081_v13, %v6714_v52 }
0x138b   :  { %5725 = vtanh.f32 %v4090_v23  ;;  %v4094_v16 = vmul.f32 0.7978846, %v4086_v26  ;;  %v4096_v32 = vmul.f32 0.7978846, %v4088_v27 }
0x138c   :  { %5727 = vtanh.f32 %v4092_v25  ;;  %v4095_v33 = vmul.f32 0.7978846, %v4087_v28  ;;  %v4097_v34 = vmul.f32 0.7978846, %v4089_v31 }
0x138d   :  { %5729 = vtanh.f32 %v4091_v2 }
0x138e   :  { %5731 = vtanh.f32 %v4093_v21 }
0x138f   :  { %5733 = vtanh.f32 %v4094_v16 }
0x1390   :  { %5735 = vtanh.f32 %v4096_v32 }
0x1391   :  { %5737 = vtanh.f32 %v4095_v33 }
0x1392   :  { %5739 = vtanh.f32 %v4097_v34 }
0x1395   :  { %v5726_v47 = vpop.eup %5725 }
0x1396   :  { %v5728_v53 = vpop.eup %5727  ;;  %v4106_v56 = vadd.f32 1.0, %v5726_v47 }
0x1397   :  { %v5730_v24 = vpop.eup %5729  ;;  %v4108_v4 = vadd.f32 1.0, %v5728_v53 }
0x1398   :  { %v5732_v59 = vpop.eup %5731  ;;  %v4107_v48 = vadd.f32 1.0, %v5730_v24  ;;  %v4114_v57 = vmul.f32 0.5, %v4106_v56 }
0x1399   :  { %v5734_v0 = vpop.eup %5733  ;;  %v4109_v37 = vadd.f32 1.0, %v5732_v59  ;;  %v4116_v54 = vmul.f32 0.5, %v4108_v4 }
0x139a   :  { %v5736_v39 = vpop.eup %5735  ;;  %v4110_v29 = vadd.f32 1.0, %v5734_v0  ;;  %v4115_v60 = vmul.f32 0.5, %v4107_v48  ;;  %v4122_v6 = vmul.f32 %v4114_v57, %v6692_v9  ;;  %v4798_v48 = vld [vmem:[%s6788_s14 + $0x1] ss:$0 sm:$0xff] }
0x139b   :  { %v5738_v55 = vpop.eup %5737  ;;  %v4112_v43 = vadd.f32 1.0, %v5736_v39  ;;  %v4117_v45 = vmul.f32 0.5, %v4109_v37  ;;  %v4124_v3 = vmul.f32 %v4116_v54, %v6694_v35  ;;  %v4799_v39 = vld [vmem:[%s6789_s15 + $0x1] ss:$0 sm:$0xff] }
0x139c   :  { %v5740_v8 = vpop.eup %5739  ;;  %v4118_v38 = vmul.f32 0.5, %v4110_v29  ;;  %v4111_v46 = vadd.f32 1.0, %v5738_v55  ;;  %v4123_v30 = vmul.f32 %v4115_v60, %v6696_v40  ;;  %v4763_v40 = vld [vmem:[%s6787_s13 + $0x1] ss:$0 sm:$0xff] }
0x139d   :  { %v4120_v61 = vmul.f32 0.5, %v4112_v43  ;;  %v4113_v44 = vadd.f32 1.0, %v5740_v8  ;;  %v4125_v18 = vmul.f32 %v4117_v45, %v6698_v41 }
0x139e   :  { %v4126_v1 = vmul.f32 %v4118_v38, %v6704_v58  ;;  %v4119_v62 = vmul.f32 0.5, %v4111_v46 }
0x139f   :  { %v4128_v7 = vmul.f32 %v4120_v61, %v6706_v42  ;;  %v4121_v10 = vmul.f32 0.5, %v4113_v44 }
0x13a0   :  { %v4127_v11 = vmul.f32 %v4119_v62, %v6712_v49  ;;  %v4130_v14 = vpack.c.bf16 %v4126_v1, %v4122_v6 }
0x13a1   :  { %v4129_v15 = vmul.f32 %v4121_v10, %v6714_v52  ;;  %v4132_v36 = vpack.c.bf16 %v4128_v7, %v4124_v3 }
0x13a2   :  { %v4131_v50 = vpack.c.bf16 %v4127_v11, %v4123_v30 }
0x13a3   :  { %v4133_v9 = vpack.c.bf16 %v4129_v15, %v4125_v18 }
0x13a4   :  { %4431 = vmatprep.mubr.bf16.mxu1 %v4131_v50 }
0x13a5   :  { %4472 = vmatprep.mubr.bf16.mxu0 %v4133_v9  ;;  %4432 = vmatmul.mubr.bf16.vlgmr.msra.gmra.mrb[100].mxu1 %v4130_v14 }
0x13a6   :  { %4473 = vmatmul.mubr.bf16.vlgmr.msra.gmra.mrb[76].mxu0 %v4132_v36 }
0x1478   :  { %v4960_v35 = vpop.f32.mrb[100].mxu1 }
0x1479   :  { %v4982_v58 = vpop.f32.mrb[76].mxu0  ;;  %v4961_v42 = vpop.f32.mrb[101].mxu1 }
0x147a   :  { %v4962_v49 = vadd.f32 %v4961_v42, %v4960_v35  ;;  %v4983_v12 = vpop.f32.mrb[77].mxu0  ;;  %v4963_v17 = vpop.f32.mrb[102].mxu1 }
0x147b   :  { %v4984_v41 = vadd.f32 %v4983_v12, %v4982_v58  ;;  %v4985_v51 = vpop.f32.mrb[78].mxu0  ;;  %v4964_v52 = vpop.f32.mrb[103].mxu1 }
0x147c   :  { %v4434_v19 = vadd.f32 %v4962_v49, %v4763_v40  ;;  %v4965_v20 = vadd.f32 %v4964_v52, %v4963_v17  ;;  %v4986_v22 = vpop.f32.mrb[79].mxu0 }
0x147d   :  { %v4987_v13 = vadd.f32 %v4986_v22, %v4985_v51 }
0x147e   :  { %v4475_v23 = vadd.f32 %v4984_v41, %v4434_v19  ;;  %v4437_v25 = vadd.f32 %v4965_v20, %v4763_v40 }
0x1480   :  { %v4478_v26 = vadd.f32 %v4987_v13, %v4437_v25  ;;  %v4481_v27 = vadd.f32 %v4475_v23, %v6678_v5 }
0x1482   :  { %4487 = vadd.xlane.f32.xlu0 %v4481_v27  ;;  %v4482_v2 = vadd.f32 %v4478_v26, %v6680_v63 }
0x1484   :  { %4489 = vadd.xlane.f32.xlu1 %v4482_v2 }
0x150f   :  { %v4488_v21 = vpop.xlane.xlu0 %4487 }
0x1510   :  { %v4491_v28 = vmul.f32 0.0078125, %v4488_v21 }
0x1511   :  { %v4490_v31 = vpop.xlane.xlu1 %4489 }
0x1512   :  { %v4493_v16 = vsub.f32 %v4481_v27, %v4491_v28  ;;  %v4492_v32 = vmul.f32 0.0078125, %v4490_v31 }
0x1514   :  { %v4494_v33 = vsub.f32 %v4482_v2, %v4492_v32  ;;  %v4495_v34 = vmul.f32 %v4493_v16, %v4493_v16 }
0x1516   :  { %4497 = vadd.xlane.f32.xlu0 %v4495_v34  ;;  %v4496_v47 = vmul.f32 %v4494_v33, %v4494_v33 }
0x1518   :  { %4499 = vadd.xlane.f32.xlu1 %v4496_v47 }
0x15a3   :  { %v4498_v53 = vpop.xlane.xlu0 %4497 }
0x15a4   :  { %v4501_v56 = vmul.f32 0.0078125, %v4498_v53 }
0x15a5   :  { %v4500_v24 = vpop.xlane.xlu1 %4499 }
0x15a6   :  { %v4503_v4 = vadd.f32 1e-12, %v4501_v56  ;;  %v4502_v59 = vmul.f32 0.0078125, %v4500_v24 }
0x15a8   :  { %5741 = vrsqrt.f32 %v4503_v4  ;;  %v4504_v5 = vadd.f32 1e-12, %v4502_v59 }
0x15aa   :  { %5743 = vrsqrt.f32 %v4504_v5 }
0x15b2   :  { %v5742_v63 = vpop.eup %5741 }
0x15b3   :  { %v4507_v0 = vmul.f32 %v5742_v63, %v4493_v16 }
0x15b4   :  { %v5744_v37 = vpop.eup %5743 }
0x15b5   :  { %v4508_v57 = vmul.f32 %v5744_v37, %v4494_v33  ;;  %v4515_v29 = vmul.f32 %v4798_v48, %v4507_v0 }
0x15b7   :  { %v4516_v55 = vmul.f32 %v4798_v48, %v4508_v57  ;;  %v4523_v54 = vadd.f32 %v4799_v39, %v4515_v29 }
0x15b9   :  { %v4524_v43 = vadd.f32 %v4799_v39, %v4516_v55  ;;  %4525 = vst [vmem:[#allocation11] sm:$0xff] %v4523_v54 }
0x15bb   :  { %4526 = vst [vmem:[#allocation11 + $0x8] sm:$0xff] %v4524_v43 }
0x15bc   :  { %5874 = shalt.err (!%p5871_p2)
}
0x15bd   :  { %s5875_s15 = scalar_lea.hbm %s6790_s16, 256 }
0x15be   :  { %p5876_p3 = scmp.ne.s32.totalorder %s6790_s16, %s5875_s15  ;;  %p5879_p4 = scmp.lt.u32.totalorder %s5875_s15, %s6790_s16 }
0x15c0   :  { %p5881_p5 = pnand %p5879_p4, %p5876_p3 }
0x15c2   :  { %5884 = shalt.err (!%p5881_p5)
}
0x15c3   :  { %4538 = dma.vmem_to_hbm [thread:$0]  %s4533_s26, 256, %s6790_s16, [#allocation4], %s5900_s10, %s5900_s10, %s5901_s21  }
0x15c4   :  { %5891 = dma.done.wait [#allocation4], 256  }
0x15c5   :  { %5892 = vsyncadd [#allocation4], 4294967040 }
0x15c6   :  { %4542 = vsyncpa [#allocation3], 1 }
0x15c7   :  { %4543 = vsyncpa [#allocation6], 1 }
0x15c8   :  { %4544 = vsyncpa [#allocation9], 1 }
0x15c9   :  { %4545 = vsyncpa [#allocation4], 1 }

</bundles_post_ra>
